<compile_context>
chip_gen: v7x
topology: tpu7x:2x2x1
jax: 0.10.0
libtpu: 0.0.40
codegen_flags: <defaults>
</compile_context>

<pallas_src>
import functools
import math

import jax
import jax.numpy as jnp
from jax.experimental import pallas as pl
from jax.experimental.pallas import tpu as pltpu


# ---------------------------------------------------------------------------
# In-kernel helpers (f32 statistics, bf16 matmul operands, f32 accumulation)
# ---------------------------------------------------------------------------
def _ln(x, g, b, eps=1e-5):
    mu = jnp.mean(x, axis=-1, keepdims=True)
    xc = x - mu
    var = jnp.mean(xc * xc, axis=-1, keepdims=True)
    return xc * jax.lax.rsqrt(var + eps) * g + b


def _mha(q, k, v, bias, wo_ref, num_heads, scale):
    """Head-looped attention on lane-dense (rows, C) slabs.

    q: (Tq, C) f32, k/v: (Tk, C) f32, bias: additive f32 broadcastable to
    (Tq, Tk).  Returns concat_h(softmax(q_h k_h^T * scale + bias) v_h) @ Wo,
    computed as sum_h o_h @ Wo[h*Dh:(h+1)*Dh, :] (no concatenate needed).
    """
    Tq, C = q.shape
    Dh = C // num_heads
    out = jnp.zeros((Tq, C), jnp.float32)
    for h in range(num_heads):
        lo, hi = h * Dh, (h + 1) * Dh
        qh = q[:, lo:hi].astype(jnp.bfloat16)
        kh = k[:, lo:hi].astype(jnp.bfloat16)
        vh = v[:, lo:hi].astype(jnp.bfloat16)
        # q @ k^T without materializing a transpose (NT dot_general).
        s = jax.lax.dot_general(qh, kh, (((1,), (1,)), ((), ())),
                                preferred_element_type=jnp.float32) * scale
        s = s + bias
        m = jnp.max(s, axis=-1, keepdims=True)
        p = jnp.exp(s - m)
        p = p * pl.reciprocal(jnp.sum(p, axis=-1, keepdims=True), approx=True)
        oh = jnp.dot(p.astype(jnp.bfloat16), vh,
                     preferred_element_type=jnp.float32)
        out = out + jnp.dot(oh.astype(jnp.bfloat16), wo_ref[lo:hi, :],
                            preferred_element_type=jnp.float32)
    return out


# ---------------------------------------------------------------------------
# Fused decoder-layer kernel: one grid step = one batch element.
# ---------------------------------------------------------------------------
def _decoder_layer_kernel(x_ref, enc_ref, kp_ref,
                          ln1_g, ln1_b, wqkv, bqkv, wo1, bo1,
                          ln2_g, ln2_b, wq2, bq2, wkv2, bkv2, wo2, bo2,
                          ln3_g, ln3_b, w1, b1, w2, b2,
                          o_ref, *, num_heads):
    C = x_ref.shape[-1]
    Dh = C // num_heads
    scale = 1.0 / math.sqrt(Dh)

    x = x_ref[0]            # (Tt, C) f32
    enc = enc_ref[0]        # (Ts, C) f32
    kp = kp_ref[0]          # (1, Ts) additive key-padding bias (f32)
    Tt = x.shape[0]

    # ---- self-attention (causal mask generated in-kernel) ----
    h = _ln(x, ln1_g[...], ln1_b[...])
    qkv = jnp.dot(h.astype(jnp.bfloat16), wqkv[...],
                  preferred_element_type=jnp.float32) + bqkv[...]
    rows = jax.lax.broadcasted_iota(jnp.int32, (Tt, Tt), 0)
    cols = jax.lax.broadcasted_iota(jnp.int32, (Tt, Tt), 1)
    causal = jnp.where(cols > rows, -1e9, 0.0).astype(jnp.float32)
    x = x + _mha(qkv[:, :C], qkv[:, C:2 * C], qkv[:, 2 * C:],
                 causal, wo1, num_heads, scale) + bo1[...]

    # ---- cross-attention over the ASR encoder output ----
    h = _ln(x, ln2_g[...], ln2_b[...])
    q = jnp.dot(h.astype(jnp.bfloat16), wq2[...],
                preferred_element_type=jnp.float32) + bq2[...]
    kv = jnp.dot(enc.astype(jnp.bfloat16), wkv2[...],
                 preferred_element_type=jnp.float32) + bkv2[...]
    x = x + _mha(q, kv[:, :C], kv[:, C:], kp, wo2, num_heads, scale) + bo2[...]

    # ---- feed-forward ----
    h = _ln(x, ln3_g[...], ln3_b[...])
    h = jnp.dot(h.astype(jnp.bfloat16), w1[...],
                preferred_element_type=jnp.float32) + b1[...]
    h = jnp.maximum(h, 0.0)
    h = jnp.dot(h.astype(jnp.bfloat16), w2[...],
                preferred_element_type=jnp.float32) + b2[...]
    o_ref[0] = (x + h).astype(o_ref.dtype)


_LAYER_PARAM_ORDER = ("ln1_g", "ln1_b", "wqkv", "bqkv", "wo1", "bo1",
                      "ln2_g", "ln2_b", "wq2", "bq2", "wkv2", "bkv2",
                      "wo2", "bo2",
                      "ln3_g", "ln3_b", "w1", "b1", "w2", "b2")


def decoder_layer_pallas(x, enc, kp_bias, lp, num_heads):
    B, Tt, C = x.shape
    Ts = enc.shape[1]
    plist = [lp[n] for n in _LAYER_PARAM_ORDER]

    def full2d(arr):
        return pl.BlockSpec(arr.shape, lambda b: (0, 0))

    return pl.pallas_call(
        functools.partial(_decoder_layer_kernel, num_heads=num_heads),
        out_shape=jax.ShapeDtypeStruct((B, Tt, C), x.dtype),
        grid=(B,),
        in_specs=[pl.BlockSpec((1, Tt, C), lambda b: (b, 0, 0)),
                  pl.BlockSpec((1, Ts, C), lambda b: (b, 0, 0)),
                  pl.BlockSpec((1, 1, Ts), lambda b: (b, 0, 0))]
                 + [full2d(a) for a in plist],
        out_specs=pl.BlockSpec((1, Tt, C), lambda b: (b, 0, 0)),
        compiler_params=pltpu.CompilerParams(
            dimension_semantics=("parallel",)),
    )(x, enc, kp_bias, *plist)


# ---------------------------------------------------------------------------
# Fused final LayerNorm + tied output projection (x @ embed^T via NT dot).
# ---------------------------------------------------------------------------
def _final_kernel(x_ref, g_ref, b_ref, emb_ref, feat_ref, logit_ref):
    h = _ln(x_ref[0], g_ref[...], b_ref[...])
    feat_ref[0] = h.astype(feat_ref.dtype)
    logit_ref[0] = jax.lax.dot_general(
        h.astype(jnp.bfloat16), emb_ref[...], (((1,), (1,)), ((), ())),
        preferred_element_type=jnp.float32).astype(logit_ref.dtype)


def final_output_pallas(x, lnf_g, lnf_b, embed):
    B, Tt, C = x.shape
    V = embed.shape[0]
    return pl.pallas_call(
        _final_kernel,
        out_shape=(jax.ShapeDtypeStruct((B, Tt, C), jnp.float32),
                   jax.ShapeDtypeStruct((B, Tt, V), jnp.float32)),
        grid=(B,),
        in_specs=[pl.BlockSpec((1, Tt, C), lambda b: (b, 0, 0)),
                  pl.BlockSpec((1, C), lambda b: (0, 0)),
                  pl.BlockSpec((1, C), lambda b: (0, 0)),
                  pl.BlockSpec((V, C), lambda b: (0, 0))],
        out_specs=(pl.BlockSpec((1, Tt, C), lambda b: (b, 0, 0)),
                   pl.BlockSpec((1, Tt, V), lambda b: (b, 0, 0))),
        compiler_params=pltpu.CompilerParams(
            dimension_semantics=("parallel",)),
    )(x, lnf_g, lnf_b, embed)


# ---------------------------------------------------------------------------
# ATDecoderAdapter.forward  ->  (feature, logits)
# ---------------------------------------------------------------------------
def at_decoder_adapter_forward(params, asr_output, adapter_input, prev_encoder,
                               *, pad, num_heads):
    B, Ts, C = asr_output.shape
    Tt = prev_encoder.shape[1]

    # encoder_padding_mask -> tiny additive cross-attention bias (B, 1, Ts).
    kp_bias = jnp.where(adapter_input == pad, -1e9, 0.0).astype(jnp.float32)
    kp_bias = kp_bias.reshape(B, 1, Ts)

    # Token embedding gather (replaces one-hot @ table) + learned positions.
    emb = jnp.take(params["embed"], prev_encoder, axis=0).astype(jnp.float32)
    x = emb * math.sqrt(C) + params["pos"][None, :Tt, :]
    x = x.astype(jnp.float32)
    asr = asr_output.astype(jnp.float32)

    for lp in params["layers"]:
        x = decoder_layer_pallas(x, asr, kp_bias, lp, num_heads)

    feature, logits = final_output_pallas(
        x, params["lnf_g"], params["lnf_b"], params["embed"])
    return feature, logits


# ---------------------------------------------------------------------------
# Pure-JAX reference with identical math (bf16 matmuls, f32 accumulation).
# ---------------------------------------------------------------------------
def at_decoder_adapter_reference(params, asr_output, adapter_input,
                                 prev_encoder, *, pad, num_heads):
    B, Ts, C = asr_output.shape
    Tt = prev_encoder.shape[1]
    Dh = C // num_heads
    scale = 1.0 / math.sqrt(Dh)

    def ln(x, g, b, eps=1e-5):
        mu = jnp.mean(x, axis=-1, keepdims=True)
        xc = x - mu
        var = jnp.mean(xc * xc, axis=-1, keepdims=True)
        return xc * jax.lax.rsqrt(var + eps) * g + b

    def mha(q, k, v, bias, wo):
        out = jnp.zeros(q.shape, jnp.float32)
        for h in range(num_heads):
            sl = slice(h * Dh, (h + 1) * Dh)
            qh = q[..., sl].astype(jnp.bfloat16)
            kh = k[..., sl].astype(jnp.bfloat16)
            vh = v[..., sl].astype(jnp.bfloat16)
            s = jnp.einsum("bqd,bkd->bqk", qh, kh,
                           preferred_element_type=jnp.float32) * scale
            s = s + bias
            p = jax.nn.softmax(s, axis=-1)
            oh = jnp.einsum("bqk,bkd->bqd", p.astype(jnp.bfloat16), vh,
                            preferred_element_type=jnp.float32)
            out = out + jnp.einsum("bqd,dc->bqc", oh.astype(jnp.bfloat16),
                                   wo[sl, :],
                                   preferred_element_type=jnp.float32)
        return out

    kp_bias = jnp.where(adapter_input == pad, -1e9,
                        0.0).astype(jnp.float32)[:, None, :]
    causal = jnp.where(jnp.arange(Tt)[None, :] > jnp.arange(Tt)[:, None],
                       -1e9, 0.0).astype(jnp.float32)

    emb = jnp.take(params["embed"], prev_encoder, axis=0).astype(jnp.float32)
    x = emb * math.sqrt(C) + params["pos"][None, :Tt, :]
    asr = asr_output.astype(jnp.float32)

    for lp in params["layers"]:
        h = ln(x, lp["ln1_g"], lp["ln1_b"])
        qkv = jnp.einsum("btc,cd->btd", h.astype(jnp.bfloat16), lp["wqkv"],
                         preferred_element_type=jnp.float32) + lp["bqkv"]
        x = x + mha(qkv[..., :C], qkv[..., C:2 * C], qkv[..., 2 * C:],
                    causal, lp["wo1"]) + lp["bo1"]

        h = ln(x, lp["ln2_g"], lp["ln2_b"])
        q = jnp.einsum("btc,cd->btd", h.astype(jnp.bfloat16), lp["wq2"],
                       preferred_element_type=jnp.float32) + lp["bq2"]
        kv = jnp.einsum("bsc,cd->bsd", asr.astype(jnp.bfloat16), lp["wkv2"],
                        preferred_element_type=jnp.float32) + lp["bkv2"]
        x = x + mha(q, kv[..., :C], kv[..., C:], kp_bias,
                    lp["wo2"]) + lp["bo2"]

        h = ln(x, lp["ln3_g"], lp["ln3_b"])
        h = jnp.einsum("btc,cf->btf", h.astype(jnp.bfloat16), lp["w1"],
                       preferred_element_type=jnp.float32) + lp["b1"]
        h = jnp.maximum(h, 0.0)
        h = jnp.einsum("btf,fc->btc", h.astype(jnp.bfloat16), lp["w2"],
                       preferred_element_type=jnp.float32) + lp["b2"]
        x = x + h

    h = ln(x, params["lnf_g"], params["lnf_b"])
    logits = jnp.einsum("btc,vc->btv", h.astype(jnp.bfloat16),
                        params["embed"], preferred_element_type=jnp.float32)
    return h, logits


# ---------------------------------------------------------------------------
# Parameter init (init_bert_params style: N(0, 0.02) weights, zero biases).
# Matmul weights stored bf16; LN params / biases / positions stored f32.
# ---------------------------------------------------------------------------
def init_params(key, *, vocab, dim, ffn_dim, num_layers, max_tgt_len):
    keys = iter(jax.random.split(key, 4 + num_layers * 8))

    def dense(shape, dtype=jnp.bfloat16):
        return (0.02 * jax.random.normal(next(keys), shape,
                                         jnp.float32)).astype(dtype)

    def zeros(shape):
        return jnp.zeros(shape, jnp.float32)

    def ones(shape):
        return jnp.ones(shape, jnp.float32)

    layers = []
    for _ in range(num_layers):
        layers.append({
            "ln1_g": ones((1, dim)), "ln1_b": zeros((1, dim)),
            "wqkv": dense((dim, 3 * dim)), "bqkv": zeros((1, 3 * dim)),
            "wo1": dense((dim, dim)), "bo1": zeros((1, dim)),
            "ln2_g": ones((1, dim)), "ln2_b": zeros((1, dim)),
            "wq2": dense((dim, dim)), "bq2": zeros((1, dim)),
            "wkv2": dense((dim, 2 * dim)), "bkv2": zeros((1, 2 * dim)),
            "wo2": dense((dim, dim)), "bo2": zeros((1, dim)),
            "ln3_g": ones((1, dim)), "ln3_b": zeros((1, dim)),
            "w1": dense((dim, ffn_dim)), "b1": zeros((1, ffn_dim)),
            "w2": dense((ffn_dim, dim)), "b2": zeros((1, dim)),
        })
    return {
        "embed": dense((vocab, dim)),                    # tied in/out embedding
        "pos": dense((max_tgt_len, dim), jnp.float32),   # learned positions
        "lnf_g": ones((1, dim)), "lnf_b": zeros((1, dim)),
        "layers": layers,
    }


if __name__ == "__main__":
    B, Ts, Tt = 2, 16, 8          # batch, source (ASR) length, target length
    C, H, FFN, V, L = 128, 4, 256, 256, 2
    PAD = 1

    root = jax.random.PRNGKey(0)
    k_param, k_asr, k_src, k_tgt = jax.random.split(root, 4)

    params = init_params(k_param, vocab=V, dim=C, ffn_dim=FFN,
                         num_layers=L, max_tgt_len=Tt)
    asr_output = jax.random.normal(k_asr, (B, Ts, C), jnp.float32)
    adapter_input = jax.random.randint(k_src, (B, Ts), 2, V)
    # Pad the tail of sequence 1 to exercise the encoder_padding_mask path.
    pad_tail = jnp.arange(Ts) >= Ts - 4
    adapter_input = adapter_input.at[1].set(
        jnp.where(pad_tail, PAD, adapter_input[1]))
    prev_encoder = jax.random.randint(k_tgt, (B, Tt), 2, V)

    fwd = jax.jit(functools.partial(at_decoder_adapter_forward,
                                    pad=PAD, num_heads=H))
    feature, logits = fwd(params, asr_output, adapter_input, prev_encoder)
    feature, logits = jax.block_until_ready((feature, logits))

    ref_feature, ref_logits = at_decoder_adapter_reference(
        params, asr_output, adapter_input, prev_encoder, pad=PAD, num_heads=H)

    assert feature.shape == (B, Tt, C) and logits.shape == (B, Tt, V)
    assert bool(jnp.isfinite(feature).all()) and bool(jnp.isfinite(logits).all())
    assert bool(jnp.allclose(feature, ref_feature, atol=2e-2, rtol=2e-2))
    assert bool(jnp.allclose(logits, ref_logits, atol=2e-2, rtol=2e-2))
    print("KERNEL_OK")
</pallas_src>

<mosaic_0001>
module attributes {stable_mosaic.version = 11 : i64} {
  func.func @_final_kernel(%arg0: i32, %arg1: memref<1x8x128xf32, #tpu.memory_space<vmem>>, %arg2: memref<1x128xf32, #tpu.memory_space<vmem>>, %arg3: memref<1x128xf32, #tpu.memory_space<vmem>>, %arg4: memref<256x128xbf16, #tpu.memory_space<vmem>>, %arg5: memref<1x8x128xf32, #tpu.memory_space<vmem>>, %arg6: memref<1x8x256xf32, #tpu.memory_space<vmem>>) attributes {dimension_semantics = [#tpu.dimension_semantics<parallel>], iteration_bounds = array<i64: 2>, scalar_prefetch = 0 : i64, scratch_operands = 0 : i64, tpu.core_type = #tpu.core_type<tc>, window_params = [{transform_indices = @transform_0, window_bounds = array<i64: 1, 8, 128>}, {pipeline_mode = #tpu.pipeline_mode<synchronous>, transform_indices = @transform_1, window_bounds = array<i64: 1, 128>}, {pipeline_mode = #tpu.pipeline_mode<synchronous>, transform_indices = @transform_2, window_bounds = array<i64: 1, 128>}, {pipeline_mode = #tpu.pipeline_mode<synchronous>, transform_indices = @transform_3, window_bounds = array<i64: 256, 128>}, {transform_indices = @transform_4, window_bounds = array<i64: 1, 8, 128>}, {transform_indices = @transform_5, window_bounds = array<i64: 1, 8, 256>}]} {
    %c0 = arith.constant 0 : index
    %c0_0 = arith.constant 0 : index
    %c0_1 = arith.constant 0 : index
    %0 = vector.load %arg1[%c0, %c0_0, %c0_1] : memref<1x8x128xf32, #tpu.memory_space<vmem>>, vector<1x8x128xf32>
    %1 = vector.shape_cast %0 : vector<1x8x128xf32> to vector<8x128xf32>
    %c0_2 = arith.constant 0 : index
    %c0_3 = arith.constant 0 : index
    %2 = vector.load %arg2[%c0_2, %c0_3] : memref<1x128xf32, #tpu.memory_space<vmem>>, vector<1x128xf32>
    %c0_4 = arith.constant 0 : index
    %c0_5 = arith.constant 0 : index
    %3 = vector.load %arg3[%c0_4, %c0_5] : memref<1x128xf32, #tpu.memory_space<vmem>>, vector<1x128xf32>
    %cst = arith.constant dense<0.000000e+00> : vector<8xf32>
    %4 = vector.multi_reduction <add>, %1, %cst [1] : vector<8x128xf32> to vector<8xf32>
    %5 = vector.shape_cast %4 : vector<8xf32> to vector<8x1xf32>
    %cst_6 = arith.constant 1.280000e+02 : f32
    %6 = vector.broadcast %cst_6 : f32 to vector<8x1xf32>
    %7 = arith.divf %5, %6 : vector<8x1xf32>
    %8 = vector.broadcast %7 : vector<8x1xf32> to vector<8x128xf32>
    %9 = arith.subf %1, %8 : vector<8x128xf32>
    %10 = arith.mulf %9, %9 : vector<8x128xf32>
    %cst_7 = arith.constant dense<0.000000e+00> : vector<8xf32>
    %11 = vector.multi_reduction <add>, %10, %cst_7 [1] : vector<8x128xf32> to vector<8xf32>
    %12 = vector.shape_cast %11 : vector<8xf32> to vector<8x1xf32>
    %cst_8 = arith.constant 1.280000e+02 : f32
    %13 = vector.broadcast %cst_8 : f32 to vector<8x1xf32>
    %14 = arith.divf %12, %13 : vector<8x1xf32>
    %cst_9 = arith.constant 9.99999974E-6 : f32
    %15 = vector.broadcast %cst_9 : f32 to vector<8x1xf32>
    %16 = arith.addf %14, %15 : vector<8x1xf32>
    %17 = math.rsqrt %16 : vector<8x1xf32>
    %18 = vector.broadcast %17 : vector<8x1xf32> to vector<8x128xf32>
    %19 = arith.mulf %9, %18 : vector<8x128xf32>
    %20 = vector.broadcast %2 : vector<1x128xf32> to vector<8x128xf32>
    %21 = arith.mulf %19, %20 : vector<8x128xf32>
    %22 = vector.broadcast %3 : vector<1x128xf32> to vector<8x128xf32>
    %23 = arith.addf %21, %22 : vector<8x128xf32>
    %c0_10 = arith.constant 0 : index
    %c0_11 = arith.constant 0 : index
    %c0_12 = arith.constant 0 : index
    %24 = vector.load %arg5[%c0_10, %c0_11, %c0_12] : memref<1x8x128xf32, #tpu.memory_space<vmem>>, vector<1x8x128xf32>
    %25 = vector.shape_cast %24 : vector<1x8x128xf32> to vector<8x128xf32>
    %26 = vector.shape_cast %23 : vector<8x128xf32> to vector<1x8x128xf32>
    tpu.vector_store %arg5[%c0_10, %c0_11, %c0_12], %26 {strides = array<i32>} : memref<1x8x128xf32, #tpu.memory_space<vmem>>, vector<1x8x128xf32>,
    %27 = arith.truncf %23 : vector<8x128xf32> to vector<8x128xbf16>
    %c0_13 = arith.constant 0 : index
    %c0_14 = arith.constant 0 : index
    %28 = vector.load %arg4[%c0_13, %c0_14] : memref<256x128xbf16, #tpu.memory_space<vmem>>, vector<256x128xbf16>
    %cst_15 = arith.constant dense<0.000000e+00> : vector<8x256xf32>
    %29 = tpu.matmul %27, %28, %cst_15 {dimension_numbers = #tpu.dot_dimension_numbers<[1], [1], [0], [0], [0, 0, 1, 0], [], []>} : vector<8x128xbf16>, vector<256x128xbf16>, vector<8x256xf32> -> vector<8x256xf32>
    %c0_16 = arith.constant 0 : index
    %c0_17 = arith.constant 0 : index
    %c0_18 = arith.constant 0 : index
    %30 = vector.load %arg6[%c0_16, %c0_17, %c0_18] : memref<1x8x256xf32, #tpu.memory_space<vmem>>, vector<1x8x256xf32>
    %31 = vector.shape_cast %30 : vector<1x8x256xf32> to vector<8x256xf32>
    %32 = vector.shape_cast %29 : vector<8x256xf32> to vector<1x8x256xf32>
    tpu.vector_store %arg6[%c0_16, %c0_17, %c0_18], %32 {strides = array<i32>} : memref<1x8x256xf32, #tpu.memory_space<vmem>>, vector<1x8x256xf32>,
    return
  }
  func.func @transform_0(%arg0: i32) -> (i32, i32, i32) {
    %c0_i32 = arith.constant 0 : i32
    %c0_i32_0 = arith.constant 0 : i32
    %c0_i32_1 = arith.constant 0 : i32
    return %arg0, %c0_i32, %c0_i32_0 : i32, i32, i32
  }
  func.func @transform_1(%arg0: i32) -> (i32, i32) {
    %c0_i32 = arith.constant 0 : i32
    %c0_i32_0 = arith.constant 0 : i32
    %c0_i32_1 = arith.constant 0 : i32
    return %c0_i32, %c0_i32_0 : i32, i32
  }
  func.func @transform_2(%arg0: i32) -> (i32, i32) {
    %c0_i32 = arith.constant 0 : i32
    %c0_i32_0 = arith.constant 0 : i32
    %c0_i32_1 = arith.constant 0 : i32
    return %c0_i32, %c0_i32_0 : i32, i32
  }
  func.func @transform_3(%arg0: i32) -> (i32, i32) {
    %c0_i32 = arith.constant 0 : i32
    %c0_i32_0 = arith.constant 0 : i32
    %c0_i32_1 = arith.constant 0 : i32
    return %c0_i32, %c0_i32_0 : i32, i32
  }
  func.func @transform_4(%arg0: i32) -> (i32, i32, i32) {
    %c0_i32 = arith.constant 0 : i32
    %c0_i32_0 = arith.constant 0 : i32
    %c0_i32_1 = arith.constant 0 : i32
    return %arg0, %c0_i32, %c0_i32_0 : i32, i32, i32
  }
  func.func @transform_5(%arg0: i32) -> (i32, i32, i32) {
    %c0_i32 = arith.constant 0 : i32
    %c0_i32_0 = arith.constant 0 : i32
    %c0_i32_1 = arith.constant 0 : i32
    return %arg0, %c0_i32, %c0_i32_0 : i32, i32, i32
  }
}

module attributes {stable_mosaic.version = 11 : i64} {
  func.func @_decoder_layer_kernel(%arg0: i32, %arg1: memref<1x8x128xf32, #tpu.memory_space<vmem>>, %arg2: memref<1x16x128xf32, #tpu.memory_space<vmem>>, %arg3: memref<1x1x16xf32, #tpu.memory_space<vmem>>, %arg4: memref<1x128xf32, #tpu.memory_space<vmem>>, %arg5: memref<1x128xf32, #tpu.memory_space<vmem>>, %arg6: memref<128x384xbf16, #tpu.memory_space<vmem>>, %arg7: memref<1x384xf32, #tpu.memory_space<vmem>>, %arg8: memref<128x128xbf16, #tpu.memory_space<vmem>>, %arg9: memref<1x128xf32, #tpu.memory_space<vmem>>, %arg10: memref<1x128xf32, #tpu.memory_space<vmem>>, %arg11: memref<1x128xf32, #tpu.memory_space<vmem>>, %arg12: memref<128x128xbf16, #tpu.memory_space<vmem>>, %arg13: memref<1x128xf32, #tpu.memory_space<vmem>>, %arg14: memref<128x256xbf16, #tpu.memory_space<vmem>>, %arg15: memref<1x256xf32, #tpu.memory_space<vmem>>, %arg16: memref<128x128xbf16, #tpu.memory_space<vmem>>, %arg17: memref<1x128xf32, #tpu.memory_space<vmem>>, %arg18: memref<1x128xf32, #tpu.memory_space<vmem>>, %arg19: memref<1x128xf32, #tpu.memory_space<vmem>>, %arg20: memref<128x256xbf16, #tpu.memory_space<vmem>>, %arg21: memref<1x256xf32, #tpu.memory_space<vmem>>, %arg22: memref<256x128xbf16, #tpu.memory_space<vmem>>, %arg23: memref<1x128xf32, #tpu.memory_space<vmem>>, %arg24: memref<1x8x128xf32, #tpu.memory_space<vmem>>) attributes {dimension_semantics = [#tpu.dimension_semantics<parallel>], iteration_bounds = array<i64: 2>, scalar_prefetch = 0 : i64, scratch_operands = 0 : i64, tpu.core_type = #tpu.core_type<tc>, window_params = [{transform_indices = @transform_0, window_bounds = array<i64: 1, 8, 128>}, {transform_indices = @transform_1, window_bounds = array<i64: 1, 16, 128>}, {transform_indices = @transform_2, window_bounds = array<i64: 1, 1, 16>}, {pipeline_mode = #tpu.pipeline_mode<synchronous>, transform_indices = @transform_3, window_bounds = array<i64: 1, 128>}, {pipeline_mode = #tpu.pipeline_mode<synchronous>, transform_indices = @transform_4, window_bounds = array<i64: 1, 128>}, {pipeline_mode = #tpu.pipeline_mode<synchronous>, transform_indices = @transform_5, window_bounds = array<i64: 128, 384>}, {pipeline_mode = #tpu.pipeline_mode<synchronous>, transform_indices = @transform_6, window_bounds = array<i64: 1, 384>}, {pipeline_mode = #tpu.pipeline_mode<synchronous>, transform_indices = @transform_7, window_bounds = array<i64: 128, 128>}, {pipeline_mode = #tpu.pipeline_mode<synchronous>, transform_indices = @transform_8, window_bounds = array<i64: 1, 128>}, {pipeline_mode = #tpu.pipeline_mode<synchronous>, transform_indices = @transform_9, window_bounds = array<i64: 1, 128>}, {pipeline_mode = #tpu.pipeline_mode<synchronous>, transform_indices = @transform_10, window_bounds = array<i64: 1, 128>}, {pipeline_mode = #tpu.pipeline_mode<synchronous>, transform_indices = @transform_11, window_bounds = array<i64: 128, 128>}, {pipeline_mode = #tpu.pipeline_mode<synchronous>, transform_indices = @transform_12, window_bounds = array<i64: 1, 128>}, {pipeline_mode = #tpu.pipeline_mode<synchronous>, transform_indices = @transform_13, window_bounds = array<i64: 128, 256>}, {pipeline_mode = #tpu.pipeline_mode<synchronous>, transform_indices = @transform_14, window_bounds = array<i64: 1, 256>}, {pipeline_mode = #tpu.pipeline_mode<synchronous>, transform_indices = @transform_15, window_bounds = array<i64: 128, 128>}, {pipeline_mode = #tpu.pipeline_mode<synchronous>, transform_indices = @transform_16, window_bounds = array<i64: 1, 128>}, {pipeline_mode = #tpu.pipeline_mode<synchronous>, transform_indices = @transform_17, window_bounds = array<i64: 1, 128>}, {pipeline_mode = #tpu.pipeline_mode<synchronous>, transform_indices = @transform_18, window_bounds = array<i64: 1, 128>}, {pipeline_mode = #tpu.pipeline_mode<synchronous>, transform_indices = @transform_19, window_bounds = array<i64: 128, 256>}, {pipeline_mode = #tpu.pipeline_mode<synchronous>, transform_indices = @transform_20, window_bounds = array<i64: 1, 256>}, {pipeline_mode = #tpu.pipeline_mode<synchronous>, transform_indices = @transform_21, window_bounds = array<i64: 256, 128>}, {pipeline_mode = #tpu.pipeline_mode<synchronous>, transform_indices = @transform_22, window_bounds = array<i64: 1, 128>}, {transform_indices = @transform_23, window_bounds = array<i64: 1, 8, 128>}]} {
    %c0 = arith.constant 0 : index
    %c0_0 = arith.constant 0 : index
    %c0_1 = arith.constant 0 : index
    %0 = vector.load %arg1[%c0, %c0_0, %c0_1] : memref<1x8x128xf32, #tpu.memory_space<vmem>>, vector<1x8x128xf32>
    %1 = vector.shape_cast %0 : vector<1x8x128xf32> to vector<8x128xf32>
    %c0_2 = arith.constant 0 : index
    %c0_3 = arith.constant 0 : index
    %c0_4 = arith.constant 0 : index
    %2 = vector.load %arg2[%c0_2, %c0_3, %c0_4] : memref<1x16x128xf32, #tpu.memory_space<vmem>>, vector<1x16x128xf32>
    %3 = vector.shape_cast %2 : vector<1x16x128xf32> to vector<16x128xf32>
    %c0_5 = arith.constant 0 : index
    %c0_6 = arith.constant 0 : index
    %c0_7 = arith.constant 0 : index
    %4 = vector.load %arg3[%c0_5, %c0_6, %c0_7] : memref<1x1x16xf32, #tpu.memory_space<vmem>>, vector<1x1x16xf32>
    %5 = vector.shape_cast %4 : vector<1x1x16xf32> to vector<1x16xf32>
    %c0_8 = arith.constant 0 : index
    %c0_9 = arith.constant 0 : index
    %6 = vector.load %arg4[%c0_8, %c0_9] : memref<1x128xf32, #tpu.memory_space<vmem>>, vector<1x128xf32>
    %c0_10 = arith.constant 0 : index
    %c0_11 = arith.constant 0 : index
    %7 = vector.load %arg5[%c0_10, %c0_11] : memref<1x128xf32, #tpu.memory_space<vmem>>, vector<1x128xf32>
    %cst = arith.constant dense<0.000000e+00> : vector<8xf32>
    %8 = vector.multi_reduction <add>, %1, %cst [1] : vector<8x128xf32> to vector<8xf32>
    %9 = vector.shape_cast %8 : vector<8xf32> to vector<8x1xf32>
    %cst_12 = arith.constant 1.280000e+02 : f32
    %10 = vector.broadcast %cst_12 : f32 to vector<8x1xf32>
    %11 = arith.divf %9, %10 : vector<8x1xf32>
    %12 = vector.broadcast %11 : vector<8x1xf32> to vector<8x128xf32>
    %13 = arith.subf %1, %12 : vector<8x128xf32>
    %14 = arith.mulf %13, %13 : vector<8x128xf32>
    %cst_13 = arith.constant dense<0.000000e+00> : vector<8xf32>
    %15 = vector.multi_reduction <add>, %14, %cst_13 [1] : vector<8x128xf32> to vector<8xf32>
    %16 = vector.shape_cast %15 : vector<8xf32> to vector<8x1xf32>
    %cst_14 = arith.constant 1.280000e+02 : f32
    %17 = vector.broadcast %cst_14 : f32 to vector<8x1xf32>
    %18 = arith.divf %16, %17 : vector<8x1xf32>
    %cst_15 = arith.constant 9.99999974E-6 : f32
    %19 = vector.broadcast %cst_15 : f32 to vector<8x1xf32>
    %20 = arith.addf %18, %19 : vector<8x1xf32>
    %21 = math.rsqrt %20 : vector<8x1xf32>
    %22 = vector.broadcast %21 : vector<8x1xf32> to vector<8x128xf32>
    %23 = arith.mulf %13, %22 : vector<8x128xf32>
    %24 = vector.broadcast %6 : vector<1x128xf32> to vector<8x128xf32>
    %25 = arith.mulf %23, %24 : vector<8x128xf32>
    %26 = vector.broadcast %7 : vector<1x128xf32> to vector<8x128xf32>
    %27 = arith.addf %25, %26 : vector<8x128xf32>
    %28 = arith.truncf %27 : vector<8x128xf32> to vector<8x128xbf16>
    %c0_16 = arith.constant 0 : index
    %c0_17 = arith.constant 0 : index
    %29 = vector.load %arg6[%c0_16, %c0_17] : memref<128x384xbf16, #tpu.memory_space<vmem>>, vector<128x384xbf16>
    %cst_18 = arith.constant dense<0.000000e+00> : vector<8x384xf32>
    %30 = tpu.matmul %28, %29, %cst_18 {dimension_numbers = #tpu.dot_dimension_numbers<[1], [0], [0], [1], [0, 0, 1, 1], [], []>} : vector<8x128xbf16>, vector<128x384xbf16>, vector<8x384xf32> -> vector<8x384xf32>
    %c0_19 = arith.constant 0 : index
    %c0_20 = arith.constant 0 : index
    %31 = vector.load %arg7[%c0_19, %c0_20] : memref<1x384xf32, #tpu.memory_space<vmem>>, vector<1x384xf32>
    %32 = vector.broadcast %31 : vector<1x384xf32> to vector<8x384xf32>
    %33 = arith.addf %30, %32 : vector<8x384xf32>
    %34 = tpu.iota {dimensions = array<i32: 0>} : vector<8x8xi32>
    %35 = tpu.iota {dimensions = array<i32: 1>} : vector<8x8xi32>
    %36 = arith.cmpi sgt, %35, %34 : vector<8x8xi32>
    %cst_21 = arith.constant -1.000000e+09 : f32
    %cst_22 = arith.constant 0.000000e+00 : f32
    %37 = vector.broadcast %cst_21 : f32 to vector<8x8xf32>
    %38 = vector.broadcast %cst_22 : f32 to vector<8x8xf32>
    %39 = arith.select %36, %37, %38 : vector<8x8xi1>, vector<8x8xf32>
    %40 = vector.extract_strided_slice %33 {offsets = [0, 0], sizes = [8, 128], strides = [1, 1]} : vector<8x384xf32> to vector<8x128xf32>
    %41 = vector.extract_strided_slice %33 {offsets = [0, 128], sizes = [8, 128], strides = [1, 1]} : vector<8x384xf32> to vector<8x128xf32>
    %42 = vector.extract_strided_slice %33 {offsets = [0, 256], sizes = [8, 128], strides = [1, 1]} : vector<8x384xf32> to vector<8x128xf32>
    %cst_23 = arith.constant 0.000000e+00 : f32
    %43 = vector.broadcast %cst_23 : f32 to vector<8x128xf32>
    %44 = vector.extract_strided_slice %40 {offsets = [0, 0], sizes = [8, 32], strides = [1, 1]} : vector<8x128xf32> to vector<8x32xf32>
    %45 = arith.truncf %44 : vector<8x32xf32> to vector<8x32xbf16>
    %46 = vector.extract_strided_slice %41 {offsets = [0, 0], sizes = [8, 32], strides = [1, 1]} : vector<8x128xf32> to vector<8x32xf32>
    %47 = arith.truncf %46 : vector<8x32xf32> to vector<8x32xbf16>
    %48 = vector.extract_strided_slice %42 {offsets = [0, 0], sizes = [8, 32], strides = [1, 1]} : vector<8x128xf32> to vector<8x32xf32>
    %49 = arith.truncf %48 : vector<8x32xf32> to vector<8x32xbf16>
    %cst_24 = arith.constant dense<0.000000e+00> : vector<8x8xf32>
    %50 = tpu.matmul %45, %47, %cst_24 {dimension_numbers = #tpu.dot_dimension_numbers<[1], [1], [0], [0], [0, 0, 1, 0], [], []>} : vector<8x32xbf16>, vector<8x32xbf16>, vector<8x8xf32> -> vector<8x8xf32>
    %cst_25 = arith.constant 0.176776692 : f32
    %51 = vector.broadcast %cst_25 : f32 to vector<8x8xf32>
    %52 = arith.mulf %50, %51 : vector<8x8xf32>
    %53 = arith.addf %52, %39 : vector<8x8xf32>
    %cst_26 = arith.constant dense<0xFF800000> : vector<8xf32>
    %54 = vector.multi_reduction <maximumf>, %53, %cst_26 [1] : vector<8x8xf32> to vector<8xf32>
    %55 = vector.shape_cast %54 : vector<8xf32> to vector<8x1xf32>
    %56 = vector.broadcast %55 : vector<8x1xf32> to vector<8x8xf32>
    %57 = arith.subf %53, %56 : vector<8x8xf32>
    %58 = math.exp %57 : vector<8x8xf32>
    %cst_27 = arith.constant dense<0.000000e+00> : vector<8xf32>
    %59 = vector.multi_reduction <add>, %58, %cst_27 [1] : vector<8x8xf32> to vector<8xf32>
    %60 = vector.shape_cast %59 : vector<8xf32> to vector<8x1xf32>
    %61 = tpu.reciprocal %60 {approx = true} : vector<8x1xf32> -> vector<8x1xf32>
    %62 = vector.broadcast %61 : vector<8x1xf32> to vector<8x8xf32>
    %63 = arith.mulf %58, %62 : vector<8x8xf32>
    %64 = arith.truncf %63 : vector<8x8xf32> to vector<8x8xbf16>
    %cst_28 = arith.constant dense<0.000000e+00> : vector<8x32xf32>
    %65 = tpu.matmul %64, %49, %cst_28 {dimension_numbers = #tpu.dot_dimension_numbers<[1], [0], [0], [1], [0, 0, 1, 1], [], []>} : vector<8x8xbf16>, vector<8x32xbf16>, vector<8x32xf32> -> vector<8x32xf32>
    %66 = arith.truncf %65 : vector<8x32xf32> to vector<8x32xbf16>
    %c0_29 = arith.constant 0 : index
    %c0_30 = arith.constant 0 : index
    %67 = vector.load %arg8[%c0_29, %c0_30] : memref<128x128xbf16, #tpu.memory_space<vmem>>, vector<32x128xbf16>
    %cst_31 = arith.constant dense<0.000000e+00> : vector<8x128xf32>
    %68 = tpu.matmul %66, %67, %cst_31 {dimension_numbers = #tpu.dot_dimension_numbers<[1], [0], [0], [1], [0, 0, 1, 1], [], []>} : vector<8x32xbf16>, vector<32x128xbf16>, vector<8x128xf32> -> vector<8x128xf32>
    %69 = arith.addf %43, %68 : vector<8x128xf32>
    %70 = vector.extract_strided_slice %40 {offsets = [0, 32], sizes = [8, 32], strides = [1, 1]} : vector<8x128xf32> to vector<8x32xf32>
    %71 = arith.truncf %70 : vector<8x32xf32> to vector<8x32xbf16>
    %72 = vector.extract_strided_slice %41 {offsets = [0, 32], sizes = [8, 32], strides = [1, 1]} : vector<8x128xf32> to vector<8x32xf32>
    %73 = arith.truncf %72 : vector<8x32xf32> to vector<8x32xbf16>
    %74 = vector.extract_strided_slice %42 {offsets = [0, 32], sizes = [8, 32], strides = [1, 1]} : vector<8x128xf32> to vector<8x32xf32>
    %75 = arith.truncf %74 : vector<8x32xf32> to vector<8x32xbf16>
    %cst_32 = arith.constant dense<0.000000e+00> : vector<8x8xf32>
    %76 = tpu.matmul %71, %73, %cst_32 {dimension_numbers = #tpu.dot_dimension_numbers<[1], [1], [0], [0], [0, 0, 1, 0], [], []>} : vector<8x32xbf16>, vector<8x32xbf16>, vector<8x8xf32> -> vector<8x8xf32>
    %cst_33 = arith.constant 0.176776692 : f32
    %77 = vector.broadcast %cst_33 : f32 to vector<8x8xf32>
    %78 = arith.mulf %76, %77 : vector<8x8xf32>
    %79 = arith.addf %78, %39 : vector<8x8xf32>
    %cst_34 = arith.constant dense<0xFF800000> : vector<8xf32>
    %80 = vector.multi_reduction <maximumf>, %79, %cst_34 [1] : vector<8x8xf32> to vector<8xf32>
    %81 = vector.shape_cast %80 : vector<8xf32> to vector<8x1xf32>
    %82 = vector.broadcast %81 : vector<8x1xf32> to vector<8x8xf32>
    %83 = arith.subf %79, %82 : vector<8x8xf32>
    %84 = math.exp %83 : vector<8x8xf32>
    %cst_35 = arith.constant dense<0.000000e+00> : vector<8xf32>
    %85 = vector.multi_reduction <add>, %84, %cst_35 [1] : vector<8x8xf32> to vector<8xf32>
    %86 = vector.shape_cast %85 : vector<8xf32> to vector<8x1xf32>
    %87 = tpu.reciprocal %86 {approx = true} : vector<8x1xf32> -> vector<8x1xf32>
    %88 = vector.broadcast %87 : vector<8x1xf32> to vector<8x8xf32>
    %89 = arith.mulf %84, %88 : vector<8x8xf32>
    %90 = arith.truncf %89 : vector<8x8xf32> to vector<8x8xbf16>
    %cst_36 = arith.constant dense<0.000000e+00> : vector<8x32xf32>
    %91 = tpu.matmul %90, %75, %cst_36 {dimension_numbers = #tpu.dot_dimension_numbers<[1], [0], [0], [1], [0, 0, 1, 1], [], []>} : vector<8x8xbf16>, vector<8x32xbf16>, vector<8x32xf32> -> vector<8x32xf32>
    %92 = arith.truncf %91 : vector<8x32xf32> to vector<8x32xbf16>
    %c32 = arith.constant 32 : index
    %c0_37 = arith.constant 0 : index
    %93 = vector.load %arg8[%c32, %c0_37] : memref<128x128xbf16, #tpu.memory_space<vmem>>, vector<32x128xbf16>
    %cst_38 = arith.constant dense<0.000000e+00> : vector<8x128xf32>
    %94 = tpu.matmul %92, %93, %cst_38 {dimension_numbers = #tpu.dot_dimension_numbers<[1], [0], [0], [1], [0, 0, 1, 1], [], []>} : vector<8x32xbf16>, vector<32x128xbf16>, vector<8x128xf32> -> vector<8x128xf32>
    %95 = arith.addf %69, %94 : vector<8x128xf32>
    %96 = vector.extract_strided_slice %40 {offsets = [0, 64], sizes = [8, 32], strides = [1, 1]} : vector<8x128xf32> to vector<8x32xf32>
    %97 = arith.truncf %96 : vector<8x32xf32> to vector<8x32xbf16>
    %98 = vector.extract_strided_slice %41 {offsets = [0, 64], sizes = [8, 32], strides = [1, 1]} : vector<8x128xf32> to vector<8x32xf32>
    %99 = arith.truncf %98 : vector<8x32xf32> to vector<8x32xbf16>
    %100 = vector.extract_strided_slice %42 {offsets = [0, 64], sizes = [8, 32], strides = [1, 1]} : vector<8x128xf32> to vector<8x32xf32>
    %101 = arith.truncf %100 : vector<8x32xf32> to vector<8x32xbf16>
    %cst_39 = arith.constant dense<0.000000e+00> : vector<8x8xf32>
    %102 = tpu.matmul %97, %99, %cst_39 {dimension_numbers = #tpu.dot_dimension_numbers<[1], [1], [0], [0], [0, 0, 1, 0], [], []>} : vector<8x32xbf16>, vector<8x32xbf16>, vector<8x8xf32> -> vector<8x8xf32>
    %cst_40 = arith.constant 0.176776692 : f32
    %103 = vector.broadcast %cst_40 : f32 to vector<8x8xf32>
    %104 = arith.mulf %102, %103 : vector<8x8xf32>
    %105 = arith.addf %104, %39 : vector<8x8xf32>
    %cst_41 = arith.constant dense<0xFF800000> : vector<8xf32>
    %106 = vector.multi_reduction <maximumf>, %105, %cst_41 [1] : vector<8x8xf32> to vector<8xf32>
    %107 = vector.shape_cast %106 : vector<8xf32> to vector<8x1xf32>
    %108 = vector.broadcast %107 : vector<8x1xf32> to vector<8x8xf32>
    %109 = arith.subf %105, %108 : vector<8x8xf32>
    %110 = math.exp %109 : vector<8x8xf32>
    %cst_42 = arith.constant dense<0.000000e+00> : vector<8xf32>
    %111 = vector.multi_reduction <add>, %110, %cst_42 [1] : vector<8x8xf32> to vector<8xf32>
    %112 = vector.shape_cast %111 : vector<8xf32> to vector<8x1xf32>
    %113 = tpu.reciprocal %112 {approx = true} : vector<8x1xf32> -> vector<8x1xf32>
    %114 = vector.broadcast %113 : vector<8x1xf32> to vector<8x8xf32>
    %115 = arith.mulf %110, %114 : vector<8x8xf32>
    %116 = arith.truncf %115 : vector<8x8xf32> to vector<8x8xbf16>
    %cst_43 = arith.constant dense<0.000000e+00> : vector<8x32xf32>
    %117 = tpu.matmul %116, %101, %cst_43 {dimension_numbers = #tpu.dot_dimension_numbers<[1], [0], [0], [1], [0, 0, 1, 1], [], []>} : vector<8x8xbf16>, vector<8x32xbf16>, vector<8x32xf32> -> vector<8x32xf32>
    %118 = arith.truncf %117 : vector<8x32xf32> to vector<8x32xbf16>
    %c64 = arith.constant 64 : index
    %c0_44 = arith.constant 0 : index
    %119 = vector.load %arg8[%c64, %c0_44] : memref<128x128xbf16, #tpu.memory_space<vmem>>, vector<32x128xbf16>
    %cst_45 = arith.constant dense<0.000000e+00> : vector<8x128xf32>
    %120 = tpu.matmul %118, %119, %cst_45 {dimension_numbers = #tpu.dot_dimension_numbers<[1], [0], [0], [1], [0, 0, 1, 1], [], []>} : vector<8x32xbf16>, vector<32x128xbf16>, vector<8x128xf32> -> vector<8x128xf32>
    %121 = arith.addf %95, %120 : vector<8x128xf32>
    %122 = vector.extract_strided_slice %40 {offsets = [0, 96], sizes = [8, 32], strides = [1, 1]} : vector<8x128xf32> to vector<8x32xf32>
    %123 = arith.truncf %122 : vector<8x32xf32> to vector<8x32xbf16>
    %124 = vector.extract_strided_slice %41 {offsets = [0, 96], sizes = [8, 32], strides = [1, 1]} : vector<8x128xf32> to vector<8x32xf32>
    %125 = arith.truncf %124 : vector<8x32xf32> to vector<8x32xbf16>
    %126 = vector.extract_strided_slice %42 {offsets = [0, 96], sizes = [8, 32], strides = [1, 1]} : vector<8x128xf32> to vector<8x32xf32>
    %127 = arith.truncf %126 : vector<8x32xf32> to vector<8x32xbf16>
    %cst_46 = arith.constant dense<0.000000e+00> : vector<8x8xf32>
    %128 = tpu.matmul %123, %125, %cst_46 {dimension_numbers = #tpu.dot_dimension_numbers<[1], [1], [0], [0], [0, 0, 1, 0], [], []>} : vector<8x32xbf16>, vector<8x32xbf16>, vector<8x8xf32> -> vector<8x8xf32>
    %cst_47 = arith.constant 0.176776692 : f32
    %129 = vector.broadcast %cst_47 : f32 to vector<8x8xf32>
    %130 = arith.mulf %128, %129 : vector<8x8xf32>
    %131 = arith.addf %130, %39 : vector<8x8xf32>
    %cst_48 = arith.constant dense<0xFF800000> : vector<8xf32>
    %132 = vector.multi_reduction <maximumf>, %131, %cst_48 [1] : vector<8x8xf32> to vector<8xf32>
    %133 = vector.shape_cast %132 : vector<8xf32> to vector<8x1xf32>
    %134 = vector.broadcast %133 : vector<8x1xf32> to vector<8x8xf32>
    %135 = arith.subf %131, %134 : vector<8x8xf32>
    %136 = math.exp %135 : vector<8x8xf32>
    %cst_49 = arith.constant dense<0.000000e+00> : vector<8xf32>
    %137 = vector.multi_reduction <add>, %136, %cst_49 [1] : vector<8x8xf32> to vector<8xf32>
    %138 = vector.shape_cast %137 : vector<8xf32> to vector<8x1xf32>
    %139 = tpu.reciprocal %138 {approx = true} : vector<8x1xf32> -> vector<8x1xf32>
    %140 = vector.broadcast %139 : vector<8x1xf32> to vector<8x8xf32>
    %141 = arith.mulf %136, %140 : vector<8x8xf32>
    %142 = arith.truncf %141 : vector<8x8xf32> to vector<8x8xbf16>
    %cst_50 = arith.constant dense<0.000000e+00> : vector<8x32xf32>
    %143 = tpu.matmul %142, %127, %cst_50 {dimension_numbers = #tpu.dot_dimension_numbers<[1], [0], [0], [1], [0, 0, 1, 1], [], []>} : vector<8x8xbf16>, vector<8x32xbf16>, vector<8x32xf32> -> vector<8x32xf32>
    %144 = arith.truncf %143 : vector<8x32xf32> to vector<8x32xbf16>
    %c96 = arith.constant 96 : index
    %c0_51 = arith.constant 0 : index
    %145 = vector.load %arg8[%c96, %c0_51] : memref<128x128xbf16, #tpu.memory_space<vmem>>, vector<32x128xbf16>
    %cst_52 = arith.constant dense<0.000000e+00> : vector<8x128xf32>
    %146 = tpu.matmul %144, %145, %cst_52 {dimension_numbers = #tpu.dot_dimension_numbers<[1], [0], [0], [1], [0, 0, 1, 1], [], []>} : vector<8x32xbf16>, vector<32x128xbf16>, vector<8x128xf32> -> vector<8x128xf32>
    %147 = arith.addf %121, %146 : vector<8x128xf32>
    %148 = arith.addf %1, %147 : vector<8x128xf32>
    %c0_53 = arith.constant 0 : index
    %c0_54 = arith.constant 0 : index
    %149 = vector.load %arg9[%c0_53, %c0_54] : memref<1x128xf32, #tpu.memory_space<vmem>>, vector<1x128xf32>
    %150 = vector.broadcast %149 : vector<1x128xf32> to vector<8x128xf32>
    %151 = arith.addf %148, %150 : vector<8x128xf32>
    %c0_55 = arith.constant 0 : index
    %c0_56 = arith.constant 0 : index
    %152 = vector.load %arg10[%c0_55, %c0_56] : memref<1x128xf32, #tpu.memory_space<vmem>>, vector<1x128xf32>
    %c0_57 = arith.constant 0 : index
    %c0_58 = arith.constant 0 : index
    %153 = vector.load %arg11[%c0_57, %c0_58] : memref<1x128xf32, #tpu.memory_space<vmem>>, vector<1x128xf32>
    %cst_59 = arith.constant dense<0.000000e+00> : vector<8xf32>
    %154 = vector.multi_reduction <add>, %151, %cst_59 [1] : vector<8x128xf32> to vector<8xf32>
    %155 = vector.shape_cast %154 : vector<8xf32> to vector<8x1xf32>
    %cst_60 = arith.constant 1.280000e+02 : f32
    %156 = vector.broadcast %cst_60 : f32 to vector<8x1xf32>
    %157 = arith.divf %155, %156 : vector<8x1xf32>
    %158 = vector.broadcast %157 : vector<8x1xf32> to vector<8x128xf32>
    %159 = arith.subf %151, %158 : vector<8x128xf32>
    %160 = arith.mulf %159, %159 : vector<8x128xf32>
    %cst_61 = arith.constant dense<0.000000e+00> : vector<8xf32>
    %161 = vector.multi_reduction <add>, %160, %cst_61 [1] : vector<8x128xf32> to vector<8xf32>
    %162 = vector.shape_cast %161 : vector<8xf32> to vector<8x1xf32>
    %cst_62 = arith.constant 1.280000e+02 : f32
    %163 = vector.broadcast %cst_62 : f32 to vector<8x1xf32>
    %164 = arith.divf %162, %163 : vector<8x1xf32>
    %cst_63 = arith.constant 9.99999974E-6 : f32
    %165 = vector.broadcast %cst_63 : f32 to vector<8x1xf32>
    %166 = arith.addf %164, %165 : vector<8x1xf32>
    %167 = math.rsqrt %166 : vector<8x1xf32>
    %168 = vector.broadcast %167 : vector<8x1xf32> to vector<8x128xf32>
    %169 = arith.mulf %159, %168 : vector<8x128xf32>
    %170 = vector.broadcast %152 : vector<1x128xf32> to vector<8x128xf32>
    %171 = arith.mulf %169, %170 : vector<8x128xf32>
    %172 = vector.broadcast %153 : vector<1x128xf32> to vector<8x128xf32>
    %173 = arith.addf %171, %172 : vector<8x128xf32>
    %174 = arith.truncf %173 : vector<8x128xf32> to vector<8x128xbf16>
    %c0_64 = arith.constant 0 : index
    %c0_65 = arith.constant 0 : index
    %175 = vector.load %arg12[%c0_64, %c0_65] : memref<128x128xbf16, #tpu.memory_space<vmem>>, vector<128x128xbf16>
    %cst_66 = arith.constant dense<0.000000e+00> : vector<8x128xf32>
    %176 = tpu.matmul %174, %175, %cst_66 {dimension_numbers = #tpu.dot_dimension_numbers<[1], [0], [0], [1], [0, 0, 1, 1], [], []>} : vector<8x128xbf16>, vector<128x128xbf16>, vector<8x128xf32> -> vector<8x128xf32>
    %c0_67 = arith.constant 0 : index
    %c0_68 = arith.constant 0 : index
    %177 = vector.load %arg13[%c0_67, %c0_68] : memref<1x128xf32, #tpu.memory_space<vmem>>, vector<1x128xf32>
    %178 = vector.broadcast %177 : vector<1x128xf32> to vector<8x128xf32>
    %179 = arith.addf %176, %178 : vector<8x128xf32>
    %180 = arith.truncf %3 : vector<16x128xf32> to vector<16x128xbf16>
    %c0_69 = arith.constant 0 : index
    %c0_70 = arith.constant 0 : index
    %181 = vector.load %arg14[%c0_69, %c0_70] : memref<128x256xbf16, #tpu.memory_space<vmem>>, vector<128x256xbf16>
    %cst_71 = arith.constant dense<0.000000e+00> : vector<16x256xf32>
    %182 = tpu.matmul %180, %181, %cst_71 {dimension_numbers = #tpu.dot_dimension_numbers<[1], [0], [0], [1], [0, 0, 1, 1], [], []>} : vector<16x128xbf16>, vector<128x256xbf16>, vector<16x256xf32> -> vector<16x256xf32>
    %c0_72 = arith.constant 0 : index
    %c0_73 = arith.constant 0 : index
    %183 = vector.load %arg15[%c0_72, %c0_73] : memref<1x256xf32, #tpu.memory_space<vmem>>, vector<1x256xf32>
    %184 = vector.broadcast %183 : vector<1x256xf32> to vector<16x256xf32>
    %185 = arith.addf %182, %184 : vector<16x256xf32>
    %186 = vector.extract_strided_slice %185 {offsets = [0, 0], sizes = [16, 128], strides = [1, 1]} : vector<16x256xf32> to vector<16x128xf32>
    %187 = vector.extract_strided_slice %185 {offsets = [0, 128], sizes = [16, 128], strides = [1, 1]} : vector<16x256xf32> to vector<16x128xf32>
    %cst_74 = arith.constant 0.000000e+00 : f32
    %188 = vector.broadcast %cst_74 : f32 to vector<8x128xf32>
    %189 = vector.extract_strided_slice %179 {offsets = [0, 0], sizes = [8, 32], strides = [1, 1]} : vector<8x128xf32> to vector<8x32xf32>
    %190 = arith.truncf %189 : vector<8x32xf32> to vector<8x32xbf16>
    %191 = vector.extract_strided_slice %186 {offsets = [0, 0], sizes = [16, 32], strides = [1, 1]} : vector<16x128xf32> to vector<16x32xf32>
    %192 = arith.truncf %191 : vector<16x32xf32> to vector<16x32xbf16>
    %193 = vector.extract_strided_slice %187 {offsets = [0, 0], sizes = [16, 32], strides = [1, 1]} : vector<16x128xf32> to vector<16x32xf32>
    %194 = arith.truncf %193 : vector<16x32xf32> to vector<16x32xbf16>
    %cst_75 = arith.constant dense<0.000000e+00> : vector<8x16xf32>
    %195 = tpu.matmul %190, %192, %cst_75 {dimension_numbers = #tpu.dot_dimension_numbers<[1], [1], [0], [0], [0, 0, 1, 0], [], []>} : vector<8x32xbf16>, vector<16x32xbf16>, vector<8x16xf32> -> vector<8x16xf32>
    %cst_76 = arith.constant 0.176776692 : f32
    %196 = vector.broadcast %cst_76 : f32 to vector<8x16xf32>
    %197 = arith.mulf %195, %196 : vector<8x16xf32>
    %198 = vector.broadcast %5 : vector<1x16xf32> to vector<8x16xf32>
    %199 = arith.addf %197, %198 : vector<8x16xf32>
    %cst_77 = arith.constant dense<0xFF800000> : vector<8xf32>
    %200 = vector.multi_reduction <maximumf>, %199, %cst_77 [1] : vector<8x16xf32> to vector<8xf32>
    %201 = vector.shape_cast %200 : vector<8xf32> to vector<8x1xf32>
    %202 = vector.broadcast %201 : vector<8x1xf32> to vector<8x16xf32>
    %203 = arith.subf %199, %202 : vector<8x16xf32>
    %204 = math.exp %203 : vector<8x16xf32>
    %cst_78 = arith.constant dense<0.000000e+00> : vector<8xf32>
    %205 = vector.multi_reduction <add>, %204, %cst_78 [1] : vector<8x16xf32> to vector<8xf32>
    %206 = vector.shape_cast %205 : vector<8xf32> to vector<8x1xf32>
    %207 = tpu.reciprocal %206 {approx = true} : vector<8x1xf32> -> vector<8x1xf32>
    %208 = vector.broadcast %207 : vector<8x1xf32> to vector<8x16xf32>
    %209 = arith.mulf %204, %208 : vector<8x16xf32>
    %210 = arith.truncf %209 : vector<8x16xf32> to vector<8x16xbf16>
    %cst_79 = arith.constant dense<0.000000e+00> : vector<8x32xf32>
    %211 = tpu.matmul %210, %194, %cst_79 {dimension_numbers = #tpu.dot_dimension_numbers<[1], [0], [0], [1], [0, 0, 1, 1], [], []>} : vector<8x16xbf16>, vector<16x32xbf16>, vector<8x32xf32> -> vector<8x32xf32>
    %212 = arith.truncf %211 : vector<8x32xf32> to vector<8x32xbf16>
    %c0_80 = arith.constant 0 : index
    %c0_81 = arith.constant 0 : index
    %213 = vector.load %arg16[%c0_80, %c0_81] : memref<128x128xbf16, #tpu.memory_space<vmem>>, vector<32x128xbf16>
    %cst_82 = arith.constant dense<0.000000e+00> : vector<8x128xf32>
    %214 = tpu.matmul %212, %213, %cst_82 {dimension_numbers = #tpu.dot_dimension_numbers<[1], [0], [0], [1], [0, 0, 1, 1], [], []>} : vector<8x32xbf16>, vector<32x128xbf16>, vector<8x128xf32> -> vector<8x128xf32>
    %215 = arith.addf %188, %214 : vector<8x128xf32>
    %216 = vector.extract_strided_slice %179 {offsets = [0, 32], sizes = [8, 32], strides = [1, 1]} : vector<8x128xf32> to vector<8x32xf32>
    %217 = arith.truncf %216 : vector<8x32xf32> to vector<8x32xbf16>
    %218 = vector.extract_strided_slice %186 {offsets = [0, 32], sizes = [16, 32], strides = [1, 1]} : vector<16x128xf32> to vector<16x32xf32>
    %219 = arith.truncf %218 : vector<16x32xf32> to vector<16x32xbf16>
    %220 = vector.extract_strided_slice %187 {offsets = [0, 32], sizes = [16, 32], strides = [1, 1]} : vector<16x128xf32> to vector<16x32xf32>
    %221 = arith.truncf %220 : vector<16x32xf32> to vector<16x32xbf16>
    %cst_83 = arith.constant dense<0.000000e+00> : vector<8x16xf32>
    %222 = tpu.matmul %217, %219, %cst_83 {dimension_numbers = #tpu.dot_dimension_numbers<[1], [1], [0], [0], [0, 0, 1, 0], [], []>} : vector<8x32xbf16>, vector<16x32xbf16>, vector<8x16xf32> -> vector<8x16xf32>
    %cst_84 = arith.constant 0.176776692 : f32
    %223 = vector.broadcast %cst_84 : f32 to vector<8x16xf32>
    %224 = arith.mulf %222, %223 : vector<8x16xf32>
    %225 = vector.broadcast %5 : vector<1x16xf32> to vector<8x16xf32>
    %226 = arith.addf %224, %225 : vector<8x16xf32>
    %cst_85 = arith.constant dense<0xFF800000> : vector<8xf32>
    %227 = vector.multi_reduction <maximumf>, %226, %cst_85 [1] : vector<8x16xf32> to vector<8xf32>
    %228 = vector.shape_cast %227 : vector<8xf32> to vector<8x1xf32>
    %229 = vector.broadcast %228 : vector<8x1xf32> to vector<8x16xf32>
    %230 = arith.subf %226, %229 : vector<8x16xf32>
    %231 = math.exp %230 : vector<8x16xf32>
    %cst_86 = arith.constant dense<0.000000e+00> : vector<8xf32>
    %232 = vector.multi_reduction <add>, %231, %cst_86 [1] : vector<8x16xf32> to vector<8xf32>
    %233 = vector.shape_cast %232 : vector<8xf32> to vector<8x1xf32>
    %234 = tpu.reciprocal %233 {approx = true} : vector<8x1xf32> -> vector<8x1xf32>
    %235 = vector.broadcast %234 : vector<8x1xf32> to vector<8x16xf32>
    %236 = arith.mulf %231, %235 : vector<8x16xf32>
    %237 = arith.truncf %236 : vector<8x16xf32> to vector<8x16xbf16>
    %cst_87 = arith.constant dense<0.000000e+00> : vector<8x32xf32>
    %238 = tpu.matmul %237, %221, %cst_87 {dimension_numbers = #tpu.dot_dimension_numbers<[1], [0], [0], [1], [0, 0, 1, 1], [], []>} : vector<8x16xbf16>, vector<16x32xbf16>, vector<8x32xf32> -> vector<8x32xf32>
    %239 = arith.truncf %238 : vector<8x32xf32> to vector<8x32xbf16>
    %c32_88 = arith.constant 32 : index
    %c0_89 = arith.constant 0 : index
    %240 = vector.load %arg16[%c32_88, %c0_89] : memref<128x128xbf16, #tpu.memory_space<vmem>>, vector<32x128xbf16>
    %cst_90 = arith.constant dense<0.000000e+00> : vector<8x128xf32>
    %241 = tpu.matmul %239, %240, %cst_90 {dimension_numbers = #tpu.dot_dimension_numbers<[1], [0], [0], [1], [0, 0, 1, 1], [], []>} : vector<8x32xbf16>, vector<32x128xbf16>, vector<8x128xf32> -> vector<8x128xf32>
    %242 = arith.addf %215, %241 : vector<8x128xf32>
    %243 = vector.extract_strided_slice %179 {offsets = [0, 64], sizes = [8, 32], strides = [1, 1]} : vector<8x128xf32> to vector<8x32xf32>
    %244 = arith.truncf %243 : vector<8x32xf32> to vector<8x32xbf16>
    %245 = vector.extract_strided_slice %186 {offsets = [0, 64], sizes = [16, 32], strides = [1, 1]} : vector<16x128xf32> to vector<16x32xf32>
    %246 = arith.truncf %245 : vector<16x32xf32> to vector<16x32xbf16>
    %247 = vector.extract_strided_slice %187 {offsets = [0, 64], sizes = [16, 32], strides = [1, 1]} : vector<16x128xf32> to vector<16x32xf32>
    %248 = arith.truncf %247 : vector<16x32xf32> to vector<16x32xbf16>
    %cst_91 = arith.constant dense<0.000000e+00> : vector<8x16xf32>
    %249 = tpu.matmul %244, %246, %cst_91 {dimension_numbers = #tpu.dot_dimension_numbers<[1], [1], [0], [0], [0, 0, 1, 0], [], []>} : vector<8x32xbf16>, vector<16x32xbf16>, vector<8x16xf32> -> vector<8x16xf32>
    %cst_92 = arith.constant 0.176776692 : f32
    %250 = vector.broadcast %cst_92 : f32 to vector<8x16xf32>
    %251 = arith.mulf %249, %250 : vector<8x16xf32>
    %252 = vector.broadcast %5 : vector<1x16xf32> to vector<8x16xf32>
    %253 = arith.addf %251, %252 : vector<8x16xf32>
    %cst_93 = arith.constant dense<0xFF800000> : vector<8xf32>
    %254 = vector.multi_reduction <maximumf>, %253, %cst_93 [1] : vector<8x16xf32> to vector<8xf32>
    %255 = vector.shape_cast %254 : vector<8xf32> to vector<8x1xf32>
    %256 = vector.broadcast %255 : vector<8x1xf32> to vector<8x16xf32>
    %257 = arith.subf %253, %256 : vector<8x16xf32>
    %258 = math.exp %257 : vector<8x16xf32>
    %cst_94 = arith.constant dense<0.000000e+00> : vector<8xf32>
    %259 = vector.multi_reduction <add>, %258, %cst_94 [1] : vector<8x16xf32> to vector<8xf32>
    %260 = vector.shape_cast %259 : vector<8xf32> to vector<8x1xf32>
    %261 = tpu.reciprocal %260 {approx = true} : vector<8x1xf32> -> vector<8x1xf32>
    %262 = vector.broadcast %261 : vector<8x1xf32> to vector<8x16xf32>
    %263 = arith.mulf %258, %262 : vector<8x16xf32>
    %264 = arith.truncf %263 : vector<8x16xf32> to vector<8x16xbf16>
    %cst_95 = arith.constant dense<0.000000e+00> : vector<8x32xf32>
    %265 = tpu.matmul %264, %248, %cst_95 {dimension_numbers = #tpu.dot_dimension_numbers<[1], [0], [0], [1], [0, 0, 1, 1], [], []>} : vector<8x16xbf16>, vector<16x32xbf16>, vector<8x32xf32> -> vector<8x32xf32>
    %266 = arith.truncf %265 : vector<8x32xf32> to vector<8x32xbf16>
    %c64_96 = arith.constant 64 : index
    %c0_97 = arith.constant 0 : index
    %267 = vector.load %arg16[%c64_96, %c0_97] : memref<128x128xbf16, #tpu.memory_space<vmem>>, vector<32x128xbf16>
    %cst_98 = arith.constant dense<0.000000e+00> : vector<8x128xf32>
    %268 = tpu.matmul %266, %267, %cst_98 {dimension_numbers = #tpu.dot_dimension_numbers<[1], [0], [0], [1], [0, 0, 1, 1], [], []>} : vector<8x32xbf16>, vector<32x128xbf16>, vector<8x128xf32> -> vector<8x128xf32>
    %269 = arith.addf %242, %268 : vector<8x128xf32>
    %270 = vector.extract_strided_slice %179 {offsets = [0, 96], sizes = [8, 32], strides = [1, 1]} : vector<8x128xf32> to vector<8x32xf32>
    %271 = arith.truncf %270 : vector<8x32xf32> to vector<8x32xbf16>
    %272 = vector.extract_strided_slice %186 {offsets = [0, 96], sizes = [16, 32], strides = [1, 1]} : vector<16x128xf32> to vector<16x32xf32>
    %273 = arith.truncf %272 : vector<16x32xf32> to vector<16x32xbf16>
    %274 = vector.extract_strided_slice %187 {offsets = [0, 96], sizes = [16, 32], strides = [1, 1]} : vector<16x128xf32> to vector<16x32xf32>
    %275 = arith.truncf %274 : vector<16x32xf32> to vector<16x32xbf16>
    %cst_99 = arith.constant dense<0.000000e+00> : vector<8x16xf32>
    %276 = tpu.matmul %271, %273, %cst_99 {dimension_numbers = #tpu.dot_dimension_numbers<[1], [1], [0], [0], [0, 0, 1, 0], [], []>} : vector<8x32xbf16>, vector<16x32xbf16>, vector<8x16xf32> -> vector<8x16xf32>
    %cst_100 = arith.constant 0.176776692 : f32
    %277 = vector.broadcast %cst_100 : f32 to vector<8x16xf32>
    %278 = arith.mulf %276, %277 : vector<8x16xf32>
    %279 = vector.broadcast %5 : vector<1x16xf32> to vector<8x16xf32>
    %280 = arith.addf %278, %279 : vector<8x16xf32>
    %cst_101 = arith.constant dense<0xFF800000> : vector<8xf32>
    %281 = vector.multi_reduction <maximumf>, %280, %cst_101 [1] : vector<8x16xf32> to vector<8xf32>
    %282 = vector.shape_cast %281 : vector<8xf32> to vector<8x1xf32>
    %283 = vector.broadcast %282 : vector<8x1xf32> to vector<8x16xf32>
    %284 = arith.subf %280, %283 : vector<8x16xf32>
    %285 = math.exp %284 : vector<8x16xf32>
    %cst_102 = arith.constant dense<0.000000e+00> : vector<8xf32>
    %286 = vector.multi_reduction <add>, %285, %cst_102 [1] : vector<8x16xf32> to vector<8xf32>
    %287 = vector.shape_cast %286 : vector<8xf32> to vector<8x1xf32>
    %288 = tpu.reciprocal %287 {approx = true} : vector<8x1xf32> -> vector<8x1xf32>
    %289 = vector.broadcast %288 : vector<8x1xf32> to vector<8x16xf32>
    %290 = arith.mulf %285, %289 : vector<8x16xf32>
    %291 = arith.truncf %290 : vector<8x16xf32> to vector<8x16xbf16>
    %cst_103 = arith.constant dense<0.000000e+00> : vector<8x32xf32>
    %292 = tpu.matmul %291, %275, %cst_103 {dimension_numbers = #tpu.dot_dimension_numbers<[1], [0], [0], [1], [0, 0, 1, 1], [], []>} : vector<8x16xbf16>, vector<16x32xbf16>, vector<8x32xf32> -> vector<8x32xf32>
    %293 = arith.truncf %292 : vector<8x32xf32> to vector<8x32xbf16>
    %c96_104 = arith.constant 96 : index
    %c0_105 = arith.constant 0 : index
    %294 = vector.load %arg16[%c96_104, %c0_105] : memref<128x128xbf16, #tpu.memory_space<vmem>>, vector<32x128xbf16>
    %cst_106 = arith.constant dense<0.000000e+00> : vector<8x128xf32>
    %295 = tpu.matmul %293, %294, %cst_106 {dimension_numbers = #tpu.dot_dimension_numbers<[1], [0], [0], [1], [0, 0, 1, 1], [], []>} : vector<8x32xbf16>, vector<32x128xbf16>, vector<8x128xf32> -> vector<8x128xf32>
    %296 = arith.addf %269, %295 : vector<8x128xf32>
    %297 = arith.addf %151, %296 : vector<8x128xf32>
    %c0_107 = arith.constant 0 : index
    %c0_108 = arith.constant 0 : index
    %298 = vector.load %arg17[%c0_107, %c0_108] : memref<1x128xf32, #tpu.memory_space<vmem>>, vector<1x128xf32>
    %299 = vector.broadcast %298 : vector<1x128xf32> to vector<8x128xf32>
    %300 = arith.addf %297, %299 : vector<8x128xf32>
    %c0_109 = arith.constant 0 : index
    %c0_110 = arith.constant 0 : index
    %301 = vector.load %arg18[%c0_109, %c0_110] : memref<1x128xf32, #tpu.memory_space<vmem>>, vector<1x128xf32>
    %c0_111 = arith.constant 0 : index
    %c0_112 = arith.constant 0 : index
    %302 = vector.load %arg19[%c0_111, %c0_112] : memref<1x128xf32, #tpu.memory_space<vmem>>, vector<1x128xf32>
    %cst_113 = arith.constant dense<0.000000e+00> : vector<8xf32>
    %303 = vector.multi_reduction <add>, %300, %cst_113 [1] : vector<8x128xf32> to vector<8xf32>
    %304 = vector.shape_cast %303 : vector<8xf32> to vector<8x1xf32>
    %cst_114 = arith.constant 1.280000e+02 : f32
    %305 = vector.broadcast %cst_114 : f32 to vector<8x1xf32>
    %306 = arith.divf %304, %305 : vector<8x1xf32>
    %307 = vector.broadcast %306 : vector<8x1xf32> to vector<8x128xf32>
    %308 = arith.subf %300, %307 : vector<8x128xf32>
    %309 = arith.mulf %308, %308 : vector<8x128xf32>
    %cst_115 = arith.constant dense<0.000000e+00> : vector<8xf32>
    %310 = vector.multi_reduction <add>, %309, %cst_115 [1] : vector<8x128xf32> to vector<8xf32>
    %311 = vector.shape_cast %310 : vector<8xf32> to vector<8x1xf32>
    %cst_116 = arith.constant 1.280000e+02 : f32
    %312 = vector.broadcast %cst_116 : f32 to vector<8x1xf32>
    %313 = arith.divf %311, %312 : vector<8x1xf32>
    %cst_117 = arith.constant 9.99999974E-6 : f32
    %314 = vector.broadcast %cst_117 : f32 to vector<8x1xf32>
    %315 = arith.addf %313, %314 : vector<8x1xf32>
    %316 = math.rsqrt %315 : vector<8x1xf32>
    %317 = vector.broadcast %316 : vector<8x1xf32> to vector<8x128xf32>
    %318 = arith.mulf %308, %317 : vector<8x128xf32>
    %319 = vector.broadcast %301 : vector<1x128xf32> to vector<8x128xf32>
    %320 = arith.mulf %318, %319 : vector<8x128xf32>
    %321 = vector.broadcast %302 : vector<1x128xf32> to vector<8x128xf32>
    %322 = arith.addf %320, %321 : vector<8x128xf32>
    %323 = arith.truncf %322 : vector<8x128xf32> to vector<8x128xbf16>
    %c0_118 = arith.constant 0 : index
    %c0_119 = arith.constant 0 : index
    %324 = vector.load %arg20[%c0_118, %c0_119] : memref<128x256xbf16, #tpu.memory_space<vmem>>, vector<128x256xbf16>
    %cst_120 = arith.constant dense<0.000000e+00> : vector<8x256xf32>
    %325 = tpu.matmul %323, %324, %cst_120 {dimension_numbers = #tpu.dot_dimension_numbers<[1], [0], [0], [1], [0, 0, 1, 1], [], []>} : vector<8x128xbf16>, vector<128x256xbf16>, vector<8x256xf32> -> vector<8x256xf32>
    %c0_121 = arith.constant 0 : index
    %c0_122 = arith.constant 0 : index
    %326 = vector.load %arg21[%c0_121, %c0_122] : memref<1x256xf32, #tpu.memory_space<vmem>>, vector<1x256xf32>
    %327 = vector.broadcast %326 : vector<1x256xf32> to vector<8x256xf32>
    %328 = arith.addf %325, %327 : vector<8x256xf32>
    %cst_123 = arith.constant 0.000000e+00 : f32
    %329 = vector.broadcast %cst_123 : f32 to vector<8x256xf32>
    %330 = arith.maximumf %328, %329 : vector<8x256xf32>
    %331 = arith.truncf %330 : vector<8x256xf32> to vector<8x256xbf16>
    %c0_124 = arith.constant 0 : index
    %c0_125 = arith.constant 0 : index
    %332 = vector.load %arg22[%c0_124, %c0_125] : memref<256x128xbf16, #tpu.memory_space<vmem>>, vector<256x128xbf16>
    %cst_126 = arith.constant dense<0.000000e+00> : vector<8x128xf32>
    %333 = tpu.matmul %331, %332, %cst_126 {dimension_numbers = #tpu.dot_dimension_numbers<[1], [0], [0], [1], [0, 0, 1, 1], [], []>} : vector<8x256xbf16>, vector<256x128xbf16>, vector<8x128xf32> -> vector<8x128xf32>
    %c0_127 = arith.constant 0 : index
    %c0_128 = arith.constant 0 : index
    %334 = vector.load %arg23[%c0_127, %c0_128] : memref<1x128xf32, #tpu.memory_space<vmem>>, vector<1x128xf32>
    %335 = vector.broadcast %334 : vector<1x128xf32> to vector<8x128xf32>
    %336 = arith.addf %333, %335 : vector<8x128xf32>
    %337 = arith.addf %300, %336 : vector<8x128xf32>
    %c0_129 = arith.constant 0 : index
    %c0_130 = arith.constant 0 : index
    %c0_131 = arith.constant 0 : index
    %338 = vector.load %arg24[%c0_129, %c0_130, %c0_131] : memref<1x8x128xf32, #tpu.memory_space<vmem>>, vector<1x8x128xf32>
    %339 = vector.shape_cast %338 : vector<1x8x128xf32> to vector<8x128xf32>
    %340 = vector.shape_cast %337 : vector<8x128xf32> to vector<1x8x128xf32>
    tpu.vector_store %arg24[%c0_129, %c0_130, %c0_131], %340 {strides = array<i32>} : memref<1x8x128xf32, #tpu.memory_space<vmem>>, vector<1x8x128xf32>,
    return
  }
  func.func @transform_0(%arg0: i32) -> (i32, i32, i32) {
    %c0_i32 = arith.constant 0 : i32
    %c0_i32_0 = arith.constant 0 : i32
    %c0_i32_1 = arith.constant 0 : i32
    return %arg0, %c0_i32, %c0_i32_0 : i32, i32, i32
  }
  func.func @transform_1(%arg0: i32) -> (i32, i32, i32) {
    %c0_i32 = arith.constant 0 : i32
    %c0_i32_0 = arith.constant 0 : i32
    %c0_i32_1 = arith.constant 0 : i32
    return %arg0, %c0_i32, %c0_i32_0 : i32, i32, i32
  }
  func.func @transform_2(%arg0: i32) -> (i32, i32, i32) {
    %c0_i32 = arith.constant 0 : i32
    %c0_i32_0 = arith.constant 0 : i32
    %c0_i32_1 = arith.constant 0 : i32
    return %arg0, %c0_i32, %c0_i32_0 : i32, i32, i32
  }
  func.func @transform_3(%arg0: i32) -> (i32, i32) {
    %c0_i32 = arith.constant 0 : i32
    %c0_i32_0 = arith.constant 0 : i32
    %c0_i32_1 = arith.constant 0 : i32
    return %c0_i32, %c0_i32_0 : i32, i32
  }
  func.func @transform_4(%arg0: i32) -> (i32, i32) {
    %c0_i32 = arith.constant 0 : i32
    %c0_i32_0 = arith.constant 0 : i32
    %c0_i32_1 = arith.constant 0 : i32
    return %c0_i32, %c0_i32_0 : i32, i32
  }
  func.func @transform_5(%arg0: i32) -> (i32, i32) {
    %c0_i32 = arith.constant 0 : i32
    %c0_i32_0 = arith.constant 0 : i32
    %c0_i32_1 = arith.constant 0 : i32
    return %c0_i32, %c0_i32_0 : i32, i32
  }
  func.func @transform_6(%arg0: i32) -> (i32, i32) {
    %c0_i32 = arith.constant 0 : i32
    %c0_i32_0 = arith.constant 0 : i32
    %c0_i32_1 = arith.constant 0 : i32
    return %c0_i32, %c0_i32_0 : i32, i32
  }
  func.func @transform_7(%arg0: i32) -> (i32, i32) {
    %c0_i32 = arith.constant 0 : i32
    %c0_i32_0 = arith.constant 0 : i32
    %c0_i32_1 = arith.constant 0 : i32
    return %c0_i32, %c0_i32_0 : i32, i32
  }
  func.func @transform_8(%arg0: i32) -> (i32, i32) {
    %c0_i32 = arith.constant 0 : i32
    %c0_i32_0 = arith.constant 0 : i32
    %c0_i32_1 = arith.constant 0 : i32
    return %c0_i32, %c0_i32_0 : i32, i32
  }
  func.func @transform_9(%arg0: i32) -> (i32, i32) {
    %c0_i32 = arith.constant 0 : i32
    %c0_i32_0 = arith.constant 0 : i32
    %c0_i32_1 = arith.constant 0 : i32
    return %c0_i32, %c0_i32_0 : i32, i32
  }
  func.func @transform_10(%arg0: i32) -> (i32, i32) {
    %c0_i32 = arith.constant 0 : i32
    %c0_i32_0 = arith.constant 0 : i32
    %c0_i32_1 = arith.constant 0 : i32
    return %c0_i32, %c0_i32_0 : i32, i32
  }
  func.func @transform_11(%arg0: i32) -> (i32, i32) {
    %c0_i32 = arith.constant 0 : i32
    %c0_i32_0 = arith.constant 0 : i32
    %c0_i32_1 = arith.constant 0 : i32
    return %c0_i32, %c0_i32_0 : i32, i32
  }
  func.func @transform_12(%arg0: i32) -> (i32, i32) {
    %c0_i32 = arith.constant 0 : i32
    %c0_i32_0 = arith.constant 0 : i32
    %c0_i32_1 = arith.constant 0 : i32
    return %c0_i32, %c0_i32_0 : i32, i32
  }
  func.func @transform_13(%arg0: i32) -> (i32, i32) {
    %c0_i32 = arith.constant 0 : i32
    %c0_i32_0 = arith.constant 0 : i32
    %c0_i32_1 = arith.constant 0 : i32
    return %c0_i32, %c0_i32_0 : i32, i32
  }
  func.func @transform_14(%arg0: i32) -> (i32, i32) {
    %c0_i32 = arith.constant 0 : i32
    %c0_i32_0 = arith.constant 0 : i32
    %c0_i32_1 = arith.constant 0 : i32
    return %c0_i32, %c0_i32_0 : i32, i32
  }
  func.func @transform_15(%arg0: i32) -> (i32, i32) {
    %c0_i32 = arith.constant 0 : i32
    %c0_i32_0 = arith.constant 0 : i32
    %c0_i32_1 = arith.constant 0 : i32
    return %c0_i32, %c0_i32_0 : i32, i32
  }
  func.func @transform_16(%arg0: i32) -> (i32, i32) {
    %c0_i32 = arith.constant 0 : i32
    %c0_i32_0 = arith.constant 0 : i32
    %c0_i32_1 = arith.constant 0 : i32
    return %c0_i32, %c0_i32_0 : i32, i32
  }
  func.func @transform_17(%arg0: i32) -> (i32, i32) {
    %c0_i32 = arith.constant 0 : i32
    %c0_i32_0 = arith.constant 0 : i32
    %c0_i32_1 = arith.constant 0 : i32
    return %c0_i32, %c0_i32_0 : i32, i32
  }
  func.func @transform_18(%arg0: i32) -> (i32, i32) {
    %c0_i32 = arith.constant 0 : i32
    %c0_i32_0 = arith.constant 0 : i32
    %c0_i32_1 = arith.constant 0 : i32
    return %c0_i32, %c0_i32_0 : i32, i32
  }
  func.func @transform_19(%arg0: i32) -> (i32, i32) {
    %c0_i32 = arith.constant 0 : i32
    %c0_i32_0 = arith.constant 0 : i32
    %c0_i32_1 = arith.constant 0 : i32
    return %c0_i32, %c0_i32_0 : i32, i32
  }
  func.func @transform_20(%arg0: i32) -> (i32, i32) {
    %c0_i32 = arith.constant 0 : i32
    %c0_i32_0 = arith.constant 0 : i32
    %c0_i32_1 = arith.constant 0 : i32
    return %c0_i32, %c0_i32_0 : i32, i32
  }
  func.func @transform_21(%arg0: i32) -> (i32, i32) {
    %c0_i32 = arith.constant 0 : i32
    %c0_i32_0 = arith.constant 0 : i32
    %c0_i32_1 = arith.constant 0 : i32
    return %c0_i32, %c0_i32_0 : i32, i32
  }
  func.func @transform_22(%arg0: i32) -> (i32, i32) {
    %c0_i32 = arith.constant 0 : i32
    %c0_i32_0 = arith.constant 0 : i32
    %c0_i32_1 = arith.constant 0 : i32
    return %c0_i32, %c0_i32_0 : i32, i32
  }
  func.func @transform_23(%arg0: i32) -> (i32, i32, i32) {
    %c0_i32 = arith.constant 0 : i32
    %c0_i32_0 = arith.constant 0 : i32
    %c0_i32_1 = arith.constant 0 : i32
    return %arg0, %c0_i32, %c0_i32_0 : i32, i32, i32
  }
}

module attributes {stable_mosaic.version = 11 : i64} {
  func.func @_decoder_layer_kernel(%arg0: i32, %arg1: memref<1x8x128xf32, #tpu.memory_space<vmem>>, %arg2: memref<1x16x128xf32, #tpu.memory_space<vmem>>, %arg3: memref<1x1x16xf32, #tpu.memory_space<vmem>>, %arg4: memref<1x128xf32, #tpu.memory_space<vmem>>, %arg5: memref<1x128xf32, #tpu.memory_space<vmem>>, %arg6: memref<128x384xbf16, #tpu.memory_space<vmem>>, %arg7: memref<1x384xf32, #tpu.memory_space<vmem>>, %arg8: memref<128x128xbf16, #tpu.memory_space<vmem>>, %arg9: memref<1x128xf32, #tpu.memory_space<vmem>>, %arg10: memref<1x128xf32, #tpu.memory_space<vmem>>, %arg11: memref<1x128xf32, #tpu.memory_space<vmem>>, %arg12: memref<128x128xbf16, #tpu.memory_space<vmem>>, %arg13: memref<1x128xf32, #tpu.memory_space<vmem>>, %arg14: memref<128x256xbf16, #tpu.memory_space<vmem>>, %arg15: memref<1x256xf32, #tpu.memory_space<vmem>>, %arg16: memref<128x128xbf16, #tpu.memory_space<vmem>>, %arg17: memref<1x128xf32, #tpu.memory_space<vmem>>, %arg18: memref<1x128xf32, #tpu.memory_space<vmem>>, %arg19: memref<1x128xf32, #tpu.memory_space<vmem>>, %arg20: memref<128x256xbf16, #tpu.memory_space<vmem>>, %arg21: memref<1x256xf32, #tpu.memory_space<vmem>>, %arg22: memref<256x128xbf16, #tpu.memory_space<vmem>>, %arg23: memref<1x128xf32, #tpu.memory_space<vmem>>, %arg24: memref<1x8x128xf32, #tpu.memory_space<vmem>>) attributes {dimension_semantics = [#tpu.dimension_semantics<parallel>], iteration_bounds = array<i64: 2>, scalar_prefetch = 0 : i64, scratch_operands = 0 : i64, tpu.core_type = #tpu.core_type<tc>, window_params = [{transform_indices = @transform_0, window_bounds = array<i64: 1, 8, 128>}, {transform_indices = @transform_1, window_bounds = array<i64: 1, 16, 128>}, {transform_indices = @transform_2, window_bounds = array<i64: 1, 1, 16>}, {pipeline_mode = #tpu.pipeline_mode<synchronous>, transform_indices = @transform_3, window_bounds = array<i64: 1, 128>}, {pipeline_mode = #tpu.pipeline_mode<synchronous>, transform_indices = @transform_4, window_bounds = array<i64: 1, 128>}, {pipeline_mode = #tpu.pipeline_mode<synchronous>, transform_indices = @transform_5, window_bounds = array<i64: 128, 384>}, {pipeline_mode = #tpu.pipeline_mode<synchronous>, transform_indices = @transform_6, window_bounds = array<i64: 1, 384>}, {pipeline_mode = #tpu.pipeline_mode<synchronous>, transform_indices = @transform_7, window_bounds = array<i64: 128, 128>}, {pipeline_mode = #tpu.pipeline_mode<synchronous>, transform_indices = @transform_8, window_bounds = array<i64: 1, 128>}, {pipeline_mode = #tpu.pipeline_mode<synchronous>, transform_indices = @transform_9, window_bounds = array<i64: 1, 128>}, {pipeline_mode = #tpu.pipeline_mode<synchronous>, transform_indices = @transform_10, window_bounds = array<i64: 1, 128>}, {pipeline_mode = #tpu.pipeline_mode<synchronous>, transform_indices = @transform_11, window_bounds = array<i64: 128, 128>}, {pipeline_mode = #tpu.pipeline_mode<synchronous>, transform_indices = @transform_12, window_bounds = array<i64: 1, 128>}, {pipeline_mode = #tpu.pipeline_mode<synchronous>, transform_indices = @transform_13, window_bounds = array<i64: 128, 256>}, {pipeline_mode = #tpu.pipeline_mode<synchronous>, transform_indices = @transform_14, window_bounds = array<i64: 1, 256>}, {pipeline_mode = #tpu.pipeline_mode<synchronous>, transform_indices = @transform_15, window_bounds = array<i64: 128, 128>}, {pipeline_mode = #tpu.pipeline_mode<synchronous>, transform_indices = @transform_16, window_bounds = array<i64: 1, 128>}, {pipeline_mode = #tpu.pipeline_mode<synchronous>, transform_indices = @transform_17, window_bounds = array<i64: 1, 128>}, {pipeline_mode = #tpu.pipeline_mode<synchronous>, transform_indices = @transform_18, window_bounds = array<i64: 1, 128>}, {pipeline_mode = #tpu.pipeline_mode<synchronous>, transform_indices = @transform_19, window_bounds = array<i64: 128, 256>}, {pipeline_mode = #tpu.pipeline_mode<synchronous>, transform_indices = @transform_20, window_bounds = array<i64: 1, 256>}, {pipeline_mode = #tpu.pipeline_mode<synchronous>, transform_indices = @transform_21, window_bounds = array<i64: 256, 128>}, {pipeline_mode = #tpu.pipeline_mode<synchronous>, transform_indices = @transform_22, window_bounds = array<i64: 1, 128>}, {transform_indices = @transform_23, window_bounds = array<i64: 1, 8, 128>}]} {
    %c0 = arith.constant 0 : index
    %c0_0 = arith.constant 0 : index
    %c0_1 = arith.constant 0 : index
    %0 = vector.load %arg1[%c0, %c0_0, %c0_1] : memref<1x8x128xf32, #tpu.memory_space<vmem>>, vector<1x8x128xf32>
    %1 = vector.shape_cast %0 : vector<1x8x128xf32> to vector<8x128xf32>
    %c0_2 = arith.constant 0 : index
    %c0_3 = arith.constant 0 : index
    %c0_4 = arith.constant 0 : index
    %2 = vector.load %arg2[%c0_2, %c0_3, %c0_4] : memref<1x16x128xf32, #tpu.memory_space<vmem>>, vector<1x16x128xf32>
    %3 = vector.shape_cast %2 : vector<1x16x128xf32> to vector<16x128xf32>
    %c0_5 = arith.constant 0 : index
    %c0_6 = arith.constant 0 : index
    %c0_7 = arith.constant 0 : index
    %4 = vector.load %arg3[%c0_5, %c0_6, %c0_7] : memref<1x1x16xf32, #tpu.memory_space<vmem>>, vector<1x1x16xf32>
    %5 = vector.shape_cast %4 : vector<1x1x16xf32> to vector<1x16xf32>
    %c0_8 = arith.constant 0 : index
    %c0_9 = arith.constant 0 : index
    %6 = vector.load %arg4[%c0_8, %c0_9] : memref<1x128xf32, #tpu.memory_space<vmem>>, vector<1x128xf32>
    %c0_10 = arith.constant 0 : index
    %c0_11 = arith.constant 0 : index
    %7 = vector.load %arg5[%c0_10, %c0_11] : memref<1x128xf32, #tpu.memory_space<vmem>>, vector<1x128xf32>
    %cst = arith.constant dense<0.000000e+00> : vector<8xf32>
    %8 = vector.multi_reduction <add>, %1, %cst [1] : vector<8x128xf32> to vector<8xf32>
    %9 = vector.shape_cast %8 : vector<8xf32> to vector<8x1xf32>
    %cst_12 = arith.constant 1.280000e+02 : f32
    %10 = vector.broadcast %cst_12 : f32 to vector<8x1xf32>
    %11 = arith.divf %9, %10 : vector<8x1xf32>
    %12 = vector.broadcast %11 : vector<8x1xf32> to vector<8x128xf32>
    %13 = arith.subf %1, %12 : vector<8x128xf32>
    %14 = arith.mulf %13, %13 : vector<8x128xf32>
    %cst_13 = arith.constant dense<0.000000e+00> : vector<8xf32>
    %15 = vector.multi_reduction <add>, %14, %cst_13 [1] : vector<8x128xf32> to vector<8xf32>
    %16 = vector.shape_cast %15 : vector<8xf32> to vector<8x1xf32>
    %cst_14 = arith.constant 1.280000e+02 : f32
    %17 = vector.broadcast %cst_14 : f32 to vector<8x1xf32>
    %18 = arith.divf %16, %17 : vector<8x1xf32>
    %cst_15 = arith.constant 9.99999974E-6 : f32
    %19 = vector.broadcast %cst_15 : f32 to vector<8x1xf32>
    %20 = arith.addf %18, %19 : vector<8x1xf32>
    %21 = math.rsqrt %20 : vector<8x1xf32>
    %22 = vector.broadcast %21 : vector<8x1xf32> to vector<8x128xf32>
    %23 = arith.mulf %13, %22 : vector<8x128xf32>
    %24 = vector.broadcast %6 : vector<1x128xf32> to vector<8x128xf32>
    %25 = arith.mulf %23, %24 : vector<8x128xf32>
    %26 = vector.broadcast %7 : vector<1x128xf32> to vector<8x128xf32>
    %27 = arith.addf %25, %26 : vector<8x128xf32>
    %28 = arith.truncf %27 : vector<8x128xf32> to vector<8x128xbf16>
    %c0_16 = arith.constant 0 : index
    %c0_17 = arith.constant 0 : index
    %29 = vector.load %arg6[%c0_16, %c0_17] : memref<128x384xbf16, #tpu.memory_space<vmem>>, vector<128x384xbf16>
    %cst_18 = arith.constant dense<0.000000e+00> : vector<8x384xf32>
    %30 = tpu.matmul %28, %29, %cst_18 {dimension_numbers = #tpu.dot_dimension_numbers<[1], [0], [0], [1], [0, 0, 1, 1], [], []>} : vector<8x128xbf16>, vector<128x384xbf16>, vector<8x384xf32> -> vector<8x384xf32>
    %c0_19 = arith.constant 0 : index
    %c0_20 = arith.constant 0 : index
    %31 = vector.load %arg7[%c0_19, %c0_20] : memref<1x384xf32, #tpu.memory_space<vmem>>, vector<1x384xf32>
    %32 = vector.broadcast %31 : vector<1x384xf32> to vector<8x384xf32>
    %33 = arith.addf %30, %32 : vector<8x384xf32>
    %34 = tpu.iota {dimensions = array<i32: 0>} : vector<8x8xi32>
    %35 = tpu.iota {dimensions = array<i32: 1>} : vector<8x8xi32>
    %36 = arith.cmpi sgt, %35, %34 : vector<8x8xi32>
    %cst_21 = arith.constant -1.000000e+09 : f32
    %cst_22 = arith.constant 0.000000e+00 : f32
    %37 = vector.broadcast %cst_21 : f32 to vector<8x8xf32>
    %38 = vector.broadcast %cst_22 : f32 to vector<8x8xf32>
    %39 = arith.select %36, %37, %38 : vector<8x8xi1>, vector<8x8xf32>
    %40 = vector.extract_strided_slice %33 {offsets = [0, 0], sizes = [8, 128], strides = [1, 1]} : vector<8x384xf32> to vector<8x128xf32>
    %41 = vector.extract_strided_slice %33 {offsets = [0, 128], sizes = [8, 128], strides = [1, 1]} : vector<8x384xf32> to vector<8x128xf32>
    %42 = vector.extract_strided_slice %33 {offsets = [0, 256], sizes = [8, 128], strides = [1, 1]} : vector<8x384xf32> to vector<8x128xf32>
    %cst_23 = arith.constant 0.000000e+00 : f32
    %43 = vector.broadcast %cst_23 : f32 to vector<8x128xf32>
    %44 = vector.extract_strided_slice %40 {offsets = [0, 0], sizes = [8, 32], strides = [1, 1]} : vector<8x128xf32> to vector<8x32xf32>
    %45 = arith.truncf %44 : vector<8x32xf32> to vector<8x32xbf16>
    %46 = vector.extract_strided_slice %41 {offsets = [0, 0], sizes = [8, 32], strides = [1, 1]} : vector<8x128xf32> to vector<8x32xf32>
    %47 = arith.truncf %46 : vector<8x32xf32> to vector<8x32xbf16>
    %48 = vector.extract_strided_slice %42 {offsets = [0, 0], sizes = [8, 32], strides = [1, 1]} : vector<8x128xf32> to vector<8x32xf32>
    %49 = arith.truncf %48 : vector<8x32xf32> to vector<8x32xbf16>
    %cst_24 = arith.constant dense<0.000000e+00> : vector<8x8xf32>
    %50 = tpu.matmul %45, %47, %cst_24 {dimension_numbers = #tpu.dot_dimension_numbers<[1], [1], [0], [0], [0, 0, 1, 0], [], []>} : vector<8x32xbf16>, vector<8x32xbf16>, vector<8x8xf32> -> vector<8x8xf32>
    %cst_25 = arith.constant 0.176776692 : f32
    %51 = vector.broadcast %cst_25 : f32 to vector<8x8xf32>
    %52 = arith.mulf %50, %51 : vector<8x8xf32>
    %53 = arith.addf %52, %39 : vector<8x8xf32>
    %cst_26 = arith.constant dense<0xFF800000> : vector<8xf32>
    %54 = vector.multi_reduction <maximumf>, %53, %cst_26 [1] : vector<8x8xf32> to vector<8xf32>
    %55 = vector.shape_cast %54 : vector<8xf32> to vector<8x1xf32>
    %56 = vector.broadcast %55 : vector<8x1xf32> to vector<8x8xf32>
    %57 = arith.subf %53, %56 : vector<8x8xf32>
    %58 = math.exp %57 : vector<8x8xf32>
    %cst_27 = arith.constant dense<0.000000e+00> : vector<8xf32>
    %59 = vector.multi_reduction <add>, %58, %cst_27 [1] : vector<8x8xf32> to vector<8xf32>
    %60 = vector.shape_cast %59 : vector<8xf32> to vector<8x1xf32>
    %61 = tpu.reciprocal %60 {approx = true} : vector<8x1xf32> -> vector<8x1xf32>
    %62 = vector.broadcast %61 : vector<8x1xf32> to vector<8x8xf32>
    %63 = arith.mulf %58, %62 : vector<8x8xf32>
    %64 = arith.truncf %63 : vector<8x8xf32> to vector<8x8xbf16>
    %cst_28 = arith.constant dense<0.000000e+00> : vector<8x32xf32>
    %65 = tpu.matmul %64, %49, %cst_28 {dimension_numbers = #tpu.dot_dimension_numbers<[1], [0], [0], [1], [0, 0, 1, 1], [], []>} : vector<8x8xbf16>, vector<8x32xbf16>, vector<8x32xf32> -> vector<8x32xf32>
    %66 = arith.truncf %65 : vector<8x32xf32> to vector<8x32xbf16>
    %c0_29 = arith.constant 0 : index
    %c0_30 = arith.constant 0 : index
    %67 = vector.load %arg8[%c0_29, %c0_30] : memref<128x128xbf16, #tpu.memory_space<vmem>>, vector<32x128xbf16>
    %cst_31 = arith.constant dense<0.000000e+00> : vector<8x128xf32>
    %68 = tpu.matmul %66, %67, %cst_31 {dimension_numbers = #tpu.dot_dimension_numbers<[1], [0], [0], [1], [0, 0, 1, 1], [], []>} : vector<8x32xbf16>, vector<32x128xbf16>, vector<8x128xf32> -> vector<8x128xf32>
    %69 = arith.addf %43, %68 : vector<8x128xf32>
    %70 = vector.extract_strided_slice %40 {offsets = [0, 32], sizes = [8, 32], strides = [1, 1]} : vector<8x128xf32> to vector<8x32xf32>
    %71 = arith.truncf %70 : vector<8x32xf32> to vector<8x32xbf16>
    %72 = vector.extract_strided_slice %41 {offsets = [0, 32], sizes = [8, 32], strides = [1, 1]} : vector<8x128xf32> to vector<8x32xf32>
    %73 = arith.truncf %72 : vector<8x32xf32> to vector<8x32xbf16>
    %74 = vector.extract_strided_slice %42 {offsets = [0, 32], sizes = [8, 32], strides = [1, 1]} : vector<8x128xf32> to vector<8x32xf32>
    %75 = arith.truncf %74 : vector<8x32xf32> to vector<8x32xbf16>
    %cst_32 = arith.constant dense<0.000000e+00> : vector<8x8xf32>
    %76 = tpu.matmul %71, %73, %cst_32 {dimension_numbers = #tpu.dot_dimension_numbers<[1], [1], [0], [0], [0, 0, 1, 0], [], []>} : vector<8x32xbf16>, vector<8x32xbf16>, vector<8x8xf32> -> vector<8x8xf32>
    %cst_33 = arith.constant 0.176776692 : f32
    %77 = vector.broadcast %cst_33 : f32 to vector<8x8xf32>
    %78 = arith.mulf %76, %77 : vector<8x8xf32>
    %79 = arith.addf %78, %39 : vector<8x8xf32>
    %cst_34 = arith.constant dense<0xFF800000> : vector<8xf32>
    %80 = vector.multi_reduction <maximumf>, %79, %cst_34 [1] : vector<8x8xf32> to vector<8xf32>
    %81 = vector.shape_cast %80 : vector<8xf32> to vector<8x1xf32>
    %82 = vector.broadcast %81 : vector<8x1xf32> to vector<8x8xf32>
    %83 = arith.subf %79, %82 : vector<8x8xf32>
    %84 = math.exp %83 : vector<8x8xf32>
    %cst_35 = arith.constant dense<0.000000e+00> : vector<8xf32>
    %85 = vector.multi_reduction <add>, %84, %cst_35 [1] : vector<8x8xf32> to vector<8xf32>
    %86 = vector.shape_cast %85 : vector<8xf32> to vector<8x1xf32>
    %87 = tpu.reciprocal %86 {approx = true} : vector<8x1xf32> -> vector<8x1xf32>
    %88 = vector.broadcast %87 : vector<8x1xf32> to vector<8x8xf32>
    %89 = arith.mulf %84, %88 : vector<8x8xf32>
    %90 = arith.truncf %89 : vector<8x8xf32> to vector<8x8xbf16>
    %cst_36 = arith.constant dense<0.000000e+00> : vector<8x32xf32>
    %91 = tpu.matmul %90, %75, %cst_36 {dimension_numbers = #tpu.dot_dimension_numbers<[1], [0], [0], [1], [0, 0, 1, 1], [], []>} : vector<8x8xbf16>, vector<8x32xbf16>, vector<8x32xf32> -> vector<8x32xf32>
    %92 = arith.truncf %91 : vector<8x32xf32> to vector<8x32xbf16>
    %c32 = arith.constant 32 : index
    %c0_37 = arith.constant 0 : index
    %93 = vector.load %arg8[%c32, %c0_37] : memref<128x128xbf16, #tpu.memory_space<vmem>>, vector<32x128xbf16>
    %cst_38 = arith.constant dense<0.000000e+00> : vector<8x128xf32>
    %94 = tpu.matmul %92, %93, %cst_38 {dimension_numbers = #tpu.dot_dimension_numbers<[1], [0], [0], [1], [0, 0, 1, 1], [], []>} : vector<8x32xbf16>, vector<32x128xbf16>, vector<8x128xf32> -> vector<8x128xf32>
    %95 = arith.addf %69, %94 : vector<8x128xf32>
    %96 = vector.extract_strided_slice %40 {offsets = [0, 64], sizes = [8, 32], strides = [1, 1]} : vector<8x128xf32> to vector<8x32xf32>
    %97 = arith.truncf %96 : vector<8x32xf32> to vector<8x32xbf16>
    %98 = vector.extract_strided_slice %41 {offsets = [0, 64], sizes = [8, 32], strides = [1, 1]} : vector<8x128xf32> to vector<8x32xf32>
    %99 = arith.truncf %98 : vector<8x32xf32> to vector<8x32xbf16>
    %100 = vector.extract_strided_slice %42 {offsets = [0, 64], sizes = [8, 32], strides = [1, 1]} : vector<8x128xf32> to vector<8x32xf32>
    %101 = arith.truncf %100 : vector<8x32xf32> to vector<8x32xbf16>
    %cst_39 = arith.constant dense<0.000000e+00> : vector<8x8xf32>
    %102 = tpu.matmul %97, %99, %cst_39 {dimension_numbers = #tpu.dot_dimension_numbers<[1], [1], [0], [0], [0, 0, 1, 0], [], []>} : vector<8x32xbf16>, vector<8x32xbf16>, vector<8x8xf32> -> vector<8x8xf32>
    %cst_40 = arith.constant 0.176776692 : f32
    %103 = vector.broadcast %cst_40 : f32 to vector<8x8xf32>
    %104 = arith.mulf %102, %103 : vector<8x8xf32>
    %105 = arith.addf %104, %39 : vector<8x8xf32>
    %cst_41 = arith.constant dense<0xFF800000> : vector<8xf32>
    %106 = vector.multi_reduction <maximumf>, %105, %cst_41 [1] : vector<8x8xf32> to vector<8xf32>
    %107 = vector.shape_cast %106 : vector<8xf32> to vector<8x1xf32>
    %108 = vector.broadcast %107 : vector<8x1xf32> to vector<8x8xf32>
    %109 = arith.subf %105, %108 : vector<8x8xf32>
    %110 = math.exp %109 : vector<8x8xf32>
    %cst_42 = arith.constant dense<0.000000e+00> : vector<8xf32>
    %111 = vector.multi_reduction <add>, %110, %cst_42 [1] : vector<8x8xf32> to vector<8xf32>
    %112 = vector.shape_cast %111 : vector<8xf32> to vector<8x1xf32>
    %113 = tpu.reciprocal %112 {approx = true} : vector<8x1xf32> -> vector<8x1xf32>
    %114 = vector.broadcast %113 : vector<8x1xf32> to vector<8x8xf32>
    %115 = arith.mulf %110, %114 : vector<8x8xf32>
    %116 = arith.truncf %115 : vector<8x8xf32> to vector<8x8xbf16>
    %cst_43 = arith.constant dense<0.000000e+00> : vector<8x32xf32>
    %117 = tpu.matmul %116, %101, %cst_43 {dimension_numbers = #tpu.dot_dimension_numbers<[1], [0], [0], [1], [0, 0, 1, 1], [], []>} : vector<8x8xbf16>, vector<8x32xbf16>, vector<8x32xf32> -> vector<8x32xf32>
    %118 = arith.truncf %117 : vector<8x32xf32> to vector<8x32xbf16>
    %c64 = arith.constant 64 : index
    %c0_44 = arith.constant 0 : index
    %119 = vector.load %arg8[%c64, %c0_44] : memref<128x128xbf16, #tpu.memory_space<vmem>>, vector<32x128xbf16>
    %cst_45 = arith.constant dense<0.000000e+00> : vector<8x128xf32>
    %120 = tpu.matmul %118, %119, %cst_45 {dimension_numbers = #tpu.dot_dimension_numbers<[1], [0], [0], [1], [0, 0, 1, 1], [], []>} : vector<8x32xbf16>, vector<32x128xbf16>, vector<8x128xf32> -> vector<8x128xf32>
    %121 = arith.addf %95, %120 : vector<8x128xf32>
    %122 = vector.extract_strided_slice %40 {offsets = [0, 96], sizes = [8, 32], strides = [1, 1]} : vector<8x128xf32> to vector<8x32xf32>
    %123 = arith.truncf %122 : vector<8x32xf32> to vector<8x32xbf16>
    %124 = vector.extract_strided_slice %41 {offsets = [0, 96], sizes = [8, 32], strides = [1, 1]} : vector<8x128xf32> to vector<8x32xf32>
    %125 = arith.truncf %124 : vector<8x32xf32> to vector<8x32xbf16>
    %126 = vector.extract_strided_slice %42 {offsets = [0, 96], sizes = [8, 32], strides = [1, 1]} : vector<8x128xf32> to vector<8x32xf32>
    %127 = arith.truncf %126 : vector<8x32xf32> to vector<8x32xbf16>
    %cst_46 = arith.constant dense<0.000000e+00> : vector<8x8xf32>
    %128 = tpu.matmul %123, %125, %cst_46 {dimension_numbers = #tpu.dot_dimension_numbers<[1], [1], [0], [0], [0, 0, 1, 0], [], []>} : vector<8x32xbf16>, vector<8x32xbf16>, vector<8x8xf32> -> vector<8x8xf32>
    %cst_47 = arith.constant 0.176776692 : f32
    %129 = vector.broadcast %cst_47 : f32 to vector<8x8xf32>
    %130 = arith.mulf %128, %129 : vector<8x8xf32>
    %131 = arith.addf %130, %39 : vector<8x8xf32>
    %cst_48 = arith.constant dense<0xFF800000> : vector<8xf32>
    %132 = vector.multi_reduction <maximumf>, %131, %cst_48 [1] : vector<8x8xf32> to vector<8xf32>
    %133 = vector.shape_cast %132 : vector<8xf32> to vector<8x1xf32>
    %134 = vector.broadcast %133 : vector<8x1xf32> to vector<8x8xf32>
    %135 = arith.subf %131, %134 : vector<8x8xf32>
    %136 = math.exp %135 : vector<8x8xf32>
    %cst_49 = arith.constant dense<0.000000e+00> : vector<8xf32>
    %137 = vector.multi_reduction <add>, %136, %cst_49 [1] : vector<8x8xf32> to vector<8xf32>
    %138 = vector.shape_cast %137 : vector<8xf32> to vector<8x1xf32>
    %139 = tpu.reciprocal %138 {approx = true} : vector<8x1xf32> -> vector<8x1xf32>
    %140 = vector.broadcast %139 : vector<8x1xf32> to vector<8x8xf32>
    %141 = arith.mulf %136, %140 : vector<8x8xf32>
    %142 = arith.truncf %141 : vector<8x8xf32> to vector<8x8xbf16>
    %cst_50 = arith.constant dense<0.000000e+00> : vector<8x32xf32>
    %143 = tpu.matmul %142, %127, %cst_50 {dimension_numbers = #tpu.dot_dimension_numbers<[1], [0], [0], [1], [0, 0, 1, 1], [], []>} : vector<8x8xbf16>, vector<8x32xbf16>, vector<8x32xf32> -> vector<8x32xf32>
    %144 = arith.truncf %143 : vector<8x32xf32> to vector<8x32xbf16>
    %c96 = arith.constant 96 : index
    %c0_51 = arith.constant 0 : index
    %145 = vector.load %arg8[%c96, %c0_51] : memref<128x128xbf16, #tpu.memory_space<vmem>>, vector<32x128xbf16>
    %cst_52 = arith.constant dense<0.000000e+00> : vector<8x128xf32>
    %146 = tpu.matmul %144, %145, %cst_52 {dimension_numbers = #tpu.dot_dimension_numbers<[1], [0], [0], [1], [0, 0, 1, 1], [], []>} : vector<8x32xbf16>, vector<32x128xbf16>, vector<8x128xf32> -> vector<8x128xf32>
    %147 = arith.addf %121, %146 : vector<8x128xf32>
    %148 = arith.addf %1, %147 : vector<8x128xf32>
    %c0_53 = arith.constant 0 : index
    %c0_54 = arith.constant 0 : index
    %149 = vector.load %arg9[%c0_53, %c0_54] : memref<1x128xf32, #tpu.memory_space<vmem>>, vector<1x128xf32>
    %150 = vector.broadcast %149 : vector<1x128xf32> to vector<8x128xf32>
    %151 = arith.addf %148, %150 : vector<8x128xf32>
    %c0_55 = arith.constant 0 : index
    %c0_56 = arith.constant 0 : index
    %152 = vector.load %arg10[%c0_55, %c0_56] : memref<1x128xf32, #tpu.memory_space<vmem>>, vector<1x128xf32>
    %c0_57 = arith.constant 0 : index
    %c0_58 = arith.constant 0 : index
    %153 = vector.load %arg11[%c0_57, %c0_58] : memref<1x128xf32, #tpu.memory_space<vmem>>, vector<1x128xf32>
    %cst_59 = arith.constant dense<0.000000e+00> : vector<8xf32>
    %154 = vector.multi_reduction <add>, %151, %cst_59 [1] : vector<8x128xf32> to vector<8xf32>
    %155 = vector.shape_cast %154 : vector<8xf32> to vector<8x1xf32>
    %cst_60 = arith.constant 1.280000e+02 : f32
    %156 = vector.broadcast %cst_60 : f32 to vector<8x1xf32>
    %157 = arith.divf %155, %156 : vector<8x1xf32>
    %158 = vector.broadcast %157 : vector<8x1xf32> to vector<8x128xf32>
    %159 = arith.subf %151, %158 : vector<8x128xf32>
    %160 = arith.mulf %159, %159 : vector<8x128xf32>
    %cst_61 = arith.constant dense<0.000000e+00> : vector<8xf32>
    %161 = vector.multi_reduction <add>, %160, %cst_61 [1] : vector<8x128xf32> to vector<8xf32>
    %162 = vector.shape_cast %161 : vector<8xf32> to vector<8x1xf32>
    %cst_62 = arith.constant 1.280000e+02 : f32
    %163 = vector.broadcast %cst_62 : f32 to vector<8x1xf32>
    %164 = arith.divf %162, %163 : vector<8x1xf32>
    %cst_63 = arith.constant 9.99999974E-6 : f32
    %165 = vector.broadcast %cst_63 : f32 to vector<8x1xf32>
    %166 = arith.addf %164, %165 : vector<8x1xf32>
    %167 = math.rsqrt %166 : vector<8x1xf32>
    %168 = vector.broadcast %167 : vector<8x1xf32> to vector<8x128xf32>
    %169 = arith.mulf %159, %168 : vector<8x128xf32>
    %170 = vector.broadcast %152 : vector<1x128xf32> to vector<8x128xf32>
    %171 = arith.mulf %169, %170 : vector<8x128xf32>
    %172 = vector.broadcast %153 : vector<1x128xf32> to vector<8x128xf32>
    %173 = arith.addf %171, %172 : vector<8x128xf32>
    %174 = arith.truncf %173 : vector<8x128xf32> to vector<8x128xbf16>
    %c0_64 = arith.constant 0 : index
    %c0_65 = arith.constant 0 : index
    %175 = vector.load %arg12[%c0_64, %c0_65] : memref<128x128xbf16, #tpu.memory_space<vmem>>, vector<128x128xbf16>
    %cst_66 = arith.constant dense<0.000000e+00> : vector<8x128xf32>
    %176 = tpu.matmul %174, %175, %cst_66 {dimension_numbers = #tpu.dot_dimension_numbers<[1], [0], [0], [1], [0, 0, 1, 1], [], []>} : vector<8x128xbf16>, vector<128x128xbf16>, vector<8x128xf32> -> vector<8x128xf32>
    %c0_67 = arith.constant 0 : index
    %c0_68 = arith.constant 0 : index
    %177 = vector.load %arg13[%c0_67, %c0_68] : memref<1x128xf32, #tpu.memory_space<vmem>>, vector<1x128xf32>
    %178 = vector.broadcast %177 : vector<1x128xf32> to vector<8x128xf32>
    %179 = arith.addf %176, %178 : vector<8x128xf32>
    %180 = arith.truncf %3 : vector<16x128xf32> to vector<16x128xbf16>
    %c0_69 = arith.constant 0 : index
    %c0_70 = arith.constant 0 : index
    %181 = vector.load %arg14[%c0_69, %c0_70] : memref<128x256xbf16, #tpu.memory_space<vmem>>, vector<128x256xbf16>
    %cst_71 = arith.constant dense<0.000000e+00> : vector<16x256xf32>
    %182 = tpu.matmul %180, %181, %cst_71 {dimension_numbers = #tpu.dot_dimension_numbers<[1], [0], [0], [1], [0, 0, 1, 1], [], []>} : vector<16x128xbf16>, vector<128x256xbf16>, vector<16x256xf32> -> vector<16x256xf32>
    %c0_72 = arith.constant 0 : index
    %c0_73 = arith.constant 0 : index
    %183 = vector.load %arg15[%c0_72, %c0_73] : memref<1x256xf32, #tpu.memory_space<vmem>>, vector<1x256xf32>
    %184 = vector.broadcast %183 : vector<1x256xf32> to vector<16x256xf32>
    %185 = arith.addf %182, %184 : vector<16x256xf32>
    %186 = vector.extract_strided_slice %185 {offsets = [0, 0], sizes = [16, 128], strides = [1, 1]} : vector<16x256xf32> to vector<16x128xf32>
    %187 = vector.extract_strided_slice %185 {offsets = [0, 128], sizes = [16, 128], strides = [1, 1]} : vector<16x256xf32> to vector<16x128xf32>
    %cst_74 = arith.constant 0.000000e+00 : f32
    %188 = vector.broadcast %cst_74 : f32 to vector<8x128xf32>
    %189 = vector.extract_strided_slice %179 {offsets = [0, 0], sizes = [8, 32], strides = [1, 1]} : vector<8x128xf32> to vector<8x32xf32>
    %190 = arith.truncf %189 : vector<8x32xf32> to vector<8x32xbf16>
    %191 = vector.extract_strided_slice %186 {offsets = [0, 0], sizes = [16, 32], strides = [1, 1]} : vector<16x128xf32> to vector<16x32xf32>
    %192 = arith.truncf %191 : vector<16x32xf32> to vector<16x32xbf16>
    %193 = vector.extract_strided_slice %187 {offsets = [0, 0], sizes = [16, 32], strides = [1, 1]} : vector<16x128xf32> to vector<16x32xf32>
    %194 = arith.truncf %193 : vector<16x32xf32> to vector<16x32xbf16>
    %cst_75 = arith.constant dense<0.000000e+00> : vector<8x16xf32>
    %195 = tpu.matmul %190, %192, %cst_75 {dimension_numbers = #tpu.dot_dimension_numbers<[1], [1], [0], [0], [0, 0, 1, 0], [], []>} : vector<8x32xbf16>, vector<16x32xbf16>, vector<8x16xf32> -> vector<8x16xf32>
    %cst_76 = arith.constant 0.176776692 : f32
    %196 = vector.broadcast %cst_76 : f32 to vector<8x16xf32>
    %197 = arith.mulf %195, %196 : vector<8x16xf32>
    %198 = vector.broadcast %5 : vector<1x16xf32> to vector<8x16xf32>
    %199 = arith.addf %197, %198 : vector<8x16xf32>
    %cst_77 = arith.constant dense<0xFF800000> : vector<8xf32>
    %200 = vector.multi_reduction <maximumf>, %199, %cst_77 [1] : vector<8x16xf32> to vector<8xf32>
    %201 = vector.shape_cast %200 : vector<8xf32> to vector<8x1xf32>
    %202 = vector.broadcast %201 : vector<8x1xf32> to vector<8x16xf32>
    %203 = arith.subf %199, %202 : vector<8x16xf32>
    %204 = math.exp %203 : vector<8x16xf32>
    %cst_78 = arith.constant dense<0.000000e+00> : vector<8xf32>
    %205 = vector.multi_reduction <add>, %204, %cst_78 [1] : vector<8x16xf32> to vector<8xf32>
    %206 = vector.shape_cast %205 : vector<8xf32> to vector<8x1xf32>
    %207 = tpu.reciprocal %206 {approx = true} : vector<8x1xf32> -> vector<8x1xf32>
    %208 = vector.broadcast %207 : vector<8x1xf32> to vector<8x16xf32>
    %209 = arith.mulf %204, %208 : vector<8x16xf32>
    %210 = arith.truncf %209 : vector<8x16xf32> to vector<8x16xbf16>
    %cst_79 = arith.constant dense<0.000000e+00> : vector<8x32xf32>
    %211 = tpu.matmul %210, %194, %cst_79 {dimension_numbers = #tpu.dot_dimension_numbers<[1], [0], [0], [1], [0, 0, 1, 1], [], []>} : vector<8x16xbf16>, vector<16x32xbf16>, vector<8x32xf32> -> vector<8x32xf32>
    %212 = arith.truncf %211 : vector<8x32xf32> to vector<8x32xbf16>
    %c0_80 = arith.constant 0 : index
    %c0_81 = arith.constant 0 : index
    %213 = vector.load %arg16[%c0_80, %c0_81] : memref<128x128xbf16, #tpu.memory_space<vmem>>, vector<32x128xbf16>
    %cst_82 = arith.constant dense<0.000000e+00> : vector<8x128xf32>
    %214 = tpu.matmul %212, %213, %cst_82 {dimension_numbers = #tpu.dot_dimension_numbers<[1], [0], [0], [1], [0, 0, 1, 1], [], []>} : vector<8x32xbf16>, vector<32x128xbf16>, vector<8x128xf32> -> vector<8x128xf32>
    %215 = arith.addf %188, %214 : vector<8x128xf32>
    %216 = vector.extract_strided_slice %179 {offsets = [0, 32], sizes = [8, 32], strides = [1, 1]} : vector<8x128xf32> to vector<8x32xf32>
    %217 = arith.truncf %216 : vector<8x32xf32> to vector<8x32xbf16>
    %218 = vector.extract_strided_slice %186 {offsets = [0, 32], sizes = [16, 32], strides = [1, 1]} : vector<16x128xf32> to vector<16x32xf32>
    %219 = arith.truncf %218 : vector<16x32xf32> to vector<16x32xbf16>
    %220 = vector.extract_strided_slice %187 {offsets = [0, 32], sizes = [16, 32], strides = [1, 1]} : vector<16x128xf32> to vector<16x32xf32>
    %221 = arith.truncf %220 : vector<16x32xf32> to vector<16x32xbf16>
    %cst_83 = arith.constant dense<0.000000e+00> : vector<8x16xf32>
    %222 = tpu.matmul %217, %219, %cst_83 {dimension_numbers = #tpu.dot_dimension_numbers<[1], [1], [0], [0], [0, 0, 1, 0], [], []>} : vector<8x32xbf16>, vector<16x32xbf16>, vector<8x16xf32> -> vector<8x16xf32>
    %cst_84 = arith.constant 0.176776692 : f32
    %223 = vector.broadcast %cst_84 : f32 to vector<8x16xf32>
    %224 = arith.mulf %222, %223 : vector<8x16xf32>
    %225 = vector.broadcast %5 : vector<1x16xf32> to vector<8x16xf32>
    %226 = arith.addf %224, %225 : vector<8x16xf32>
    %cst_85 = arith.constant dense<0xFF800000> : vector<8xf32>
    %227 = vector.multi_reduction <maximumf>, %226, %cst_85 [1] : vector<8x16xf32> to vector<8xf32>
    %228 = vector.shape_cast %227 : vector<8xf32> to vector<8x1xf32>
    %229 = vector.broadcast %228 : vector<8x1xf32> to vector<8x16xf32>
    %230 = arith.subf %226, %229 : vector<8x16xf32>
    %231 = math.exp %230 : vector<8x16xf32>
    %cst_86 = arith.constant dense<0.000000e+00> : vector<8xf32>
    %232 = vector.multi_reduction <add>, %231, %cst_86 [1] : vector<8x16xf32> to vector<8xf32>
    %233 = vector.shape_cast %232 : vector<8xf32> to vector<8x1xf32>
    %234 = tpu.reciprocal %233 {approx = true} : vector<8x1xf32> -> vector<8x1xf32>
    %235 = vector.broadcast %234 : vector<8x1xf32> to vector<8x16xf32>
    %236 = arith.mulf %231, %235 : vector<8x16xf32>
    %237 = arith.truncf %236 : vector<8x16xf32> to vector<8x16xbf16>
    %cst_87 = arith.constant dense<0.000000e+00> : vector<8x32xf32>
    %238 = tpu.matmul %237, %221, %cst_87 {dimension_numbers = #tpu.dot_dimension_numbers<[1], [0], [0], [1], [0, 0, 1, 1], [], []>} : vector<8x16xbf16>, vector<16x32xbf16>, vector<8x32xf32> -> vector<8x32xf32>
    %239 = arith.truncf %238 : vector<8x32xf32> to vector<8x32xbf16>
    %c32_88 = arith.constant 32 : index
    %c0_89 = arith.constant 0 : index
    %240 = vector.load %arg16[%c32_88, %c0_89] : memref<128x128xbf16, #tpu.memory_space<vmem>>, vector<32x128xbf16>
    %cst_90 = arith.constant dense<0.000000e+00> : vector<8x128xf32>
    %241 = tpu.matmul %239, %240, %cst_90 {dimension_numbers = #tpu.dot_dimension_numbers<[1], [0], [0], [1], [0, 0, 1, 1], [], []>} : vector<8x32xbf16>, vector<32x128xbf16>, vector<8x128xf32> -> vector<8x128xf32>
    %242 = arith.addf %215, %241 : vector<8x128xf32>
    %243 = vector.extract_strided_slice %179 {offsets = [0, 64], sizes = [8, 32], strides = [1, 1]} : vector<8x128xf32> to vector<8x32xf32>
    %244 = arith.truncf %243 : vector<8x32xf32> to vector<8x32xbf16>
    %245 = vector.extract_strided_slice %186 {offsets = [0, 64], sizes = [16, 32], strides = [1, 1]} : vector<16x128xf32> to vector<16x32xf32>
    %246 = arith.truncf %245 : vector<16x32xf32> to vector<16x32xbf16>
    %247 = vector.extract_strided_slice %187 {offsets = [0, 64], sizes = [16, 32], strides = [1, 1]} : vector<16x128xf32> to vector<16x32xf32>
    %248 = arith.truncf %247 : vector<16x32xf32> to vector<16x32xbf16>
    %cst_91 = arith.constant dense<0.000000e+00> : vector<8x16xf32>
    %249 = tpu.matmul %244, %246, %cst_91 {dimension_numbers = #tpu.dot_dimension_numbers<[1], [1], [0], [0], [0, 0, 1, 0], [], []>} : vector<8x32xbf16>, vector<16x32xbf16>, vector<8x16xf32> -> vector<8x16xf32>
    %cst_92 = arith.constant 0.176776692 : f32
    %250 = vector.broadcast %cst_92 : f32 to vector<8x16xf32>
    %251 = arith.mulf %249, %250 : vector<8x16xf32>
    %252 = vector.broadcast %5 : vector<1x16xf32> to vector<8x16xf32>
    %253 = arith.addf %251, %252 : vector<8x16xf32>
    %cst_93 = arith.constant dense<0xFF800000> : vector<8xf32>
    %254 = vector.multi_reduction <maximumf>, %253, %cst_93 [1] : vector<8x16xf32> to vector<8xf32>
    %255 = vector.shape_cast %254 : vector<8xf32> to vector<8x1xf32>
    %256 = vector.broadcast %255 : vector<8x1xf32> to vector<8x16xf32>
    %257 = arith.subf %253, %256 : vector<8x16xf32>
    %258 = math.exp %257 : vector<8x16xf32>
    %cst_94 = arith.constant dense<0.000000e+00> : vector<8xf32>
    %259 = vector.multi_reduction <add>, %258, %cst_94 [1] : vector<8x16xf32> to vector<8xf32>
    %260 = vector.shape_cast %259 : vector<8xf32> to vector<8x1xf32>
    %261 = tpu.reciprocal %260 {approx = true} : vector<8x1xf32> -> vector<8x1xf32>
    %262 = vector.broadcast %261 : vector<8x1xf32> to vector<8x16xf32>
    %263 = arith.mulf %258, %262 : vector<8x16xf32>
    %264 = arith.truncf %263 : vector<8x16xf32> to vector<8x16xbf16>
    %cst_95 = arith.constant dense<0.000000e+00> : vector<8x32xf32>
    %265 = tpu.matmul %264, %248, %cst_95 {dimension_numbers = #tpu.dot_dimension_numbers<[1], [0], [0], [1], [0, 0, 1, 1], [], []>} : vector<8x16xbf16>, vector<16x32xbf16>, vector<8x32xf32> -> vector<8x32xf32>
    %266 = arith.truncf %265 : vector<8x32xf32> to vector<8x32xbf16>
    %c64_96 = arith.constant 64 : index
    %c0_97 = arith.constant 0 : index
    %267 = vector.load %arg16[%c64_96, %c0_97] : memref<128x128xbf16, #tpu.memory_space<vmem>>, vector<32x128xbf16>
    %cst_98 = arith.constant dense<0.000000e+00> : vector<8x128xf32>
    %268 = tpu.matmul %266, %267, %cst_98 {dimension_numbers = #tpu.dot_dimension_numbers<[1], [0], [0], [1], [0, 0, 1, 1], [], []>} : vector<8x32xbf16>, vector<32x128xbf16>, vector<8x128xf32> -> vector<8x128xf32>
    %269 = arith.addf %242, %268 : vector<8x128xf32>
    %270 = vector.extract_strided_slice %179 {offsets = [0, 96], sizes = [8, 32], strides = [1, 1]} : vector<8x128xf32> to vector<8x32xf32>
    %271 = arith.truncf %270 : vector<8x32xf32> to vector<8x32xbf16>
    %272 = vector.extract_strided_slice %186 {offsets = [0, 96], sizes = [16, 32], strides = [1, 1]} : vector<16x128xf32> to vector<16x32xf32>
    %273 = arith.truncf %272 : vector<16x32xf32> to vector<16x32xbf16>
    %274 = vector.extract_strided_slice %187 {offsets = [0, 96], sizes = [16, 32], strides = [1, 1]} : vector<16x128xf32> to vector<16x32xf32>
    %275 = arith.truncf %274 : vector<16x32xf32> to vector<16x32xbf16>
    %cst_99 = arith.constant dense<0.000000e+00> : vector<8x16xf32>
    %276 = tpu.matmul %271, %273, %cst_99 {dimension_numbers = #tpu.dot_dimension_numbers<[1], [1], [0], [0], [0, 0, 1, 0], [], []>} : vector<8x32xbf16>, vector<16x32xbf16>, vector<8x16xf32> -> vector<8x16xf32>
    %cst_100 = arith.constant 0.176776692 : f32
    %277 = vector.broadcast %cst_100 : f32 to vector<8x16xf32>
    %278 = arith.mulf %276, %277 : vector<8x16xf32>
    %279 = vector.broadcast %5 : vector<1x16xf32> to vector<8x16xf32>
    %280 = arith.addf %278, %279 : vector<8x16xf32>
    %cst_101 = arith.constant dense<0xFF800000> : vector<8xf32>
    %281 = vector.multi_reduction <maximumf>, %280, %cst_101 [1] : vector<8x16xf32> to vector<8xf32>
    %282 = vector.shape_cast %281 : vector<8xf32> to vector<8x1xf32>
    %283 = vector.broadcast %282 : vector<8x1xf32> to vector<8x16xf32>
    %284 = arith.subf %280, %283 : vector<8x16xf32>
    %285 = math.exp %284 : vector<8x16xf32>
    %cst_102 = arith.constant dense<0.000000e+00> : vector<8xf32>
    %286 = vector.multi_reduction <add>, %285, %cst_102 [1] : vector<8x16xf32> to vector<8xf32>
    %287 = vector.shape_cast %286 : vector<8xf32> to vector<8x1xf32>
    %288 = tpu.reciprocal %287 {approx = true} : vector<8x1xf32> -> vector<8x1xf32>
    %289 = vector.broadcast %288 : vector<8x1xf32> to vector<8x16xf32>
    %290 = arith.mulf %285, %289 : vector<8x16xf32>
    %291 = arith.truncf %290 : vector<8x16xf32> to vector<8x16xbf16>
    %cst_103 = arith.constant dense<0.000000e+00> : vector<8x32xf32>
    %292 = tpu.matmul %291, %275, %cst_103 {dimension_numbers = #tpu.dot_dimension_numbers<[1], [0], [0], [1], [0, 0, 1, 1], [], []>} : vector<8x16xbf16>, vector<16x32xbf16>, vector<8x32xf32> -> vector<8x32xf32>
    %293 = arith.truncf %292 : vector<8x32xf32> to vector<8x32xbf16>
    %c96_104 = arith.constant 96 : index
    %c0_105 = arith.constant 0 : index
    %294 = vector.load %arg16[%c96_104, %c0_105] : memref<128x128xbf16, #tpu.memory_space<vmem>>, vector<32x128xbf16>
    %cst_106 = arith.constant dense<0.000000e+00> : vector<8x128xf32>
    %295 = tpu.matmul %293, %294, %cst_106 {dimension_numbers = #tpu.dot_dimension_numbers<[1], [0], [0], [1], [0, 0, 1, 1], [], []>} : vector<8x32xbf16>, vector<32x128xbf16>, vector<8x128xf32> -> vector<8x128xf32>
    %296 = arith.addf %269, %295 : vector<8x128xf32>
    %297 = arith.addf %151, %296 : vector<8x128xf32>
    %c0_107 = arith.constant 0 : index
    %c0_108 = arith.constant 0 : index
    %298 = vector.load %arg17[%c0_107, %c0_108] : memref<1x128xf32, #tpu.memory_space<vmem>>, vector<1x128xf32>
    %299 = vector.broadcast %298 : vector<1x128xf32> to vector<8x128xf32>
    %300 = arith.addf %297, %299 : vector<8x128xf32>
    %c0_109 = arith.constant 0 : index
    %c0_110 = arith.constant 0 : index
    %301 = vector.load %arg18[%c0_109, %c0_110] : memref<1x128xf32, #tpu.memory_space<vmem>>, vector<1x128xf32>
    %c0_111 = arith.constant 0 : index
    %c0_112 = arith.constant 0 : index
    %302 = vector.load %arg19[%c0_111, %c0_112] : memref<1x128xf32, #tpu.memory_space<vmem>>, vector<1x128xf32>
    %cst_113 = arith.constant dense<0.000000e+00> : vector<8xf32>
    %303 = vector.multi_reduction <add>, %300, %cst_113 [1] : vector<8x128xf32> to vector<8xf32>
    %304 = vector.shape_cast %303 : vector<8xf32> to vector<8x1xf32>
    %cst_114 = arith.constant 1.280000e+02 : f32
    %305 = vector.broadcast %cst_114 : f32 to vector<8x1xf32>
    %306 = arith.divf %304, %305 : vector<8x1xf32>
    %307 = vector.broadcast %306 : vector<8x1xf32> to vector<8x128xf32>
    %308 = arith.subf %300, %307 : vector<8x128xf32>
    %309 = arith.mulf %308, %308 : vector<8x128xf32>
    %cst_115 = arith.constant dense<0.000000e+00> : vector<8xf32>
    %310 = vector.multi_reduction <add>, %309, %cst_115 [1] : vector<8x128xf32> to vector<8xf32>
    %311 = vector.shape_cast %310 : vector<8xf32> to vector<8x1xf32>
    %cst_116 = arith.constant 1.280000e+02 : f32
    %312 = vector.broadcast %cst_116 : f32 to vector<8x1xf32>
    %313 = arith.divf %311, %312 : vector<8x1xf32>
    %cst_117 = arith.constant 9.99999974E-6 : f32
    %314 = vector.broadcast %cst_117 : f32 to vector<8x1xf32>
    %315 = arith.addf %313, %314 : vector<8x1xf32>
    %316 = math.rsqrt %315 : vector<8x1xf32>
    %317 = vector.broadcast %316 : vector<8x1xf32> to vector<8x128xf32>
    %318 = arith.mulf %308, %317 : vector<8x128xf32>
    %319 = vector.broadcast %301 : vector<1x128xf32> to vector<8x128xf32>
    %320 = arith.mulf %318, %319 : vector<8x128xf32>
    %321 = vector.broadcast %302 : vector<1x128xf32> to vector<8x128xf32>
    %322 = arith.addf %320, %321 : vector<8x128xf32>
    %323 = arith.truncf %322 : vector<8x128xf32> to vector<8x128xbf16>
    %c0_118 = arith.constant 0 : index
    %c0_119 = arith.constant 0 : index
    %324 = vector.load %arg20[%c0_118, %c0_119] : memref<128x256xbf16, #tpu.memory_space<vmem>>, vector<128x256xbf16>
    %cst_120 = arith.constant dense<0.000000e+00> : vector<8x256xf32>
    %325 = tpu.matmul %323, %324, %cst_120 {dimension_numbers = #tpu.dot_dimension_numbers<[1], [0], [0], [1], [0, 0, 1, 1], [], []>} : vector<8x128xbf16>, vector<128x256xbf16>, vector<8x256xf32> -> vector<8x256xf32>
    %c0_121 = arith.constant 0 : index
    %c0_122 = arith.constant 0 : index
    %326 = vector.load %arg21[%c0_121, %c0_122] : memref<1x256xf32, #tpu.memory_space<vmem>>, vector<1x256xf32>
    %327 = vector.broadcast %326 : vector<1x256xf32> to vector<8x256xf32>
    %328 = arith.addf %325, %327 : vector<8x256xf32>
    %cst_123 = arith.constant 0.000000e+00 : f32
    %329 = vector.broadcast %cst_123 : f32 to vector<8x256xf32>
    %330 = arith.maximumf %328, %329 : vector<8x256xf32>
    %331 = arith.truncf %330 : vector<8x256xf32> to vector<8x256xbf16>
    %c0_124 = arith.constant 0 : index
    %c0_125 = arith.constant 0 : index
    %332 = vector.load %arg22[%c0_124, %c0_125] : memref<256x128xbf16, #tpu.memory_space<vmem>>, vector<256x128xbf16>
    %cst_126 = arith.constant dense<0.000000e+00> : vector<8x128xf32>
    %333 = tpu.matmul %331, %332, %cst_126 {dimension_numbers = #tpu.dot_dimension_numbers<[1], [0], [0], [1], [0, 0, 1, 1], [], []>} : vector<8x256xbf16>, vector<256x128xbf16>, vector<8x128xf32> -> vector<8x128xf32>
    %c0_127 = arith.constant 0 : index
    %c0_128 = arith.constant 0 : index
    %334 = vector.load %arg23[%c0_127, %c0_128] : memref<1x128xf32, #tpu.memory_space<vmem>>, vector<1x128xf32>
    %335 = vector.broadcast %334 : vector<1x128xf32> to vector<8x128xf32>
    %336 = arith.addf %333, %335 : vector<8x128xf32>
    %337 = arith.addf %300, %336 : vector<8x128xf32>
    %c0_129 = arith.constant 0 : index
    %c0_130 = arith.constant 0 : index
    %c0_131 = arith.constant 0 : index
    %338 = vector.load %arg24[%c0_129, %c0_130, %c0_131] : memref<1x8x128xf32, #tpu.memory_space<vmem>>, vector<1x8x128xf32>
    %339 = vector.shape_cast %338 : vector<1x8x128xf32> to vector<8x128xf32>
    %340 = vector.shape_cast %337 : vector<8x128xf32> to vector<1x8x128xf32>
    tpu.vector_store %arg24[%c0_129, %c0_130, %c0_131], %340 {strides = array<i32>} : memref<1x8x128xf32, #tpu.memory_space<vmem>>, vector<1x8x128xf32>,
    return
  }
  func.func @transform_0(%arg0: i32) -> (i32, i32, i32) {
    %c0_i32 = arith.constant 0 : i32
    %c0_i32_0 = arith.constant 0 : i32
    %c0_i32_1 = arith.constant 0 : i32
    return %arg0, %c0_i32, %c0_i32_0 : i32, i32, i32
  }
  func.func @transform_1(%arg0: i32) -> (i32, i32, i32) {
    %c0_i32 = arith.constant 0 : i32
    %c0_i32_0 = arith.constant 0 : i32
    %c0_i32_1 = arith.constant 0 : i32
    return %arg0, %c0_i32, %c0_i32_0 : i32, i32, i32
  }
  func.func @transform_2(%arg0: i32) -> (i32, i32, i32) {
    %c0_i32 = arith.constant 0 : i32
    %c0_i32_0 = arith.constant 0 : i32
    %c0_i32_1 = arith.constant 0 : i32
    return %arg0, %c0_i32, %c0_i32_0 : i32, i32, i32
  }
  func.func @transform_3(%arg0: i32) -> (i32, i32) {
    %c0_i32 = arith.constant 0 : i32
    %c0_i32_0 = arith.constant 0 : i32
    %c0_i32_1 = arith.constant 0 : i32
    return %c0_i32, %c0_i32_0 : i32, i32
  }
  func.func @transform_4(%arg0: i32) -> (i32, i32) {
    %c0_i32 = arith.constant 0 : i32
    %c0_i32_0 = arith.constant 0 : i32
    %c0_i32_1 = arith.constant 0 : i32
    return %c0_i32, %c0_i32_0 : i32, i32
  }
  func.func @transform_5(%arg0: i32) -> (i32, i32) {
    %c0_i32 = arith.constant 0 : i32
    %c0_i32_0 = arith.constant 0 : i32
    %c0_i32_1 = arith.constant 0 : i32
    return %c0_i32, %c0_i32_0 : i32, i32
  }
  func.func @transform_6(%arg0: i32) -> (i32, i32) {
    %c0_i32 = arith.constant 0 : i32
    %c0_i32_0 = arith.constant 0 : i32
    %c0_i32_1 = arith.constant 0 : i32
    return %c0_i32, %c0_i32_0 : i32, i32
  }
  func.func @transform_7(%arg0: i32) -> (i32, i32) {
    %c0_i32 = arith.constant 0 : i32
    %c0_i32_0 = arith.constant 0 : i32
    %c0_i32_1 = arith.constant 0 : i32
    return %c0_i32, %c0_i32_0 : i32, i32
  }
  func.func @transform_8(%arg0: i32) -> (i32, i32) {
    %c0_i32 = arith.constant 0 : i32
    %c0_i32_0 = arith.constant 0 : i32
    %c0_i32_1 = arith.constant 0 : i32
    return %c0_i32, %c0_i32_0 : i32, i32
  }
  func.func @transform_9(%arg0: i32) -> (i32, i32) {
    %c0_i32 = arith.constant 0 : i32
    %c0_i32_0 = arith.constant 0 : i32
    %c0_i32_1 = arith.constant 0 : i32
    return %c0_i32, %c0_i32_0 : i32, i32
  }
  func.func @transform_10(%arg0: i32) -> (i32, i32) {
    %c0_i32 = arith.constant 0 : i32
    %c0_i32_0 = arith.constant 0 : i32
    %c0_i32_1 = arith.constant 0 : i32
    return %c0_i32, %c0_i32_0 : i32, i32
  }
  func.func @transform_11(%arg0: i32) -> (i32, i32) {
    %c0_i32 = arith.constant 0 : i32
    %c0_i32_0 = arith.constant 0 : i32
    %c0_i32_1 = arith.constant 0 : i32
    return %c0_i32, %c0_i32_0 : i32, i32
  }
  func.func @transform_12(%arg0: i32) -> (i32, i32) {
    %c0_i32 = arith.constant 0 : i32
    %c0_i32_0 = arith.constant 0 : i32
    %c0_i32_1 = arith.constant 0 : i32
    return %c0_i32, %c0_i32_0 : i32, i32
  }
  func.func @transform_13(%arg0: i32) -> (i32, i32) {
    %c0_i32 = arith.constant 0 : i32
    %c0_i32_0 = arith.constant 0 : i32
    %c0_i32_1 = arith.constant 0 : i32
    return %c0_i32, %c0_i32_0 : i32, i32
  }
  func.func @transform_14(%arg0: i32) -> (i32, i32) {
    %c0_i32 = arith.constant 0 : i32
    %c0_i32_0 = arith.constant 0 : i32
    %c0_i32_1 = arith.constant 0 : i32
    return %c0_i32, %c0_i32_0 : i32, i32
  }
  func.func @transform_15(%arg0: i32) -> (i32, i32) {
    %c0_i32 = arith.constant 0 : i32
    %c0_i32_0 = arith.constant 0 : i32
    %c0_i32_1 = arith.constant 0 : i32
    return %c0_i32, %c0_i32_0 : i32, i32
  }
  func.func @transform_16(%arg0: i32) -> (i32, i32) {
    %c0_i32 = arith.constant 0 : i32
    %c0_i32_0 = arith.constant 0 : i32
    %c0_i32_1 = arith.constant 0 : i32
    return %c0_i32, %c0_i32_0 : i32, i32
  }
  func.func @transform_17(%arg0: i32) -> (i32, i32) {
    %c0_i32 = arith.constant 0 : i32
    %c0_i32_0 = arith.constant 0 : i32
    %c0_i32_1 = arith.constant 0 : i32
    return %c0_i32, %c0_i32_0 : i32, i32
  }
  func.func @transform_18(%arg0: i32) -> (i32, i32) {
    %c0_i32 = arith.constant 0 : i32
    %c0_i32_0 = arith.constant 0 : i32
    %c0_i32_1 = arith.constant 0 : i32
    return %c0_i32, %c0_i32_0 : i32, i32
  }
  func.func @transform_19(%arg0: i32) -> (i32, i32) {
    %c0_i32 = arith.constant 0 : i32
    %c0_i32_0 = arith.constant 0 : i32
    %c0_i32_1 = arith.constant 0 : i32
    return %c0_i32, %c0_i32_0 : i32, i32
  }
  func.func @transform_20(%arg0: i32) -> (i32, i32) {
    %c0_i32 = arith.constant 0 : i32
    %c0_i32_0 = arith.constant 0 : i32
    %c0_i32_1 = arith.constant 0 : i32
    return %c0_i32, %c0_i32_0 : i32, i32
  }
  func.func @transform_21(%arg0: i32) -> (i32, i32) {
    %c0_i32 = arith.constant 0 : i32
    %c0_i32_0 = arith.constant 0 : i32
    %c0_i32_1 = arith.constant 0 : i32
    return %c0_i32, %c0_i32_0 : i32, i32
  }
  func.func @transform_22(%arg0: i32) -> (i32, i32) {
    %c0_i32 = arith.constant 0 : i32
    %c0_i32_0 = arith.constant 0 : i32
    %c0_i32_1 = arith.constant 0 : i32
    return %c0_i32, %c0_i32_0 : i32, i32
  }
  func.func @transform_23(%arg0: i32) -> (i32, i32, i32) {
    %c0_i32 = arith.constant 0 : i32
    %c0_i32_0 = arith.constant 0 : i32
    %c0_i32_1 = arith.constant 0 : i32
    return %arg0, %c0_i32, %c0_i32_0 : i32, i32, i32
  }
}

</mosaic_0001>

<bundles_post_ra>
// kernel: at_decoder_adapter_forward.5
= control target key start
LH: loop header
LB: loop body
LE: loop exit
PB: predicated region body
PF: predicated region fallthrough
CT: control target
= control target key end

     0   :  { %11 = vsyncpa [#allocation3], 0  ;;  %s982_s0 = inlined_call_operand.vmem [shape: f32[2,8,128], index: 0, kind: input, shape index: {}]   ;;  %s983_s1 = inlined_call_operand.vmem [shape: f32[1,128], index: 1, kind: input, shape index: {}]   ;;  %s984_s2 = inlined_call_operand.vmem [shape: f32[1,128], index: 2, kind: input, shape index: {}]   ;;  %s985_s3 = inlined_call_operand.vmem [shape: bf16[256,128], index: 3, kind: input, shape index: {}]   ;;  %s986_s4 = inlined_call_operand.hbm [shape: f32[2,8,128], index: 4, kind: output, shape index: {0}]   ;;  %s987_s5 = inlined_call_operand.hbm [shape: f32[2,8,256], index: 5, kind: output, shape index: {1}]  }
   0x1   :  { %13 = vsyncpa [#allocation3 + $0x1], 0 }
   0x2   :  { %14 = vsyncpa [#allocation5], 0 }
   0x3   :  { %16 = vsyncpa [#allocation5 + $0x1], 0  ;;  %s799_s18 = smov 0   ;;  %s801_s19 = smov 0  }
   0x4   :  { %s803_s20 = smov 0   ;;  %s805_s21 = smov 0  }
   0x5 LB: > { %s820_s22 = sadd.s32 4294967295, %s765_s21   ;;  %s558_s23 = sadd.s32 4294967294, %s765_s21   ;;  %s765_s21 = sphi %s805_s21, %s993_s21   ;;  %s761_s20 = sphi %s803_s20, %s992_s20   ;;  %s757_s19 = sphi %s801_s19, %s991_s19   ;;  %s753_s18 = sphi %s799_s18, %s990_s18  }
   0x6   : > { %s824_s24 = sadd.s32 1, %s765_s21   ;;  %s118_s25 = sadd.s32 1, %s761_s20 }
   0x7   : > { %s115_s26 = ssub.s32 %s765_s21, %s824_s24  ;;  %p128_p0 = scmp.ne.s32.totalorder %s761_s20, %s757_s19 }
   0x8   : > { %p116_p1 = scmp.eq.s32.totalorder %s115_s26, 0  ;;  %p129_p2 = scmp.eq.s32.totalorder %s820_s22, 1 }
   0x9   : > { %p134_p3 = scmp.ne.s32.totalorder %s757_s19, %s753_s18  ;;  %p135_p4 = scmp.eq.s32.totalorder %s558_s23, 1 }
   0xa   : > { %s835_s27 = scalar_select %p116_p1, %s761_s20, %s118_s25  }
   0xb   : > { %p837_p5 = por %p129_p2, %p128_p0  ;;  %p841_p6 = por %p135_p4, %p134_p3 }
   0xc   : > { %p561_p7 = scmp.ge.s32.totalorder %s765_s21, 1  ;;  %p195_p8 = scmp.lt.s32.totalorder %s765_s21, 3 }
   0xe   : > { %p196_p9 = pnand %p561_p7, %p195_p8 }
   0xf   : > { %p227_p10 = scmp.lt.s32.totalorder (!%p196_p9), %s820_s22, 1  ;;  %v653_v1 = vld [vmem:[%s985_s3 + $0x40] sm:$0xff] (!%p196_p9)   ;;  %v655_v3 = vld [vmem:[%s985_s3 + $0x48] sm:$0xff] (!%p196_p9)   ;;  %v657_v5 = vld [vmem:[%s985_s3 + $0x50] sm:$0xff] (!%p196_p9)   ;;  %s901_s10 = sand.u32 (!%p196_p9), 1, %s757_s19  }
  0x10   : > { %199 = sbr.rel (%p196_p9) target bundleno = 570 (0x23a), region = 36  ;;  %v654_v2 = vld [vmem:[%s985_s3] sm:$0xff] (!%p196_p9)   ;;  %591 = vmatprep.subr.bf16.mxu0 (!%p196_p9), %v653_v1  ;;  %v656_v4 = vld [vmem:[%s985_s3 + $0x8] sm:$0xff] (!%p196_p9)   ;;  %v658_v6 = vld [vmem:[%s985_s3 + $0x10] sm:$0xff] (!%p196_p9)   ;;  %s562_s13 = sshll.u32 (!%p196_p9), %s901_s10, 3 }
  0x11   : > { %592 = vmatpush3.bf16.xpose.msra.mxu0 (!%p196_p9), %v654_v2  ;;  %v659_v7 = vld [vmem:[%s985_s3 + $0x58] sm:$0xff] (!%p196_p9)   ;;  %v661_v9 = vld [vmem:[%s985_s3 + $0x60] sm:$0xff] (!%p196_p9)   ;;  %v663_v15 = vld [vmem:[%s985_s3 + $0x68] sm:$0xff] (!%p196_p9)   ;;  %s219_s16 = scalar_lea.vmem (!%p196_p9), [#allocation2], %s562_s13  ;;  %s585_s17 = sshll.u32 (!%p196_p9), %s820_s22, 7 }
  0x12   : > { %593 = vmatprep.subr.bf16.mxu0 (!%p196_p9), %v655_v3  ;;  %v660_v8 = vld [vmem:[%s985_s3 + $0x18] sm:$0xff] (!%p196_p9)   ;;  %v662_v10 = vld [vmem:[%s985_s3 + $0x20] sm:$0xff] (!%p196_p9)   ;;  %v664_v16 = vld [vmem:[%s985_s3 + $0x28] sm:$0xff] (!%p196_p9)   ;;  %s914_s26 = scalar_lea.hbm (!%p196_p9), %s986_s4, %s585_s17  ;;  %s767_s8 = smov (!%p196_p9), [#allocation2]  }
  0x13   : > { %v665_v17 = vld [vmem:[%s985_s3 + $0x70] sm:$0xff] (!%p196_p9)   ;;  %v667_v19 = vld [vmem:[%s985_s3 + $0x78] sm:$0xff] (!%p196_p9)   ;;  %v565_v25 = vld [vmem:[%s983_s1] ss:$0 sm:$0xff] (!%p196_p9) }
  0x14   : > { %v666_v18 = vld [vmem:[%s985_s3 + $0x30] sm:$0xff] (!%p196_p9)   ;;  %v668_v20 = vld [vmem:[%s985_s3 + $0x38] sm:$0xff] (!%p196_p9)   ;;  %v566_v27 = vld [vmem:[%s984_s2] ss:$0 sm:$0xff] (!%p196_p9) }
  0x17   : > { %s228_s30 = scalar_select %p227_p10, %s820_s22, 1 }
  0x19   : > { %s564_s6 = sshll.u32 %s228_s30, 3  ;;  %594 = vmatpush3.bf16.xpose.msra.mxu0 %v656_v4  ;;  %s453_s30 = sshll.u32 %s219_s16, 4  ;;  %s454_s30 = int_to_ptr.vmem [resolvable:$true] %s453_s30 }
  0x1a   : > { %s230_s9 = scalar_lea.vmem %s982_s0, %s564_s6  ;;  %595 = vmatprep.subr.bf16.mxu0 %v657_v5  ;;  %s435_s6 = scalar_lea.sflag [#allocation3], %s901_s10 }
  0x1b   : > { %v232_v0 = vld [vmem:[%s230_s9] sm:$0xff]  ;;  %s671_s7 = scalar_lea.vmem %s454_s30, 128  ;;  %s675_s9 = sshll.u32 %s767_s8, 4  ;;  %s676_s9 = int_to_ptr.vmem [resolvable:$false] %s675_s9 }
  0x1c   : > { %235 = vadd.xlane.f32.xlu0 %v232_v0  ;;  %p672_p11 = scmp.ne.s32.totalorder %s454_s30, %s671_s7  ;;  %s677_s11 = scalar_lea.vmem %s676_s9, 256 }
  0x1d   : > { %p678_p0 = scmp.lt.s32.totalorder %s454_s30, %s676_s9  ;;  %p679_p1 = scmp.lt.s32.totalorder %s677_s11, %s671_s7 }
  0x1e   : > { %p673_p12 = pnand %p672_p11, %p837_p5 }
  0x1f   : > { %p680_p2 = por %p679_p1, %p678_p0 }
  0x20   : > { %p674_p13 = pneg %p673_p12 }
  0x21   : > { %596 = vmatpush3.bf16.xpose.msra.mxu0 %v658_v6 }
  0x22   : > { %597 = vmatprep.subr.bf16.mxu0 %v659_v7  ;;  %p681_p3 = pnand %p680_p2, %p674_p13 }
  0x29   : > { %598 = vmatpush3.bf16.xpose.msra.mxu0 %v660_v8 }
  0x2a   : > { %599 = vmatprep.subr.bf16.mxu0 %v661_v9 }
  0x31   : > { %600 = vmatpush3.bf16.xpose.msra.mxu0 %v662_v10 }
  0x32   : > { %601 = vmatprep.subr.bf16.mxu0 %v663_v15 }
  0x39   : > { %602 = vmatpush3.bf16.xpose.msra.mxu0 %v664_v16 }
  0x3a   : > { %603 = vmatprep.subr.bf16.mxu0 %v665_v17 }
  0x41   : > { %604 = vmatpush3.bf16.xpose.msra.mxu0 %v666_v18 }
  0x42   : > { %605 = vmatprep.subr.bf16.mxu0 %v667_v19 }
  0x49   : > { %606 = vmatpush3.bf16.xpose.msra.mxu0 %v668_v20 }
  0xa9   : > { %v236_v11 = vpop.xlane.xlu0 %235 }
  0xaa   : > { %v238_v12 = vmul.f32 0.0078125, %v236_v11 }
  0xac   : > { %v239_v13 = vsub.f32 %v232_v0, %v238_v12 }
  0xae   : > { %v240_v14 = vmul.f32 %v239_v13, %v239_v13 }
  0xb0   : > { %241 = vadd.xlane.f32.xlu0 %v240_v14 }
 0x13d   : > { %v242_v21 = vpop.xlane.xlu0 %241 }
 0x13e   : > { %v243_v22 = vmul.f32 0.0078125, %v242_v21 }
 0x140   : > { %v244_v23 = vadd.f32 1e-05, %v243_v22 }
 0x142   : > { %669 = vrsqrt.f32 %v244_v23 }
 0x14c   : > { %v670_v24 = vpop.eup %669 }
 0x14d   : > { %v246_v26 = vmul.f32 %v670_v24, %v239_v13 }
 0x14f   : > { %v253_v28 = vmul.f32 %v565_v25, %v246_v26 }
 0x151   : > { %v260_v29 = vadd.f32 %v566_v27, %v253_v28 }
 0x153   : > { %v262_v30 = vpack.c.bf16 %v260_v29, %v260_v29  ;;  %261 = vst [vmem:[%s219_s16] sm:$0xff] %v260_v29 }
 0x155   : > { %607 = vmatprep.mubr.bf16.mxu0 %v262_v30 }
 0x156   : > { %608 = vmatmul.mubr.bf16.vlgmr.msra.gmra.mrb[0].mxu0 %v262_v30 }
 0x157   : > { %684 = shalt.err (!%p681_p3)
}
 0x158   : > { %s685_s12 = scalar_lea.hbm %s914_s26, 128  ;;  %s689_s15 = scalar_lea.hbm %s986_s4, 256 }
 0x159   : > { %p686_p4 = scmp.ne.s32.totalorder %s914_s26, %s685_s12  ;;  %p690_p9 = scmp.lt.u32.totalorder %s914_s26, %s986_s4 }
 0x15a   : > { %p691_p10 = scmp.lt.u32.totalorder %s689_s15, %s685_s12  ;;  %p693_p12 = scmp.lt.u32.totalorder %s685_s12, %s914_s26 }
 0x15b   : > { %p687_p7 = pnand %p686_p4, %p837_p5 }
 0x15c   : > { %p692_p11 = por %p691_p10, %p690_p9 }
 0x15d   : > { %p688_p8 = pneg %p687_p7 }
 0x15e   : > { %p694_p13 = por %p693_p12, %p692_p11 }
 0x160   : > { %p695_p0 = pnand %p694_p13, %p688_p8 }
 0x162   : > { %698 = shalt.err (!%p695_p0)
}
 0x163   : > { %609 = dma.vmem_to_hbm [thread:$0]  (%p837_p5), %s454_s30, 128, %s914_s26, %s435_s6  }
 0x164   : > { %s563_s23 = sshll.u32 %s901_s10, 4  ;;  %s590_s8 = sshll.u32 %s820_s22, 8 }
 0x165   : > { %s226_s25 = scalar_lea.vmem [#allocation4], %s563_s23  ;;  %s941_s12 = scalar_lea.hbm %s987_s5, %s590_s8 }
 0x166   : > { %s467_s7 = sshll.u32 %s226_s25, 4  ;;  %s440_s26 = scalar_lea.sflag [#allocation5], %s901_s10  ;;  %s936_s7 = int_to_ptr.vmem [resolvable:$true] %s467_s7 }
 0x167   : > { %s699_s30 = scalar_lea.vmem %s936_s7, 256  ;;  %s768_s22 = smov [#allocation4]  }
 0x168   : > { %p700_p1 = scmp.ne.s32.totalorder %s936_s7, %s699_s30  ;;  %s703_s6 = sshll.u32 %s768_s22, 4  ;;  %s704_s6 = int_to_ptr.vmem [resolvable:$false] %s703_s6 }
 0x169   : > { %s705_s13 = scalar_lea.vmem %s704_s6, 512  ;;  %p706_p4 = scmp.lt.s32.totalorder %s936_s7, %s704_s6 }
 0x16a   : > { %p701_p2 = pnand %p700_p1, %p837_p5  ;;  %p707_p7 = scmp.lt.s32.totalorder %s705_s13, %s699_s30 }
 0x16c   : > { %p702_p3 = pneg %p701_p2  ;;  %p708_p8 = por %p707_p7, %p706_p4 }
 0x16e   : > { %p709_p9 = pnand %p708_p8, %p702_p3 }
 0x229   : > { %v425_v31 = vpop.f32.mrb[0].mxu0 }
 0x22a   : > { %432 = vst [vmem:[%s226_s25] sm:$0xff] %v425_v31  ;;  %v427_v32 = vpop.f32.mrb[1].mxu0 }
 0x22b   : > { %433 = vst [vmem:[%s226_s25 + $0x8] sm:$0xff] %v427_v32  ;;  %v429_v33 = vpop.f32.mrb[2].mxu0 }
 0x22c   : > { %v430_v34 = vpop.f32.mrb[3].mxu0 }
 0x22d   : > { %712 = shalt.err (!%p709_p9)
}
 0x22e   : > { %s713_s10 = scalar_lea.hbm %s941_s12, 256  ;;  %s717_s16 = scalar_lea.hbm %s987_s5, 512 }
 0x22f   : > { %p714_p10 = scmp.ne.s32.totalorder %s941_s12, %s713_s10  ;;  %p718_p13 = scmp.lt.u32.totalorder %s941_s12, %s987_s5 }
 0x230   : > { %p719_p0 = scmp.lt.u32.totalorder %s717_s16, %s713_s10  ;;  %p721_p2 = scmp.lt.u32.totalorder %s713_s10, %s941_s12 }
 0x231   : > { %p715_p11 = pnand %p714_p10, %p837_p5 }
 0x232   : > { %p720_p1 = por %p719_p0, %p718_p13 }
 0x233   : > { %p716_p12 = pneg %p715_p11 }
 0x234   : > { %p722_p3 = por %p721_p2, %p720_p1 }
 0x236   : > { %p723_p4 = pnand %p722_p3, %p716_p12 }
 0x238   : > { %726 = shalt.err (!%p723_p4)
}
 0x239   : > { %610 = dma.vmem_to_hbm [thread:$0]  (%p837_p5), %s936_s7, 256, %s941_s12, %s440_s26  }
 0x23a PF: > { %p620_p7 = scmp.ge.s32.totalorder %s765_s21, 2  ;;  %s479_s25 = sand.u32 1, %s753_s18  }
 0x23b   : > { %s480_s8 = scalar_lea.sflag [#allocation3], %s479_s25 }
 0x23c   : > { %p614_p8 = pnand %p620_p7, %p841_p6 }
 0x23e   : > { %744 = dma.done.wait (!%p614_p8), %s480_s8, 128  }
 0x23f   : > { %746 = vsyncadd (!%p614_p8), %s480_s8, 4294967168  ;;  %s489_s9 = scalar_lea.sflag [#allocation5], %s479_s25 }
 0x240   : > { %748 = dma.done.wait (!%p614_p8), %s489_s9, 256  }
 0x241   : > { %750 = vsyncadd (!%p614_p8), %s489_s9, 4294967040  ;;  %p19_p5 = scmp.ge.s32.totalorder %s824_s24, 4   ;;  %s990_s18 = smov %s757_s19 }
 0x242   : > { %s991_s19 = smov %s761_s20  ;;  %s992_s20 = smov %s835_s27 }
 0x243   : > { %s993_s21 = smov %s824_s24  ;;  %21 = sbr.rel (!%p19_p5) target bundleno = 5 (0x5), region = 88 }
 0x24a   :  { %494 = vsyncpa [#allocation3], 1 }
 0x24b   :  { %496 = vsyncpa [#allocation3 + $0x1], 1 }
 0x24c   :  { %497 = vsyncpa [#allocation5], 1 }
 0x24d   :  { %499 = vsyncpa [#allocation5 + $0x1], 1 }

// kernel: at_decoder_adapter_forward.4
= control target key start
LH: loop header
LB: loop body
LE: loop exit
PB: predicated region body
PF: predicated region fallthrough
CT: control target
= control target key end

     0   :  { %s4517_s0 = inlined_call_operand.vmem [shape: f32[2,8,128], index: 0, kind: input, shape index: {}]   ;;  %s4518_s1 = inlined_call_operand.vmem [shape: f32[2,16,128], index: 1, kind: input, shape index: {}]   ;;  %s4519_s2 = inlined_call_operand.vmem [shape: f32[2,1,16], index: 2, kind: input, shape index: {}]   ;;  %s4520_s3 = inlined_call_operand.vmem [shape: f32[1,128], index: 3, kind: input, shape index: {}]   ;;  %s4521_s4 = inlined_call_operand.vmem [shape: f32[1,128], index: 4, kind: input, shape index: {}]   ;;  %s4522_s5 = inlined_call_operand.vmem [shape: bf16[128,384], index: 5, kind: input, shape index: {}]   ;;  %s4523_s6 = inlined_call_operand.vmem [shape: f32[1,384], index: 6, kind: input, shape index: {}]   ;;  %s4524_s7 = inlined_call_operand.vmem [shape: bf16[128,128], index: 7, kind: input, shape index: {}]   ;;  %s4525_s8 = inlined_call_operand.vmem [shape: f32[1,128], index: 8, kind: input, shape index: {}]   ;;  %s4526_s9 = inlined_call_operand.vmem [shape: f32[1,128], index: 9, kind: input, shape index: {}]   ;;  %s4527_s10 = inlined_call_operand.vmem [shape: f32[1,128], index: 10, kind: input, shape index: {}]   ;;  %s4528_s11 = inlined_call_operand.vmem [shape: bf16[128,128], index: 11, kind: input, shape index: {}]   ;;  %s4529_s12 = inlined_call_operand.vmem [shape: f32[1,128], index: 12, kind: input, shape index: {}]   ;;  %s4530_s13 = inlined_call_operand.vmem [shape: bf16[128,256], index: 13, kind: input, shape index: {}]   ;;  %s4531_s14 = inlined_call_operand.vmem [shape: f32[1,256], index: 14, kind: input, shape index: {}]   ;;  %s4532_s15 = inlined_call_operand.vmem [shape: bf16[128,128], index: 15, kind: input, shape index: {}]   ;;  %s4533_s16 = inlined_call_operand.vmem [shape: f32[1,128], index: 16, kind: input, shape index: {}]   ;;  %s4534_s17 = inlined_call_operand.vmem [shape: f32[1,128], index: 17, kind: input, shape index: {}]   ;;  %s4535_s18 = inlined_call_operand.vmem [shape: f32[1,128], index: 18, kind: input, shape index: {}]   ;;  %s4536_s19 = inlined_call_operand.vmem [shape: bf16[128,256], index: 19, kind: input, shape index: {}]   ;;  %s4537_s20 = inlined_call_operand.vmem [shape: f32[1,256], index: 20, kind: input, shape index: {}]   ;;  %s4538_s21 = inlined_call_operand.vmem [shape: bf16[256,128], index: 21, kind: input, shape index: {}]   ;;  %s4539_s22 = inlined_call_operand.vmem [shape: f32[1,128], index: 22, kind: input, shape index: {}]   ;;  %s4540_s23 = inlined_call_operand.vmem [shape: f32[2,8,128], index: 23, kind: output, shape index: {}]  }
   0x1   :  { %4551 = sst [smem:[#allocation2_spill]] %s4517_s0 }
   0x2   :  { %4552 = sst [smem:[#allocation3_spill]] %s4518_s1 }
   0x3   :  { %4553 = sst [smem:[#allocation4_spill]] %s4519_s2 }
   0x4   :  { %4554 = sst [smem:[#allocation5_spill]] %s4520_s3 }
   0x5   :  { %4555 = sst [smem:[#allocation6_spill]] %s4521_s4  ;;  %s3905_s4 = smov 0  }
   0x6   :  { %4556 = sst [smem:[#allocation7_spill]] %s4522_s5 }
   0x7   :  { %4557 = sst [smem:[#allocation8_spill]] %s4523_s6 }
   0x8   :  { %4558 = sst [smem:[#allocation9_spill]] %s4524_s7 }
   0x9 LB: > { %s3160_s30 = sadd.s32 4294967295, %s3777_s4   ;;  %p3164_p0 = scmp.ge.s32.totalorder %s3777_s4, 1  ;;  %s3777_s4 = sphi %s3905_s4, %s33_s4  }
   0xa   : > { %p654_p1 = scmp.lt.s32.totalorder %s3777_s4, 3 }
   0xc   : > { %p655_p2 = pnand %p3164_p0, %p654_p1 }
   0xd   : > { %p724_p3 = scmp.lt.s32.totalorder (!%p655_p2), %s3160_s30, 1  ;;  %s4559_s1 = sld [smem:[#allocation2_spill]] (!%p655_p2)  ;;  %v3779_v3 = vmov (!%p655_p2), 0.0   ;;  %v3780_v25 = vmov (!%p655_p2), 0   ;;  %vm3781_vm0 = vmmov (!%p655_p2), 0   ;;  %v808_v41 = vlaneseq (!%p655_p2) }
   0xe   : > { %658 = sbr.rel (%p655_p2) target bundleno = 6591 (0x19bf), region = 112  ;;  %s4560_s27 = sld [smem:[#allocation7_spill]] (!%p655_p2)  ;;  %3399 = vmatprep.subr.bf16.mxu1 (!%p655_p2), %v3779_v3  ;;  %983 = vmatprep.mubr.bf16.mxu0 (!%p655_p2), %v3780_v25  ;;  %vm1106_vm1 = vcmask (!%p655_p2), 1043456   ;;  %vm1041_vm2 = vcmask (!%p655_p2), 261120   ;;  %vm1090_vm4 = vcmask (!%p655_p2), 64512   ;;  %vm2088_vm5 = vcmask (!%p655_p2), 130048  }
   0xf   : > { %3415 = vmatprep.mubr.msk.bf16.mxu1 (!%p655_p2), %vm3781_vm0, %v3779_v3  ;;  %s4561_s0 = sld [smem:[#allocation5_spill]] (!%p655_p2)  ;;  %v809_v42 = vshrl.u32 (!%p655_p2), %v808_v41, 7  ;;  %s4563_s6 = sld [smem:[#allocation8_spill]] (!%p655_p2) }
  0x10   : > { %s4548_s7 = smov (!%p655_p2), 96   ;;  %s4546_s28 = smov (!%p655_p2), 64  }
  0x11   : > { %v818_v43 = vsub.s32 (!%p655_p2), 2, %v809_v42  ;;  %v4023_v45 = vsub.s32 (!%p655_p2), 1, %v809_v42  ;;  %v4025_v46 = vsub.s32 (!%p655_p2), 0, %v809_v42  ;;  %s4544_s29 = smov (!%p655_p2), 32   ;;  %s4566_s3 = smov (!%p655_p2), 96  }
  0x12   : > { %s4567_s25 = sld [smem:[#allocation4_spill]] (!%p655_p2) }
  0x14   : > { %v3613_v1 = vld [vmem:[%s4560_s27 + $0x4] ss:$12 sps:$4 sm:$0xff] (!%p655_p2)   ;;  %v3615_v2 = vld [vmem:[%s4560_s27] ss:$12 sps:$4 sm:$0xff] (!%p655_p2)   ;;  %v3616_v4 = vld [vmem:[%s4560_s27 + $0x8] ss:$12 sps:$4 sm:$0xff] (!%p655_p2)  }
  0x15   : > { %s4572_s30 = smov (!%p724_p3, %s3160_s30), 1  ;;  %v3617_v5 = vld [vmem:[%s4560_s27 + $0x1c] ss:$12 sps:$4 sm:$0xff]   ;;  %v3619_v6 = vld [vmem:[%s4560_s27 + $0x18] ss:$12 sps:$4 sm:$0xff]   ;;  %951 = vmatprep.subr.bf16.mxu0 %v3613_v1  ;;  %3400 = vmatpush3.bf16.msra.mxu1 %v3616_v4 }
  0x16   : > { %s4543_s24 = sshll.u32 %s4572_s30, 3  ;;  %v3620_v7 = vld [vmem:[%s4560_s27 + $0x20] ss:$12 sps:$4 sm:$0xff]   ;;  %952 = vmatpush1.bf16.msra.mxu0 %v3615_v2  ;;  %3401 = vmatprep.subr.bf16.mxu1 %v3779_v3  ;;  %v3623_v13 = vld [vmem:[%s4560_s27 + $0x30] ss:$12 sps:$4 sm:$0xff]  }
  0x17   : > { %s727_s26 = scalar_lea.vmem %s4559_s1, %s4543_s24  ;;  %v3621_v8 = vld [vmem:[%s4560_s27 + $0x34] ss:$12 sps:$4 sm:$0xff]   ;;  %953 = vmatprep.subr.bf16.mxu0 %v3617_v5  ;;  %v3624_v14 = vld [vmem:[%s4560_s27 + $0x38] ss:$12 sps:$4 sm:$0xff]   ;;  %v3628_v17 = vld [vmem:[%s4560_s27 + $0x50] ss:$12 sps:$4 sm:$0xff]  }
  0x18   : > { %v3921_v0 = vld [vmem:[%s727_s26] sm:$0xff]  ;;  %v3625_v15 = vld [vmem:[%s4560_s27 + $0x4c] ss:$12 sps:$4 sm:$0xff]   ;;  %v3627_v16 = vld [vmem:[%s4560_s27 + $0x48] ss:$12 sps:$4 sm:$0xff]   ;;  %s4562_s1 = sld [smem:[#allocation6_spill]]  ;;  %s735_s5 = scalar_lea.vmem %s4567_s25, %s4572_s30 }
  0x19   : > { %747 = vadd.xlane.f32.xlu0 %v3921_v0  ;;  %3402 = vmatpush3.bf16.msra.mxu1 %v3620_v7  ;;  %v3629_v18 = vld [vmem:[%s4560_s27 + $0x64] ss:$12 sps:$4 sm:$0xff]   ;;  %v3631_v19 = vld [vmem:[%s4560_s27 + $0x60] ss:$12 sps:$4 sm:$0xff]   ;;  %v3632_v20 = vld [vmem:[%s4560_s27 + $0x68] ss:$12 sps:$4 sm:$0xff]  }
  0x1a   : > { %954 = vmatpush1.bf16.msra.mxu0 %v3619_v6  ;;  %3403 = vmatprep.subr.bf16.mxu1 %v3779_v3  ;;  %v3633_v21 = vld [vmem:[%s4560_s27 + $0x7c] ss:$12 sps:$4 sm:$0xff]   ;;  %v3635_v22 = vld [vmem:[%s4560_s27 + $0x78] ss:$12 sps:$4 sm:$0xff]   ;;  %v3636_v23 = vld [vmem:[%s4560_s27 + $0x80] ss:$12 sps:$4 sm:$0xff]  }
  0x1b   : > { %955 = vmatprep.subr.bf16.mxu0 %v3621_v8  ;;  %v3637_v24 = vld [vmem:[%s4560_s27 + $0x94] ss:$12 sps:$4 sm:$0xff]   ;;  %v3639_v26 = vld [vmem:[%s4560_s27 + $0x90] ss:$12 sps:$4 sm:$0xff]   ;;  %v3640_v27 = vld [vmem:[%s4560_s27 + $0x98] ss:$12 sps:$4 sm:$0xff]  }
  0x1c   : > { %v3641_v28 = vld [vmem:[%s4560_s27 + $0xac] ss:$12 sps:$4 sm:$0xff]   ;;  %v3643_v29 = vld [vmem:[%s4560_s27 + $0xa8] ss:$12 sps:$4 sm:$0xff]   ;;  %v3644_v30 = vld [vmem:[%s4560_s27 + $0xb0] ss:$12 sps:$4 sm:$0xff]  }
  0x1d   : > { %3404 = vmatpush3.bf16.msra.mxu1 %v3624_v14  ;;  %v3169_v35 = vld [vmem:[%s4561_s0] ss:$0 sm:$0xff]  ;;  %v1035_v7 = vand.u32 127, %v808_v41  ;;  %s4564_s0 = sld [smem:[#allocation9_spill]] }
  0x1e   : > { %956 = vmatpush1.bf16.msra.mxu0 %v3623_v13  ;;  %3405 = vmatprep.subr.bf16.mxu1 %v3779_v3  ;;  %v3170_v37 = vld [vmem:[%s4562_s1] ss:$0 sm:$0xff]  ;;  %s3302_s1 = sshll.u32 %s4572_s30, 4 }
  0x1f   : > { %957 = vmatprep.subr.bf16.mxu0 %v3625_v15  ;;  %v806_v44 = vld [vmem:[%s4563_s6] sm:$0x7]  ;;  %vm1036_vm3 = vcmp.gt.s32.totalorder %v1035_v7, %v809_v42 }
  0x20   : > { %v819_v47 = vrot.slane %v806_v44, %v818_v43  ;;  %v815_v48 = vrot.slane %v806_v44, %v4023_v45  ;;  %v811_v49 = vrot.slane %v806_v44, %v4025_v46 }
  0x21   : > { %3406 = vmatpush3.bf16.msra.mxu1 %v3628_v17 }
  0x22   : > { %958 = vmatpush1.bf16.msra.mxu0 %v3627_v16  ;;  %3407 = vmatprep.subr.bf16.mxu1 %v3779_v3 }
  0x23   : > { %959 = vmatprep.subr.bf16.mxu0 %v3629_v18 }
  0x25   : > { %3408 = vmatpush3.bf16.msra.mxu1 %v3632_v20 }
  0x26   : > { %960 = vmatpush1.bf16.msra.mxu0 %v3631_v19  ;;  %3409 = vmatprep.subr.bf16.mxu1 %v3779_v3 }
  0x27   : > { %961 = vmatprep.subr.bf16.mxu0 %v3633_v21 }
  0x29   : > { %3410 = vmatpush3.bf16.msra.mxu1 %v3636_v23 }
  0x2a   : > { %962 = vmatpush1.bf16.msra.mxu0 %v3635_v22  ;;  %3411 = vmatprep.subr.bf16.mxu1 %v3779_v3 }
  0x2b   : > { %963 = vmatprep.subr.bf16.mxu0 %v3637_v24 }
  0x2d   : > { %3412 = vmatpush3.bf16.msra.mxu1 %v3640_v27 }
  0x2e   : > { %964 = vmatpush1.bf16.msra.mxu0 %v3639_v26  ;;  %3413 = vmatprep.subr.bf16.mxu1 %v3779_v3 }
  0x2f   : > { %965 = vmatprep.subr.bf16.mxu0 %v3641_v28 }
  0x31   : > { %3414 = vmatpush3.bf16.msra.mxu1 %v3644_v30 }
  0x32   : > { %966 = vmatpush1.bf16.msra.mxu0 %v3643_v29  ;;  %3425 = vmatprep.subr.bf16.mxu1 %v3779_v3 }
  0x33   : > { %3419 = vmatprep.subr.bf16.mxu0 %v3779_v3 }
  0xa6   : > { %v748_v9 = vpop.xlane.xlu0 %747 }
  0xa7   : > { %v750_v10 = vmul.f32 0.0078125, %v748_v9  ;;  %v4055_v9 = vsel %vm1036_vm3, -1e+09, %v3779_v3 }
  0xa9   : > { %v751_v11 = vsub.f32 %v3921_v0, %v750_v10 }
  0xab   : > { %v752_v12 = vmul.f32 %v751_v11, %v751_v11 }
  0xad   : > { %753 = vadd.xlane.f32.xlu0 %v752_v12 }
 0x13a   : > { %v754_v31 = vpop.xlane.xlu0 %753 }
 0x13b   : > { %v755_v32 = vmul.f32 0.0078125, %v754_v31 }
 0x13d   : > { %v756_v33 = vadd.f32 1e-05, %v755_v32 }
 0x13f   : > { %3733 = vrsqrt.f32 %v756_v33 }
 0x149   : > { %v3734_v34 = vpop.eup %3733 }
 0x14a   : > { %v758_v36 = vmul.f32 %v3734_v34, %v751_v11 }
 0x14c   : > { %v765_v38 = vmul.f32 %v3169_v35, %v758_v36 }
 0x14e   : > { %v772_v39 = vadd.f32 %v3170_v37, %v765_v38  ;;  %v3647_v38 = vld [vmem:[%s4564_s0 + $0x10] sm:$0xff]  }
 0x150   : > { %v773_v40 = vpack.c.bf16 %v772_v39, %v772_v39  ;;  %v3648_v39 = vld [vmem:[%s4564_s0 + $0x18] sm:$0xff]  }
 0x152   : > { %984 = vmatmul.mubr.bf16.vlgmr.msra.gmra.mrb[0].mxu0 %v773_v40  ;;  %3416 = vmatmul.mubr.bf16.vlgmr.msra.gmra.mrb[0].mxu1 %v773_v40 }
 0x153   : > { %3421 = vmatprep.mubr.msk.bf16.mxu0 %vm3781_vm0, %v3779_v3  ;;  %3427 = vmatprep.mubr.msk.bf16.mxu1 %vm3781_vm0, %v3779_v3 }
 0x225   : > { %v985_v50 = vpop.f32.mrb[0].mxu0  ;;  %v1026_v51 = vpop.f32.mrb[0].mxu1 }
 0x226   : > { %v1027_v52 = vadd.f32 %v1026_v51, %v819_v47  ;;  %v987_v53 = vpop.f32.mrb[1].mxu0  ;;  %v3417_v54 = vpop.f32.mrb[1].mxu1  ;;  %v986_v61 = vadd.f32 %v985_v50, %v811_v49  ;;  %v3645_v47 = vld [vmem:[%s4564_s0] sm:$0xff]   ;;  %v3646_v49 = vld [vmem:[%s4564_s0 + $0x8] sm:$0xff]  }
 0x227   : > { %v988_v55 = vadd.f32 %v987_v53, %v815_v48  ;;  %v989_v56 = vpop.f32.mrb[2].mxu0  ;;  %v1029_v57 = vpop.f32.mrb[2].mxu1 }
 0x228   : > { %v4029_v58 = vpack.c.bf16 %v1027_v52, %v1027_v52  ;;  %v990_v59 = vpop.f32.mrb[3].mxu0  ;;  %v3418_v60 = vpop.f32.mrb[3].mxu1  ;;  %v4040_v2 = vpack.c.bf16 %v986_v61, %v986_v61 }
 0x229   : > { %v4031_v62 = vpack.c.bf16 %v988_v55, %v988_v55 }
 0x22a   : > { %v1108_v63 = vsel %vm1106_vm1, %v4029_v58, 0 }
 0x22b   : > { %3426 = vmatpush3.bf16.msra.mxu1 %v1108_v63  ;;  %1159 = vrot.lane.b32.xlu1 %v4031_v62, %s4548_s7  ;;  %v1046_v1 = vsel %vm1041_vm2, %v4031_v62, 0 }
 0x22c   : > { %3420 = vmatpush3.bf16.xpose.msra.mxu0 %v1046_v1  ;;  %3437 = vmatprep.subr.bf16.mxu1 %v3779_v3 }
 0x22d   : > { %3431 = vmatprep.subr.bf16.mxu0 %v3779_v3 }
 0x22f   : > { %1156 = vrot.lane.b32.xlu1 %v4040_v2, %s4548_s7 }
 0x233   : > { %3422 = vmatmul.mubr.msk.bf16.vlgmr.msra.gmra.mrb[4].mxu0 %vm1041_vm2, %v4040_v2 }
 0x234   : > { %3433 = vmatprep.mubr.msk.bf16.mxu0 %vm3781_vm0, %v3779_v3 }
 0x29d   : > { %v1160_v4 = vpop.permute.xlu1 %1159 }
 0x29e   : > { %v1165_v5 = vsel %vm1041_vm2, %v1160_v4, 0 }
 0x29f   : > { %3432 = vmatpush3.bf16.xpose.msra.mxu0 %v1165_v5 }
 0x2a0   : > { %3443 = vmatprep.subr.bf16.mxu0 %v3779_v3 }
 0x2a1   : > { %v1157_v6 = vpop.permute.xlu1 %1156 }
 0x2a6   : > { %3434 = vmatmul.mubr.msk.bf16.vlgmr.msra.gmra.mrb[8].mxu0 %vm1041_vm2, %v1157_v6 }
 0x2a7   : > { %3447 = vmatprep.mubr.msk.bf16.mxu0 %vm3781_vm0, %v3779_v3  ;;  %3444 = vmatpush3.bf16.msra.mxu0 %v3647_v38 }
 0x2a8   : > { %3445 = vmatprep.subr.bf16.mxu0 %v3779_v3 }
 0x2ab   : > { %3446 = vmatpush3.bf16.msra.mxu0 %v3648_v39 }
 0x2ac   : > { %3459 = vmatprep.subr.bf16.mxu0 %v3779_v3 }
 0x306   : > { %v1082_v8 = vpop.f32.mrb[4].mxu0 }
 0x307   : > { %v1088_v10 = vmul.f32 0.17677669, %v1082_v8  ;;  %v3423_v11 = vpop.f32.mrb[5].mxu0 }
 0x308   : > { %v1085_v12 = vpop.f32.mrb[6].mxu0 }
 0x309   : > { %v3424_v13 = vpop.f32.mrb[7].mxu0  ;;  %v1089_v14 = vadd.f32 %v1088_v10, %v4055_v9 }
 0x30b   : > { %v1091_v15 = vsel %vm1090_vm4, %v1089_v14, -inf }
 0x30c   : > { %1092 = vmax.xlane.f32.xlu0 %v1091_v15 }
 0x379   : > { %v1201_v16 = vpop.f32.mrb[8].mxu0 }
 0x37a   : > { %v1207_v17 = vmul.f32 0.17677669, %v1201_v16  ;;  %v3435_v18 = vpop.f32.mrb[9].mxu0 }
 0x37b   : > { %v1204_v19 = vpop.f32.mrb[10].mxu0 }
 0x37c   : > { %v3436_v20 = vpop.f32.mrb[11].mxu0  ;;  %v1208_v21 = vadd.f32 %v1207_v17, %v4055_v9 }
 0x37e   : > { %v1209_v22 = vsel %vm1090_vm4, %v1208_v21, -inf }
 0x37f   : > { %1210 = vmax.xlane.f32.xlu1 %v1209_v22 }
 0x390   : > { %1385 = vrot.lane.b32.xlu1 %v4040_v2, %s4546_s28 }
 0x399   : > { %v1093_v23 = vpop.xlane.xlu0 %1092 }
 0x39a   : > { %v1094_v24 = vsub.f32 %v1089_v14, %v1093_v23 }
 0x39c   : > { %v1095_v26 = vmul.f32 1.442695, %v1094_v24 }
 0x39e   : > { %3735 = vpow2.f32 %v1095_v26 }
 0x3a8   : > { %v3736_v27 = vpop.eup %3735 }
 0x3a9   : > { %v1097_v28 = vsel %vm1090_vm4, %v3736_v27, 0.0 }
 0x3aa   : > { %1098 = vadd.xlane.f32.xlu0 %v1097_v28 }
 0x40c   : > { %v1211_v29 = vpop.xlane.xlu1 %1210 }
 0x40d   : > { %v1212_v30 = vsub.f32 %v1208_v21, %v1211_v29 }
 0x40f   : > { %v1213_v31 = vmul.f32 1.442695, %v1212_v30 }
 0x410   : > { %v1386_v1 = vpop.permute.xlu1 %1385 }
 0x411   : > { %3737 = vpow2.f32 %v1213_v31 }
 0x41b   : > { %v3738_v32 = vpop.eup %3737 }
 0x41c   : > { %v1215_v33 = vsel %vm1090_vm4, %v3738_v32, 0.0 }
 0x41d   : > { %1216 = vadd.xlane.f32.xlu0 %v1215_v33 }
 0x433   : > { %1222 = vrot.lane.b32.xlu0 %v4029_v58, %s4548_s7 }
 0x437   : > { %v1099_v34 = vpop.xlane.xlu0 %1098  ;;  %1387 = vrot.lane.b32.xlu0 %v4031_v62, %s4546_s28 }
 0x438   : > { %3739 = vrcp.f32 %v1099_v34 }
 0x442   : > { %v3740_v35 = vpop.eup %3739 }
 0x443   : > { %v1101_v36 = vmul.f32 %v3740_v35, %v3736_v27  ;;  %v3650_v35 = vld [vmem:[%s4564_s0 + $0x28] sm:$0xff]  }
 0x445   : > { %v1102_v37 = vpack.c.bf16 %v1101_v36, %v1101_v36 }
 0x447   : > { %3428 = vmatmul.mubr.msk.bf16.vlgmr.msra.gmra.mrb[4].mxu1 %vm1090_vm4, %v1102_v37 }
 0x448   : > { %3439 = vmatprep.mubr.msk.bf16.mxu1 %vm3781_vm0, %v3779_v3 }
 0x4aa   : > { %v1217_v40 = vpop.xlane.xlu0 %1216 }
 0x4ab   : > { %3741 = vrcp.f32 %v1217_v40 }
 0x4ae   : > { %v1223_v41 = vpop.permute.xlu0 %1222 }
 0x4af   : > { %v1228_v42 = vsel %vm1106_vm1, %v1223_v41, 0 }
 0x4b0   : > { %3438 = vmatpush3.bf16.msra.mxu1 %v1228_v42 }
 0x4b1   : > { %3451 = vmatprep.subr.bf16.mxu1 %v3779_v3 }
 0x4b2   : > { %v1388_v55 = vpop.permute.xlu0 %1387 }
 0x4b3   : > { %v1393_v61 = vsel %vm1041_vm2, %v1388_v55, 0 }
 0x4b5   : > { %v3742_v43 = vpop.eup %3741 }
 0x4b6   : > { %v1219_v44 = vmul.f32 %v3742_v43, %v3738_v32 }
 0x4b8   : > { %v1220_v48 = vpack.c.bf16 %v1219_v44, %v1219_v44 }
 0x4ba   : > { %3440 = vmatmul.mubr.msk.bf16.vlgmr.msra.gmra.mrb[8].mxu1 %vm1090_vm4, %v1220_v48 }
 0x4bb   : > { %3452 = vmatpush3.bf16.msra.mxu1 %v3645_v47  ;;  %3455 = vmatprep.mubr.msk.bf16.mxu1 %vm3781_vm0, %v3779_v3 }
 0x4bc   : > { %3453 = vmatprep.subr.bf16.mxu1 %v3779_v3 }
 0x4bf   : > { %3454 = vmatpush3.bf16.msra.mxu1 %v3646_v49 }
 0x4c0   : > { %3465 = vmatprep.subr.bf16.mxu1 %v3779_v3 }
 0x51a   : > { %v1144_v50 = vpop.f32.mrb[4].mxu1 }
 0x51b   : > { %v1150_v51 = vpack.c.bf16 %v1144_v50, %v1144_v50  ;;  %v3429_v52 = vpop.f32.mrb[5].mxu1 }
 0x51c   : > { %v1147_v53 = vpop.f32.mrb[6].mxu1 }
 0x51d   : > { %v3430_v54 = vpop.f32.mrb[7].mxu1  ;;  %3456 = vmatmul.mubr.msk.bf16.vlgmr.msra.gmra.mrb[12].mxu1 %vm1041_vm2, %v1150_v51 }
 0x51e   : > { %3467 = vmatprep.mubr.msk.bf16.mxu1 %vm3781_vm0, %v3779_v3 }
 0x58d   : > { %v1264_v56 = vpop.f32.mrb[8].mxu1 }
 0x58e   : > { %v1270_v57 = vpack.c.bf16 %v1264_v56, %v1264_v56  ;;  %v3441_v59 = vpop.f32.mrb[9].mxu1 }
 0x58f   : > { %v1267_v60 = vpop.f32.mrb[10].mxu1 }
 0x590   : > { %v3442_v63 = vpop.f32.mrb[11].mxu1  ;;  %3448 = vmatmul.mubr.msk.bf16.vlgmr.msra.gmra.mrb[12].mxu0 %vm1041_vm2, %v1270_v57 }
 0x591   : > { %3460 = vmatpush3.bf16.xpose.msra.mxu0 %v1393_v61  ;;  %3461 = vmatprep.mubr.msk.bf16.mxu0 %vm3781_vm0, %v3779_v3 }
 0x592   : > { %3471 = vmatprep.subr.bf16.mxu0 %v3779_v3 }
 0x598   : > { %3462 = vmatmul.mubr.msk.bf16.vlgmr.msra.gmra.mrb[16].mxu0 %vm1041_vm2, %v1386_v1 }
 0x599   : > { %3475 = vmatprep.mubr.msk.bf16.mxu0 %vm3781_vm0, %v3779_v3 }
 0x5f0   : > { %v1379_v4 = vpop.f32.mrb[12].mxu1 }
 0x5f1   : > { %v3457_v5 = vpop.f32.mrb[13].mxu1 }
 0x5f2   : > { %v1382_v6 = vpop.f32.mrb[14].mxu1 }
 0x5f3   : > { %v3458_v7 = vpop.f32.mrb[15].mxu1  ;;  %v3652_v6 = vld [vmem:[%s4564_s0 + $0x38] sm:$0xff]  }
 0x663   : > { %v1324_v8 = vpop.f32.mrb[12].mxu0 }
 0x664   : > { %v4104_v10 = vadd.f32 %v1379_v4, %v1324_v8  ;;  %v3449_v11 = vpop.f32.mrb[13].mxu0 }
 0x665   : > { %v1327_v12 = vpop.f32.mrb[14].mxu0 }
 0x666   : > { %v3450_v13 = vpop.f32.mrb[15].mxu0 }
 0x66b   : > { %v1429_v14 = vpop.f32.mrb[16].mxu0 }
 0x66c   : > { %v1435_v15 = vmul.f32 0.17677669, %v1429_v14  ;;  %v3463_v16 = vpop.f32.mrb[17].mxu0 }
 0x66d   : > { %v1432_v17 = vpop.f32.mrb[18].mxu0 }
 0x66e   : > { %v3464_v18 = vpop.f32.mrb[19].mxu0  ;;  %v1436_v19 = vadd.f32 %v1435_v15, %v4055_v9  ;;  %v3215_v17 = vld [vmem:[%s4525_s8] ss:$0 sm:$0xff] }
 0x670   : > { %v1437_v20 = vsel %vm1090_vm4, %v1436_v19, -inf }
 0x671   : > { %1438 = vmax.xlane.f32.xlu0 %v1437_v20 }
 0x687   : > { %1449 = vrot.lane.b32.xlu0 %v4029_v58, %s4546_s28 }
 0x68b   : > { %1558 = vrot.lane.b32.xlu0 %v4040_v2, %s4544_s29  ;;  %v3649_v2 = vld [vmem:[%s4564_s0 + $0x20] sm:$0xff]  }
 0x68c   : > { %3472 = vmatpush3.bf16.msra.mxu0 %v3649_v2  ;;  %v3664_v2 = vld [vmem:[%s4530_s13 + $0x34] ss:$8 sps:$4 sm:$0xff]  }
 0x68d   : > { %3473 = vmatprep.subr.bf16.mxu0 %v3779_v3 }
 0x690   : > { %3474 = vmatpush3.bf16.msra.mxu0 %v3650_v35 }
 0x691   : > { %3485 = vmatprep.subr.bf16.mxu0 %v3779_v3 }
 0x6fe   : > { %v1439_v21 = vpop.xlane.xlu0 %1438 }
 0x6ff   : > { %v1440_v22 = vsub.f32 %v1436_v19, %v1439_v21  ;;  %v3653_v21 = vld [vmem:[%s4530_s13] ss:$8 sps:$4 sm:$0xff]  }
 0x701   : > { %v1441_v23 = vmul.f32 1.442695, %v1440_v22  ;;  %v3655_v22 = vld [vmem:[%s4530_s13 + $0x4] ss:$8 sps:$4 sm:$0xff]  }
 0x702   : > { %v1450_v24 = vpop.permute.xlu0 %1449 }
 0x703   : > { %3743 = vpow2.f32 %v1441_v23  ;;  %v1455_v26 = vsel %vm1106_vm1, %v1450_v24, 0  ;;  %v3658_v23 = vld [vmem:[%s4530_s13 + $0x14] ss:$8 sps:$4 sm:$0xff]   ;;  %v3656_v24 = vld [vmem:[%s4530_s13 + $0x10] ss:$8 sps:$4 sm:$0xff]  }
 0x704   : > { %3466 = vmatpush3.bf16.msra.mxu1 %v1455_v26  ;;  %v3661_v26 = vld [vmem:[%s4530_s13 + $0x24] ss:$8 sps:$4 sm:$0xff]  }
 0x705   : > { %3479 = vmatprep.subr.bf16.mxu1 %v3779_v3 }
 0x70d   : > { %v3744_v27 = vpop.eup %3743 }
 0x70e   : > { %v1443_v28 = vsel %vm1090_vm4, %v3744_v27, 0.0 }
 0x70f   : > { %1444 = vadd.xlane.f32.xlu1 %v1443_v28  ;;  %v3659_v28 = vld [vmem:[%s4530_s13 + $0x20] ss:$8 sps:$4 sm:$0xff]  }
 0x720   : > { %1560 = vrot.lane.b32.xlu1 %v4031_v62, %s4544_s29  ;;  %v1559_v62 = vpop.permute.xlu0 %1558 }
 0x79c   : > { %v1445_v29 = vpop.xlane.xlu1 %1444 }
 0x79d   : > { %3745 = vrcp.f32 %v1445_v29  ;;  %v3662_v29 = vld [vmem:[%s4530_s13 + $0x30] ss:$8 sps:$4 sm:$0xff]  }
 0x7a0   : > { %v1561_v32 = vpop.permute.xlu1 %1560 }
 0x7a1   : > { %v1566_v34 = vsel %vm1041_vm2, %v1561_v32, 0  ;;  %v3672_v32 = vld [vmem:[%s4530_s13 + $0x54] ss:$8 sps:$4 sm:$0xff]  }
 0x7a7   : > { %v3746_v30 = vpop.eup %3745 }
 0x7a8   : > { %v1447_v31 = vmul.f32 %v3746_v30, %v3744_v27  ;;  %v3669_v27 = vld [vmem:[%s4528_s11 + $0x8] sm:$0xff]  }
 0x7a9   : > { %v3668_v30 = vld [vmem:[%s4530_s13 + $0x44] ss:$8 sps:$4 sm:$0xff]  }
 0x7aa   : > { %v1448_v33 = vpack.c.bf16 %v1447_v31, %v1447_v31  ;;  %v3666_v31 = vld [vmem:[%s4530_s13 + $0x40] ss:$8 sps:$4 sm:$0xff]  }
 0x7ac   : > { %3468 = vmatmul.mubr.msk.bf16.vlgmr.msra.gmra.mrb[16].mxu1 %vm1090_vm4, %v1448_v33  ;;  %v3670_v33 = vld [vmem:[%s4530_s13 + $0x50] ss:$8 sps:$4 sm:$0xff]  }
 0x7ad   : > { %3480 = vmatpush3.bf16.xpose.msra.mxu1 %v1566_v34  ;;  %3481 = vmatprep.mubr.msk.bf16.mxu1 %vm3781_vm0, %v3779_v3 }
 0x7ae   : > { %3491 = vmatprep.subr.bf16.mxu1 %v3779_v3 }
 0x7b4   : > { %3482 = vmatmul.mubr.msk.bf16.vlgmr.msra.gmra.mrb[20].mxu1 %vm1041_vm2, %v1559_v62 }
 0x7b5   : > { %3495 = vmatprep.mubr.msk.bf16.mxu1 %vm3781_vm0, %v3779_v3 }
 0x87f   : > { %v1491_v36 = vpop.f32.mrb[16].mxu1 }
 0x880   : > { %v1497_v37 = vpack.c.bf16 %v1491_v36, %v1491_v36  ;;  %v3469_v38 = vpop.f32.mrb[17].mxu1 }
 0x881   : > { %v1494_v39 = vpop.f32.mrb[18].mxu1  ;;  %v3676_v38 = vld [vmem:[%s4530_s13 + $0x64] ss:$8 sps:$4 sm:$0xff]  }
 0x882   : > { %v3470_v40 = vpop.f32.mrb[19].mxu1  ;;  %3476 = vmatmul.mubr.msk.bf16.vlgmr.msra.gmra.mrb[20].mxu0 %vm1041_vm2, %v1497_v37  ;;  %v3673_v37 = vld [vmem:[%s4528_s11 + $0x10] sm:$0xff]   ;;  %v3674_v39 = vld [vmem:[%s4530_s13 + $0x60] ss:$8 sps:$4 sm:$0xff]  }
 0x883   : > { %3487 = vmatprep.mubr.msk.bf16.mxu0 %vm3781_vm0, %v3779_v3  ;;  %v3677_v40 = vld [vmem:[%s4528_s11 + $0x18] sm:$0xff]  }
 0x887   : > { %v1602_v41 = vpop.f32.mrb[20].mxu1 }
 0x888   : > { %v1608_v42 = vmul.f32 0.17677669, %v1602_v41  ;;  %v3483_v43 = vpop.f32.mrb[21].mxu1  ;;  %v3678_v41 = vld [vmem:[%s4530_s13 + $0x70] ss:$8 sps:$4 sm:$0xff]  }
 0x889   : > { %v1605_v44 = vpop.f32.mrb[22].mxu1  ;;  %v3681_v43 = vld [vmem:[%s4528_s11 + $0x20] sm:$0xff]  }
 0x88a   : > { %v3484_v47 = vpop.f32.mrb[23].mxu1  ;;  %v1609_v48 = vadd.f32 %v1608_v42, %v4055_v9  ;;  %v3651_v9 = vld [vmem:[%s4564_s0 + $0x30] sm:$0xff]   ;;  %s4565_s0 = sld [smem:[#allocation3_spill]] }
 0x88b   : > { %3492 = vmatpush3.bf16.msra.mxu1 %v3651_v9  ;;  %v3680_v42 = vld [vmem:[%s4530_s13 + $0x74] ss:$8 sps:$4 sm:$0xff]  }
 0x88c   : > { %v1610_v49 = vsel %vm1090_vm4, %v1609_v48, -inf  ;;  %3493 = vmatprep.subr.bf16.mxu1 %v3779_v3 }
 0x88d   : > { %1611 = vmax.xlane.f32.xlu0 %v1610_v49  ;;  %v3682_v49 = vld [vmem:[%s4528_s11 + $0x28] sm:$0xff]  }
 0x88f   : > { %3494 = vmatpush3.bf16.msra.mxu1 %v3652_v6 }
 0x890   : > { %1988 = vmatprep.subr.bf16.mxu1 %v3655_v22  ;;  %s732_s24 = scalar_lea.vmem %s4565_s0, %s3302_s1  ;;  %s4568_s1 = smov 64  }
 0x891   : > { %v742_v44 = vld [vmem:[%s732_s24] sm:$0xff]  ;;  %v743_v47 = vld [vmem:[%s732_s24 + $0x8] sm:$0xff]  ;;  %s4570_s0 = sshll.u32 %s4572_s30, 3 }
 0x8a3   : > { %1622 = vrot.lane.b32.xlu0 %v4029_v58, %s4544_s29  ;;  %s4569_s29 = smov 32  }
 0x91a   : > { %v1612_v50 = vpop.xlane.xlu0 %1611 }
 0x91b   : > { %v1613_v51 = vsub.f32 %v1609_v48, %v1612_v50  ;;  %v1879_v48 = vpack.c.bf16 %v743_v47, %v742_v44  ;;  %v3683_v50 = vld [vmem:[%s4528_s11 + $0x30] sm:$0xff]  }
 0x91d   : > { %v1614_v52 = vmul.f32 1.442695, %v1613_v51  ;;  %v3684_v51 = vld [vmem:[%s4528_s11 + $0x38] sm:$0xff]  }
 0x91e   : > { %v1623_v53 = vpop.permute.xlu0 %1622 }
 0x91f   : > { %3747 = vpow2.f32 %v1614_v52  ;;  %v1628_v54 = vsel %vm1106_vm1, %v1623_v53, 0 }
 0x920   : > { %3486 = vmatpush3.bf16.msra.mxu0 %v1628_v54 }
 0x921   : > { %3499 = vmatprep.subr.bf16.mxu0 %v3779_v3 }
 0x929   : > { %v3748_v55 = vpop.eup %3747 }
 0x92a   : > { %v1616_v56 = vsel %vm1090_vm4, %v3748_v55, 0.0 }
 0x92b   : > { %1617 = vadd.xlane.f32.xlu1 %v1616_v56  ;;  %v3216_v56 = vld [vmem:[%s4526_s9] ss:$0 sm:$0xff] }
 0x955   : > { %v1551_v58 = vpop.f32.mrb[20].mxu0 }
 0x956   : > { %v1557_v57 = vadd.f32 %v1551_v58, %v4104_v10  ;;  %v3477_v59 = vpop.f32.mrb[21].mxu0  ;;  %v3217_v58 = vld [vmem:[%s4527_s10] ss:$0 sm:$0xff] }
 0x957   : > { %v1554_v60 = vpop.f32.mrb[22].mxu0 }
 0x958   : > { %v3478_v61 = vpop.f32.mrb[23].mxu0 }
 0x959   : > { %v1896_v61 = vld [vmem:[%s4531_s14] sm:$0x3] }
 0x9b8   : > { %v1618_v63 = vpop.xlane.xlu1 %1617 }
 0x9b9   : > { %3749 = vrcp.f32 %v1618_v63  ;;  %v1901_v63 = vrot.slane %v1896_v61, %v4025_v46 }
 0x9c3   : > { %v3750_v1 = vpop.eup %3749 }
 0x9c4   : > { %v1620_v4 = vmul.f32 %v3750_v1, %v3748_v55  ;;  %v1905_v1 = vrot.slane %v1896_v61, %v4023_v45  ;;  %v3685_v61 = vld [vmem:[%s4532_s15] sm:$0xff]  }
 0x9c6   : > { %v1621_v5 = vpack.c.bf16 %v1620_v4, %v1620_v4 }
 0x9c8   : > { %3488 = vmatmul.mubr.msk.bf16.vlgmr.msra.gmra.mrb[24].mxu0 %vm1090_vm4, %v1621_v5 }
 0x9c9   : > { %3515 = vmatprep.mubr.msk.bf16.mxu0 %vm3781_vm0, %v3779_v3 }
 0xa9b   : > { %v1664_v7 = vpop.f32.mrb[24].mxu0 }
 0xa9c   : > { %v1670_v8 = vpack.c.bf16 %v1664_v7, %v1664_v7  ;;  %v3489_v10 = vpop.f32.mrb[25].mxu0 }
 0xa9d   : > { %v1667_v11 = vpop.f32.mrb[26].mxu0 }
 0xa9e   : > { %v3490_v12 = vpop.f32.mrb[27].mxu0  ;;  %3496 = vmatmul.mubr.msk.bf16.vlgmr.msra.gmra.mrb[24].mxu1 %vm1041_vm2, %v1670_v8 }
 0xa9f   : > { %2020 = vmatprep.mubr.bf16.mxu1 %v3780_v25  ;;  %1989 = vmatpush1.bf16.msra.mxu1 %v3653_v21 }
 0xaa0   : > { %1990 = vmatprep.subr.bf16.mxu1 %v3658_v23 }
 0xaa3   : > { %1991 = vmatpush1.bf16.msra.mxu1 %v3656_v24 }
 0xaa4   : > { %1992 = vmatprep.subr.bf16.mxu1 %v3661_v26 }
 0xaa7   : > { %1993 = vmatpush1.bf16.msra.mxu1 %v3659_v28  ;;  %v4295_v28 = vld [vmem:[%s735_s5] ss:$0 sm:$0xff]  ;;  %s739_s5 = scalar_lea.vmem %s4540_s23, %s4570_s0 }
 0xaa8   : > { %1994 = vmatprep.subr.bf16.mxu1 %v3664_v2 }
 0xaab   : > { %1995 = vmatpush1.bf16.msra.mxu1 %v3662_v29 }
 0xaac   : > { %1996 = vmatprep.subr.bf16.mxu1 %v3668_v30 }
 0xaaf   : > { %1997 = vmatpush1.bf16.msra.mxu1 %v3666_v31 }
 0xab0   : > { %1998 = vmatprep.subr.bf16.mxu1 %v3672_v32 }
 0xab3   : > { %1999 = vmatpush1.bf16.msra.mxu1 %v3670_v33 }
 0xab4   : > { %2000 = vmatprep.subr.bf16.mxu1 %v3676_v38 }
 0xab7   : > { %2001 = vmatpush1.bf16.msra.mxu1 %v3674_v39 }
 0xab8   : > { %2002 = vmatprep.subr.bf16.mxu1 %v3680_v42 }
 0xabb   : > { %2003 = vmatpush1.bf16.msra.mxu1 %v3678_v41 }
 0xabc   : > { %3525 = vmatprep.subr.bf16.mxu1 %v3779_v3 }
 0xabe   : > { %2021 = vmatmul.mubr.bf16.vlgmr.msra.gmra.mrb[28].mxu1 %v1879_v48 }
 0xabf   : > { %3527 = vmatprep.mubr.msk.bf16.mxu1 %vm3781_vm0, %v3779_v3 }
 0xb71   : > { %v1724_v13 = vpop.f32.mrb[24].mxu1 }
 0xb72   : > { %v1730_v14 = vadd.f32 %v1724_v13, %v1557_v57  ;;  %v3497_v15 = vpop.f32.mrb[25].mxu1 }
 0xb73   : > { %v1727_v16 = vpop.f32.mrb[26].mxu1 }
 0xb74   : > { %v1731_v18 = vadd.f32 %v1730_v14, %v3921_v0  ;;  %v3498_v19 = vpop.f32.mrb[27].mxu1  ;;  %v3665_v0 = vld [vmem:[%s4528_s11] sm:$0xff]  }
 0xb75   : > { %3500 = vmatpush3.bf16.msra.mxu0 %v3665_v0  ;;  %v3218_v16 = vld [vmem:[%s4529_s12] ss:$0 sm:$0xff] }
 0xb76   : > { %v4160_v20 = vadd.f32 %v3215_v17, %v1731_v18  ;;  %3501 = vmatprep.subr.bf16.mxu0 %v3779_v3 }
 0xb78   : > { %1742 = vadd.xlane.f32.xlu1 %v4160_v20 }
 0xb79   : > { %3502 = vmatpush3.bf16.msra.mxu0 %v3669_v27 }
 0xb7a   : > { %3503 = vmatprep.subr.bf16.mxu0 %v3779_v3 }
 0xb7d   : > { %3504 = vmatpush3.bf16.msra.mxu0 %v3673_v37 }
 0xb7e   : > { %3505 = vmatprep.subr.bf16.mxu0 %v3779_v3 }
 0xb81   : > { %3506 = vmatpush3.bf16.msra.mxu0 %v3677_v40 }
 0xb82   : > { %3507 = vmatprep.subr.bf16.mxu0 %v3779_v3 }
 0xb85   : > { %3508 = vmatpush3.bf16.msra.mxu0 %v3681_v43 }
 0xb86   : > { %3509 = vmatprep.subr.bf16.mxu0 %v3779_v3 }
 0xb89   : > { %3510 = vmatpush3.bf16.msra.mxu0 %v3682_v49 }
 0xb8a   : > { %3511 = vmatprep.subr.bf16.mxu0 %v3779_v3 }
 0xb8d   : > { %3512 = vmatpush3.bf16.msra.mxu0 %v3683_v50 }
 0xb8e   : > { %3513 = vmatprep.subr.bf16.mxu0 %v3779_v3 }
 0xb91   : > { %3514 = vmatpush3.bf16.msra.mxu0 %v3684_v51  ;;  %v2022_v4 = vpop.f32.mrb[28].mxu1 }
 0xb92   : > { %3519 = vmatprep.subr.bf16.mxu0 %v3779_v3  ;;  %v2023_v5 = vadd.f32 %v2022_v4, %v1901_v63  ;;  %v2024_v6 = vpop.f32.mrb[29].mxu1 }
 0xb93   : > { %v2025_v7 = vadd.f32 %v2024_v6, %v1905_v1  ;;  %v2026_v8 = vpop.f32.mrb[30].mxu1 }
 0xb94   : > { %v2027_v10 = vadd.f32 %v2026_v8, %v1901_v63  ;;  %v2028_v11 = vpop.f32.mrb[31].mxu1 }
 0xb95   : > { %v2029_v12 = vadd.f32 %v2028_v11, %v1905_v1  ;;  %v3686_v1 = vld [vmem:[%s4532_s15 + $0x8] sm:$0xff]  }
 0xb96   : > { %v4264_v13 = vpack.c.bf16 %v2027_v10, %v2023_v5 }
 0xb97   : > { %v4266_v14 = vpack.c.bf16 %v2029_v12, %v2025_v7 }
 0xb98   : > { %2153 = vrot.lane.b32.xlu0 %v4264_v13, %s4566_s3  ;;  %v2038_v15 = vsel %vm1041_vm2, %v4264_v13, 0 }
 0xb99   : > { %3526 = vmatpush3.bf16.msra.mxu1 %v4266_v14 }
 0xb9a   : > { %3537 = vmatprep.subr.bf16.mxu1 %v3779_v3 }
 0xc05   : > { %v1743_v34 = vpop.xlane.xlu1 %1742 }
 0xc06   : > { %v1744_v62 = vmul.f32 0.0078125, %v1743_v34 }
 0xc08   : > { %v1745_v35 = vsub.f32 %v4160_v20, %v1744_v62 }
 0xc0a   : > { %v1746_v36 = vmul.f32 %v1745_v35, %v1745_v35  ;;  %v2154_v18 = vpop.permute.xlu0 %2153 }
 0xc0b   : > { %v2159_v24 = vsel %vm1041_vm2, %v2154_v18, 0 }
 0xc0c   : > { %1747 = vadd.xlane.f32.xlu1 %v1746_v36 }
 0xc99   : > { %v1748_v52 = vpop.xlane.xlu1 %1747 }
 0xc9a   : > { %v1749_v53 = vmul.f32 0.0078125, %v1748_v52 }
 0xc9c   : > { %v1750_v54 = vadd.f32 1e-05, %v1749_v53 }
 0xc9e   : > { %3751 = vrsqrt.f32 %v1750_v54 }
 0xca8   : > { %v3752_v55 = vpop.eup %3751 }
 0xca9   : > { %v1752_v9 = vmul.f32 %v3752_v55, %v1745_v35 }
 0xcab   : > { %v1759_v57 = vmul.f32 %v3216_v56, %v1752_v9  ;;  %v3687_v56 = vld [vmem:[%s4532_s15 + $0x10] sm:$0xff]   ;;  %v3688_v9 = vld [vmem:[%s4532_s15 + $0x18] sm:$0xff]  }
 0xcad   : > { %v1766_v59 = vadd.f32 %v3217_v58, %v1759_v57 }
 0xcaf   : > { %v1767_v60 = vpack.c.bf16 %v1766_v59, %v1766_v59 }
 0xcb1   : > { %3516 = vmatmul.mubr.bf16.vlgmr.msra.gmra.mrb[28].mxu0 %v1767_v60 }
 0xcb2   : > { %3521 = vmatprep.mubr.msk.bf16.mxu0 %vm3781_vm0, %v3779_v3  ;;  %3520 = vmatpush3.bf16.xpose.msra.mxu0 %v2038_v15 }
 0xcb3   : > { %3531 = vmatprep.subr.bf16.mxu0 %v3779_v3 }
 0xd84   : > { %v1873_v17 = vpop.f32.mrb[28].mxu0 }
 0xd85   : > { %v1874_v19 = vadd.f32 %v3218_v16, %v1873_v17  ;;  %v3517_v21 = vpop.f32.mrb[29].mxu0 }
 0xd86   : > { %v1876_v22 = vpop.f32.mrb[30].mxu0 }
 0xd87   : > { %v4278_v23 = vpack.c.bf16 %v1874_v19, %v1874_v19  ;;  %v3518_v0 = vpop.f32.mrb[31].mxu0 }
 0xd89   : > { %2150 = vrot.lane.b32.xlu1 %v4278_v23, %s4566_s3  ;;  %3522 = vmatmul.mubr.msk.bf16.vlgmr.msra.gmra.mrb[32].mxu0 %vm1041_vm2, %v4278_v23 }
 0xd8a   : > { %3532 = vmatpush3.bf16.xpose.msra.mxu0 %v2159_v24  ;;  %3533 = vmatprep.mubr.msk.bf16.mxu0 %vm3781_vm0, %v3779_v3 }
 0xd8b   : > { %3543 = vmatprep.subr.bf16.mxu0 %v3779_v3 }
 0xdfb   : > { %v2151_v26 = vpop.permute.xlu1 %2150 }
 0xdfc   : > { %3534 = vmatmul.mubr.msk.bf16.vlgmr.msra.gmra.mrb[36].mxu0 %vm1041_vm2, %v2151_v26 }
 0xdfd   : > { %3547 = vmatprep.mubr.msk.bf16.mxu0 %vm3781_vm0, %v3779_v3  ;;  %3544 = vmatpush3.bf16.msra.mxu0 %v3687_v56 }
 0xdfe   : > { %3545 = vmatprep.subr.bf16.mxu0 %v3779_v3 }
 0xe01   : > { %3546 = vmatpush3.bf16.msra.mxu0 %v3688_v9 }
 0xe02   : > { %3559 = vmatprep.subr.bf16.mxu0 %v3779_v3 }
 0xe5c   : > { %v2074_v27 = vpop.f32.mrb[32].mxu0 }
 0xe5d   : > { %v2080_v2 = vmul.f32 0.17677669, %v2074_v27  ;;  %v3523_v29 = vpop.f32.mrb[33].mxu0 }
 0xe5e   : > { %v2077_v30 = vpop.f32.mrb[34].mxu0 }
 0xe5f   : > { %v3524_v31 = vpop.f32.mrb[35].mxu0  ;;  %v2087_v32 = vadd.f32 %v4295_v28, %v2080_v2 }
 0xe61   : > { %v2089_v33 = vsel %vm2088_vm5, %v2087_v32, -inf }
 0xe62   : > { %2090 = vmax.xlane.f32.xlu0 %v2089_v33 }
 0xecf   : > { %v2195_v34 = vpop.f32.mrb[36].mxu0 }
 0xed0   : > { %v2201_v62 = vmul.f32 0.17677669, %v2195_v34  ;;  %v3535_v35 = vpop.f32.mrb[37].mxu0 }
 0xed1   : > { %v2198_v36 = vpop.f32.mrb[38].mxu0 }
 0xed2   : > { %v3536_v37 = vpop.f32.mrb[39].mxu0  ;;  %v2202_v38 = vadd.f32 %v4295_v28, %v2201_v62 }
 0xed4   : > { %v2203_v39 = vsel %vm2088_vm5, %v2202_v38, -inf }
 0xed5   : > { %2204 = vmax.xlane.f32.xlu1 %v2203_v39 }
 0xee6   : > { %2379 = vrot.lane.b32.xlu1 %v4264_v13, %s4568_s1 }
 0xeef   : > { %v2091_v40 = vpop.xlane.xlu0 %2090 }
 0xef0   : > { %v2092_v41 = vsub.f32 %v2087_v32, %v2091_v40 }
 0xef2   : > { %v2093_v42 = vmul.f32 1.442695, %v2092_v41 }
 0xef4   : > { %3753 = vpow2.f32 %v2093_v42 }
 0xefe   : > { %v3754_v43 = vpop.eup %3753 }
 0xeff   : > { %v2095_v44 = vsel %vm2088_vm5, %v3754_v43, 0.0 }
 0xf00   : > { %2096 = vadd.xlane.f32.xlu0 %v2095_v44 }
 0xf62   : > { %v2205_v47 = vpop.xlane.xlu1 %2204 }
 0xf63   : > { %v2206_v48 = vsub.f32 %v2202_v38, %v2205_v47 }
 0xf65   : > { %v2207_v49 = vmul.f32 1.442695, %v2206_v48 }
 0xf66   : > { %v2380_v10 = vpop.permute.xlu1 %2379 }
 0xf67   : > { %3755 = vpow2.f32 %v2207_v49  ;;  %v2385_v17 = vsel %vm1041_vm2, %v2380_v10, 0 }
 0xf71   : > { %v3756_v50 = vpop.eup %3755 }
 0xf72   : > { %v2209_v51 = vsel %vm2088_vm5, %v3756_v50, 0.0 }
 0xf73   : > { %2210 = vadd.xlane.f32.xlu0 %v2209_v51  ;;  %v3690_v51 = vld [vmem:[%s4532_s15 + $0x28] sm:$0xff]  }
 0xf89   : > { %2216 = vrot.lane.b32.xlu0 %v4266_v14, %s4566_s3 }
 0xf8d   : > { %v2097_v52 = vpop.xlane.xlu0 %2096  ;;  %2377 = vrot.lane.b32.xlu0 %v4278_v23, %s4568_s1 }
 0xf8e   : > { %3757 = vrcp.f32 %v2097_v52 }
 0xf98   : > { %v3758_v53 = vpop.eup %3757 }
 0xf99   : > { %v2099_v54 = vmul.f32 %v3758_v53, %v3754_v43  ;;  %v3689_v43 = vld [vmem:[%s4532_s15 + $0x20] sm:$0xff]  }
 0xf9b   : > { %v2100_v55 = vpack.c.bf16 %v2099_v54, %v2099_v54 }
 0xf9d   : > { %3528 = vmatmul.mubr.msk.bf16.vlgmr.msra.gmra.mrb[32].mxu1 %vm2088_vm5, %v2100_v55 }
 0xf9e   : > { %3539 = vmatprep.mubr.msk.bf16.mxu1 %vm3781_vm0, %v3779_v3 }
0x1000   : > { %v2211_v58 = vpop.xlane.xlu0 %2210 }
0x1001   : > { %3759 = vrcp.f32 %v2211_v58 }
0x1004   : > { %v2217_v57 = vpop.permute.xlu0 %2216 }
0x1005   : > { %3538 = vmatpush3.bf16.msra.mxu1 %v2217_v57 }
0x1006   : > { %3551 = vmatprep.subr.bf16.mxu1 %v3779_v3 }
0x1008   : > { %v2378_v19 = vpop.permute.xlu0 %2377 }
0x100b   : > { %v3760_v59 = vpop.eup %3759 }
0x100c   : > { %v2213_v60 = vmul.f32 %v3760_v59, %v3756_v50 }
0x100e   : > { %v2214_v63 = vpack.c.bf16 %v2213_v60, %v2213_v60 }
0x1010   : > { %3540 = vmatmul.mubr.msk.bf16.vlgmr.msra.gmra.mrb[36].mxu1 %vm2088_vm5, %v2214_v63 }
0x1011   : > { %3552 = vmatpush3.bf16.msra.mxu1 %v3685_v61  ;;  %3555 = vmatprep.mubr.msk.bf16.mxu1 %vm3781_vm0, %v3779_v3 }
0x1012   : > { %3553 = vmatprep.subr.bf16.mxu1 %v3779_v3 }
0x1015   : > { %3554 = vmatpush3.bf16.msra.mxu1 %v3686_v1 }
0x1016   : > { %3565 = vmatprep.subr.bf16.mxu1 %v3779_v3 }
0x1070   : > { %v2138_v4 = vpop.f32.mrb[32].mxu1 }
0x1071   : > { %v2144_v5 = vpack.c.bf16 %v2138_v4, %v2138_v4  ;;  %v3529_v6 = vpop.f32.mrb[33].mxu1 }
0x1072   : > { %v2141_v7 = vpop.f32.mrb[34].mxu1 }
0x1073   : > { %v3530_v8 = vpop.f32.mrb[35].mxu1  ;;  %3556 = vmatmul.mubr.msk.bf16.vlgmr.msra.gmra.mrb[40].mxu1 %vm1041_vm2, %v2144_v5 }
0x1074   : > { %3567 = vmatprep.mubr.msk.bf16.mxu1 %vm3781_vm0, %v3779_v3  ;;  %v3691_v8 = vld [vmem:[%s4532_s15 + $0x30] sm:$0xff]  }
0x10e3   : > { %v2256_v11 = vpop.f32.mrb[36].mxu1 }
0x10e4   : > { %v2262_v12 = vpack.c.bf16 %v2256_v11, %v2256_v11  ;;  %v3541_v15 = vpop.f32.mrb[37].mxu1 }
0x10e5   : > { %v2259_v16 = vpop.f32.mrb[38].mxu1 }
0x10e6   : > { %v3542_v18 = vpop.f32.mrb[39].mxu1  ;;  %3548 = vmatmul.mubr.msk.bf16.vlgmr.msra.gmra.mrb[40].mxu0 %vm1041_vm2, %v2262_v12 }
0x10e7   : > { %3560 = vmatpush3.bf16.xpose.msra.mxu0 %v2385_v17  ;;  %3561 = vmatprep.mubr.msk.bf16.mxu0 %vm3781_vm0, %v3779_v3 }
0x10e8   : > { %3571 = vmatprep.subr.bf16.mxu0 %v3779_v3 }
0x10ee   : > { %3562 = vmatmul.mubr.msk.bf16.vlgmr.msra.gmra.mrb[44].mxu0 %vm1041_vm2, %v2378_v19 }
0x10ef   : > { %3575 = vmatprep.mubr.msk.bf16.mxu0 %vm3781_vm0, %v3779_v3  ;;  %3572 = vmatpush3.bf16.msra.mxu0 %v3689_v43  ;;  %v3702_v43 = vld [vmem:[%s4536_s19 + $0x30] ss:$8 sps:$4 sm:$0xff]  }
0x10f0   : > { %3573 = vmatprep.subr.bf16.mxu0 %v3779_v3 }
0x10f3   : > { %3574 = vmatpush3.bf16.msra.mxu0 %v3690_v51  ;;  %v3714_v51 = vld [vmem:[%s4536_s19 + $0x70] ss:$8 sps:$4 sm:$0xff]  }
0x10f4   : > { %3585 = vmatprep.subr.bf16.mxu0 %v3779_v3 }
0x1146   : > { %v2371_v21 = vpop.f32.mrb[40].mxu1 }
0x1147   : > { %v3557_v22 = vpop.f32.mrb[41].mxu1 }
0x1148   : > { %v2374_v0 = vpop.f32.mrb[42].mxu1 }
0x1149   : > { %v3558_v24 = vpop.f32.mrb[43].mxu1 }
0x11b9   : > { %v2316_v26 = vpop.f32.mrb[40].mxu0 }
0x11ba   : > { %v4343_v27 = vadd.f32 %v2371_v21, %v2316_v26  ;;  %v3549_v2 = vpop.f32.mrb[41].mxu0 }
0x11bb   : > { %v2319_v29 = vpop.f32.mrb[42].mxu0 }
0x11bc   : > { %v3550_v30 = vpop.f32.mrb[43].mxu0 }
0x11c1   : > { %v2421_v31 = vpop.f32.mrb[44].mxu0 }
0x11c2   : > { %v2427_v32 = vmul.f32 0.17677669, %v2421_v31  ;;  %v3563_v33 = vpop.f32.mrb[45].mxu0 }
0x11c3   : > { %v2424_v34 = vpop.f32.mrb[46].mxu0 }
0x11c4   : > { %v3564_v62 = vpop.f32.mrb[47].mxu0  ;;  %v2428_v35 = vadd.f32 %v4295_v28, %v2427_v32  ;;  %v3693_v34 = vld [vmem:[%s4536_s19] ss:$8 sps:$4 sm:$0xff]  }
0x11c5   : > { %v3695_v62 = vld [vmem:[%s4536_s19 + $0x4] ss:$8 sps:$4 sm:$0xff]  }
0x11c6   : > { %v2429_v36 = vsel %vm2088_vm5, %v2428_v35, -inf }
0x11c7   : > { %2430 = vmax.xlane.f32.xlu0 %v2429_v36  ;;  %v3701_v36 = vld [vmem:[%s4536_s19 + $0x24] ss:$8 sps:$4 sm:$0xff]  }
0x11dd   : > { %2441 = vrot.lane.b32.xlu0 %v4266_v14, %s4568_s1 }
0x11e1   : > { %2548 = vrot.lane.b32.xlu0 %v4278_v23, %s4569_s29 }
0x1254   : > { %v2431_v37 = vpop.xlane.xlu0 %2430 }
0x1255   : > { %v2432_v38 = vsub.f32 %v2428_v35, %v2431_v37  ;;  %v3698_v35 = vld [vmem:[%s4536_s19 + $0x14] ss:$8 sps:$4 sm:$0xff]   ;;  %v3699_v37 = vld [vmem:[%s4536_s19 + $0x20] ss:$8 sps:$4 sm:$0xff]  }
0x1257   : > { %v2433_v39 = vmul.f32 1.442695, %v2432_v38 }
0x1258   : > { %v2442_v40 = vpop.permute.xlu0 %2441 }
0x1259   : > { %3761 = vpow2.f32 %v2433_v39  ;;  %3566 = vmatpush3.bf16.msra.mxu1 %v2442_v40 }
0x125a   : > { %3579 = vmatprep.subr.bf16.mxu1 %v3779_v3 }
0x1263   : > { %v3762_v41 = vpop.eup %3761 }
0x1264   : > { %v2435_v42 = vsel %vm2088_vm5, %v3762_v41, 0.0 }
0x1265   : > { %2436 = vadd.xlane.f32.xlu1 %v2435_v42  ;;  %v3704_v42 = vld [vmem:[%s4536_s19 + $0x34] ss:$8 sps:$4 sm:$0xff]  }
0x1276   : > { %2550 = vrot.lane.b32.xlu1 %v4264_v13, %s4569_s29  ;;  %v2549_v13 = vpop.permute.xlu0 %2548 }
0x12f2   : > { %v2437_v23 = vpop.xlane.xlu1 %2436 }
0x12f3   : > { %3763 = vrcp.f32 %v2437_v23  ;;  %v3707_v23 = vld [vmem:[%s4536_s19 + $0x44] ss:$8 sps:$4 sm:$0xff]  }
0x12f6   : > { %v2551_v48 = vpop.permute.xlu1 %2550 }
0x12f7   : > { %v2556_v50 = vsel %vm1041_vm2, %v2551_v48, 0  ;;  %v3708_v48 = vld [vmem:[%s4536_s19 + $0x50] ss:$8 sps:$4 sm:$0xff]  }
0x12fd   : > { %v3764_v44 = vpop.eup %3763 }
0x12fe   : > { %v2439_v47 = vmul.f32 %v3764_v44, %v3762_v41  ;;  %v3705_v44 = vld [vmem:[%s4536_s19 + $0x40] ss:$8 sps:$4 sm:$0xff]  }
0x1300   : > { %v2440_v49 = vpack.c.bf16 %v2439_v47, %v2439_v47  ;;  %v3710_v47 = vld [vmem:[%s4536_s19 + $0x54] ss:$8 sps:$4 sm:$0xff]  }
0x1302   : > { %3568 = vmatmul.mubr.msk.bf16.vlgmr.msra.gmra.mrb[44].mxu1 %vm2088_vm5, %v2440_v49  ;;  %v3713_v49 = vld [vmem:[%s4536_s19 + $0x64] ss:$8 sps:$4 sm:$0xff]  }
0x1303   : > { %3580 = vmatpush3.bf16.xpose.msra.mxu1 %v2556_v50  ;;  %3581 = vmatprep.mubr.msk.bf16.mxu1 %vm3781_vm0, %v3779_v3  ;;  %v3711_v50 = vld [vmem:[%s4536_s19 + $0x60] ss:$8 sps:$4 sm:$0xff]  }
0x1304   : > { %3591 = vmatprep.subr.bf16.mxu1 %v3779_v3 }
0x130a   : > { %3582 = vmatmul.mubr.msk.bf16.vlgmr.msra.gmra.mrb[48].mxu1 %vm1041_vm2, %v2549_v13  ;;  %v3716_v13 = vld [vmem:[%s4536_s19 + $0x74] ss:$8 sps:$4 sm:$0xff]  }
0x130b   : > { %3595 = vmatprep.mubr.msk.bf16.mxu1 %vm3781_vm0, %v3779_v3  ;;  %3592 = vmatpush3.bf16.msra.mxu1 %v3691_v8 }
0x130c   : > { %3593 = vmatprep.subr.bf16.mxu1 %v3779_v3 }
0x13d5   : > { %v2481_v52 = vpop.f32.mrb[44].mxu1 }
0x13d6   : > { %v2487_v53 = vpack.c.bf16 %v2481_v52, %v2481_v52  ;;  %v3569_v54 = vpop.f32.mrb[45].mxu1  ;;  %v3717_v52 = vld [vmem:[%s4538_s21 + $0x40] sm:$0xff]  }
0x13d7   : > { %v2484_v55 = vpop.f32.mrb[46].mxu1  ;;  %v3719_v54 = vld [vmem:[%s4538_s21 + $0x48] sm:$0xff]  }
0x13d8   : > { %v3570_v56 = vpop.f32.mrb[47].mxu1  ;;  %3576 = vmatmul.mubr.msk.bf16.vlgmr.msra.gmra.mrb[48].mxu0 %vm1041_vm2, %v2487_v53  ;;  %v3718_v53 = vld [vmem:[%s4538_s21] sm:$0xff]   ;;  %v3720_v55 = vld [vmem:[%s4538_s21 + $0x8] sm:$0xff]  }
0x13d9   : > { %3587 = vmatprep.mubr.msk.bf16.mxu0 %vm3781_vm0, %v3779_v3  ;;  %v3692_v3 = vld [vmem:[%s4532_s15 + $0x38] sm:$0xff]   ;;  %v3721_v56 = vld [vmem:[%s4538_s21 + $0x50] sm:$0xff]  }
0x13da   : > { %3594 = vmatpush3.bf16.msra.mxu1 %v3692_v3 }
0x13db   : > { %3377 = vmatprep.subr.bf16.mxu1 %v3717_v52 }
0x13dd   : > { %v2592_v9 = vpop.f32.mrb[48].mxu1 }
0x13de   : > { %v2598_v58 = vmul.f32 0.17677669, %v2592_v9  ;;  %v3583_v57 = vpop.f32.mrb[49].mxu1  ;;  %v3722_v9 = vld [vmem:[%s4538_s21 + $0x10] sm:$0xff]  }
0x13df   : > { %v2595_v59 = vpop.f32.mrb[50].mxu1  ;;  %v3724_v57 = vld [vmem:[%s4538_s21 + $0x18] sm:$0xff]  }
0x13e0   : > { %v3584_v60 = vpop.f32.mrb[51].mxu1  ;;  %v2599_v61 = vadd.f32 %v4295_v28, %v2598_v58  ;;  %v3723_v58 = vld [vmem:[%s4538_s21 + $0x58] sm:$0xff]   ;;  %v3725_v59 = vld [vmem:[%s4538_s21 + $0x60] sm:$0xff]  }
0x13e1   : > { %v3726_v60 = vld [vmem:[%s4538_s21 + $0x20] sm:$0xff]  }
0x13e2   : > { %v2600_v63 = vsel %vm2088_vm5, %v2599_v61, -inf }
0x13e3   : > { %2601 = vmax.xlane.f32.xlu1 %v2600_v63  ;;  %v3728_v63 = vld [vmem:[%s4538_s21 + $0x28] sm:$0xff]  }
0x1470   : > { %v2602_v1 = vpop.xlane.xlu1 %2601 }
0x1471   : > { %v2603_v4 = vsub.f32 %v2599_v61, %v2602_v1  ;;  %v3727_v61 = vld [vmem:[%s4538_s21 + $0x68] sm:$0xff]  }
0x1473   : > { %v2604_v5 = vmul.f32 1.442695, %v2603_v4 }
0x1475   : > { %3765 = vpow2.f32 %v2604_v5 }
0x147f   : > { %v3766_v6 = vpop.eup %3765 }
0x1480   : > { %v2606_v7 = vsel %vm2088_vm5, %v3766_v6, 0.0 }
0x1481   : > { %2607 = vadd.xlane.f32.xlu0 %v2606_v7  ;;  %v3265_v7 = vld [vmem:[%s4534_s17] ss:$0 sm:$0xff] }
0x1497   : > { %2612 = vrot.lane.b32.xlu0 %v4266_v14, %s4569_s29 }
0x14ab   : > { %v2541_v28 = vpop.f32.mrb[48].mxu0 }
0x14ac   : > { %v2547_v10 = vadd.f32 %v2541_v28, %v4343_v27  ;;  %v3577_v11 = vpop.f32.mrb[49].mxu0  ;;  %v3266_v28 = vld [vmem:[%s4535_s18] ss:$0 sm:$0xff] }
0x14ad   : > { %v2544_v12 = vpop.f32.mrb[50].mxu0 }
0x14ae   : > { %v3578_v15 = vpop.f32.mrb[51].mxu0 }
0x14af   : > { %v3729_v15 = vld [vmem:[%s4538_s21 + $0x70] sm:$0xff]  }
0x150e   : > { %v2608_v16 = vpop.xlane.xlu0 %2607 }
0x150f   : > { %3767 = vrcp.f32 %v2608_v16  ;;  %v3730_v16 = vld [vmem:[%s4538_s21 + $0x30] sm:$0xff]  }
0x1512   : > { %v2613_v17 = vpop.permute.xlu0 %2612 }
0x1513   : > { %3586 = vmatpush3.bf16.msra.mxu0 %v2613_v17  ;;  %v3731_v17 = vld [vmem:[%s4538_s21 + $0x78] sm:$0xff]  }
0x1514   : > { %2864 = vmatprep.subr.bf16.mxu0 %v3695_v62 }
0x1519   : > { %v3768_v18 = vpop.eup %3767 }
0x151a   : > { %v2610_v19 = vmul.f32 %v3768_v18, %v3766_v6  ;;  %v3732_v18 = vld [vmem:[%s4538_s21 + $0x38] sm:$0xff]  }
0x151c   : > { %v2611_v14 = vpack.c.bf16 %v2610_v19, %v2610_v19  ;;  %v2772_v19 = vld [vmem:[%s4537_s20] sm:$0x3] }
0x151d   : > { %v2781_v3 = vrot.slane %v2772_v19, %v4023_v45 }
0x151e   : > { %3588 = vmatmul.mubr.msk.bf16.vlgmr.msra.gmra.mrb[52].mxu0 %vm2088_vm5, %v2611_v14  ;;  %v2777_v14 = vrot.slane %v2772_v19, %v4025_v46  ;;  %v3283_v46 = vld [vmem:[%s4539_s22] ss:$0 sm:$0xff] }
0x151f   : > { %2896 = vmatprep.mubr.bf16.mxu0 %v3780_v25  ;;  %v3264_v25 = vld [vmem:[%s4533_s16] ss:$0 sm:$0xff]  ;;  %2865 = vmatpush1.bf16.msra.mxu0 %v3693_v34 }
0x1520   : > { %2866 = vmatprep.subr.bf16.mxu0 %v3698_v35 }
0x15f1   : > { %v2652_v21 = vpop.f32.mrb[52].mxu0 }
0x15f2   : > { %v2658_v22 = vpack.c.bf16 %v2652_v21, %v2652_v21  ;;  %v3589_v0 = vpop.f32.mrb[53].mxu0 }
0x15f3   : > { %v2655_v24 = vpop.f32.mrb[54].mxu0 }
0x15f4   : > { %v3590_v26 = vpop.f32.mrb[55].mxu0  ;;  %3596 = vmatmul.mubr.msk.bf16.vlgmr.msra.gmra.mrb[52].mxu1 %vm1041_vm2, %v2658_v22 }
0x15f5   : > { %3378 = vmatpush3.bf16.msra.mxu1 %v3718_v53 }
0x15f6   : > { %3379 = vmatprep.subr.bf16.mxu1 %v3719_v54 }
0x15f9   : > { %3380 = vmatpush3.bf16.msra.mxu1 %v3720_v55 }
0x15fa   : > { %3381 = vmatprep.subr.bf16.mxu1 %v3721_v56 }
0x15fd   : > { %3382 = vmatpush3.bf16.msra.mxu1 %v3722_v9 }
0x15fe   : > { %3383 = vmatprep.subr.bf16.mxu1 %v3723_v58 }
0x1601   : > { %3384 = vmatpush3.bf16.msra.mxu1 %v3724_v57 }
0x1602   : > { %3385 = vmatprep.subr.bf16.mxu1 %v3725_v59 }
0x1605   : > { %3386 = vmatpush3.bf16.msra.mxu1 %v3726_v60 }
0x1606   : > { %3387 = vmatprep.subr.bf16.mxu1 %v3727_v61 }
0x1609   : > { %3388 = vmatpush3.bf16.msra.mxu1 %v3728_v63 }
0x160a   : > { %3389 = vmatprep.subr.bf16.mxu1 %v3729_v15 }
0x160d   : > { %3390 = vmatpush3.bf16.msra.mxu1 %v3730_v16 }
0x160e   : > { %3391 = vmatprep.subr.bf16.mxu1 %v3731_v17 }
0x1611   : > { %3392 = vmatpush3.bf16.msra.mxu1 %v3732_v18 }
0x16c7   : > { %v2712_v27 = vpop.f32.mrb[52].mxu1 }
0x16c8   : > { %v2718_v2 = vadd.f32 %v2712_v27, %v2547_v10  ;;  %v3597_v29 = vpop.f32.mrb[53].mxu1 }
0x16c9   : > { %v2715_v30 = vpop.f32.mrb[54].mxu1 }
0x16ca   : > { %v2719_v31 = vadd.f32 %v2718_v2, %v4160_v20  ;;  %v3598_v32 = vpop.f32.mrb[55].mxu1  ;;  %v3696_v20 = vld [vmem:[%s4536_s19 + $0x10] ss:$8 sps:$4 sm:$0xff]  }
0x16cb   : > { %2867 = vmatpush1.bf16.msra.mxu0 %v3696_v20 }
0x16cc   : > { %v4394_v33 = vadd.f32 %v3264_v25, %v2719_v31  ;;  %2868 = vmatprep.subr.bf16.mxu0 %v3701_v36 }
0x16ce   : > { %2730 = vadd.xlane.f32.xlu1 %v4394_v33 }
0x16cf   : > { %2869 = vmatpush1.bf16.msra.mxu0 %v3699_v37 }
0x16d0   : > { %2870 = vmatprep.subr.bf16.mxu0 %v3704_v42 }
0x16d3   : > { %2871 = vmatpush1.bf16.msra.mxu0 %v3702_v43 }
0x16d4   : > { %2872 = vmatprep.subr.bf16.mxu0 %v3707_v23 }
0x16d7   : > { %2873 = vmatpush1.bf16.msra.mxu0 %v3705_v44 }
0x16d8   : > { %2874 = vmatprep.subr.bf16.mxu0 %v3710_v47 }
0x16db   : > { %2875 = vmatpush1.bf16.msra.mxu0 %v3708_v48 }
0x16dc   : > { %2876 = vmatprep.subr.bf16.mxu0 %v3713_v49 }
0x16df   : > { %2877 = vmatpush1.bf16.msra.mxu0 %v3711_v50 }
0x16e0   : > { %2878 = vmatprep.subr.bf16.mxu0 %v3716_v13 }
0x16e3   : > { %2879 = vmatpush1.bf16.msra.mxu0 %v3714_v51 }
0x175b   : > { %v2731_v38 = vpop.xlane.xlu1 %2730 }
0x175c   : > { %v2732_v39 = vmul.f32 0.0078125, %v2731_v38 }
0x175e   : > { %v2733_v40 = vsub.f32 %v4394_v33, %v2732_v39 }
0x1760   : > { %v2734_v41 = vmul.f32 %v2733_v40, %v2733_v40 }
0x1762   : > { %2735 = vadd.xlane.f32.xlu1 %v2734_v41 }
0x17ef   : > { %v2736_v1 = vpop.xlane.xlu1 %2735 }
0x17f0   : > { %v2737_v4 = vmul.f32 0.0078125, %v2736_v1 }
0x17f2   : > { %v2738_v5 = vadd.f32 1e-05, %v2737_v4 }
0x17f4   : > { %3769 = vrsqrt.f32 %v2738_v5 }
0x17fe   : > { %v3770_v6 = vpop.eup %3769 }
0x17ff   : > { %v2740_v8 = vmul.f32 %v3770_v6, %v2733_v40 }
0x1801   : > { %v2747_v10 = vmul.f32 %v3265_v7, %v2740_v8 }
0x1803   : > { %v2754_v11 = vadd.f32 %v3266_v28, %v2747_v10 }
0x1805   : > { %v2755_v12 = vpack.c.bf16 %v2754_v11, %v2754_v11 }
0x1807   : > { %2897 = vmatmul.mubr.bf16.vlgmr.msra.gmra.mrb[56].mxu0 %v2755_v12 }
0x18da   : > { %v2898_v21 = vpop.f32.mrb[56].mxu0 }
0x18db   : > { %v2899_v22 = vadd.f32 %v2898_v21, %v2777_v14  ;;  %v2900_v0 = vpop.f32.mrb[57].mxu0 }
0x18dc   : > { %v2901_v24 = vadd.f32 %v2900_v0, %v2781_v3  ;;  %v2902_v26 = vpop.f32.mrb[58].mxu0 }
0x18dd   : > { %v2905_v27 = vmax.f32 %v2899_v22, 0.0  ;;  %v2903_v2 = vpop.f32.mrb[59].mxu0 }
0x18de   : > { %v2906_v29 = vmax.f32 %v2901_v24, 0.0 }
0x18df   : > { %v2907_v25 = vpack.c.bf16 %v2905_v27, %v2905_v27 }
0x18e0   : > { %v2908_v30 = vpack.c.bf16 %v2906_v29, %v2906_v29 }
0x18e2   : > { %3076 = vmatprep.mubr.bf16.mxu1 %v2908_v30 }
0x18e3   : > { %3077 = vmatmul.mubr.bf16.vlgmr.msra.gmra.mrb[56].mxu1 %v2907_v25 }
0x19b6   : > { %v3393_v31 = vpop.f32.mrb[56].mxu1 }
0x19b7   : > { %v3394_v32 = vpop.f32.mrb[57].mxu1 }
0x19b8   : > { %v3395_v45 = vadd.f32 %v3394_v32, %v3393_v31  ;;  %v3396_v34 = vpop.f32.mrb[58].mxu1 }
0x19b9   : > { %v3397_v62 = vpop.f32.mrb[59].mxu1 }
0x19ba   : > { %v3079_v35 = vadd.f32 %v3395_v45, %v3283_v46 }
0x19bc   : > { %v3084_v20 = vadd.f32 %v3079_v35, %v4394_v33 }
0x19be   : > { %3085 = vst [vmem:[%s739_s5] sm:$0xff] %v3084_v20 }
0x19bf PF: > { %s33_s4 = sadd.s32 1, %s3777_s4  }
0x19c0   : > { %p30_p4 = scmp.ge.s32.totalorder %s33_s4, 4  }
0x19c2   :  { %32 = sbr.rel (!%p30_p4) target bundleno = 9 (0x9), region = 148 }

// kernel: at_decoder_adapter_forward.3
= control target key start
LH: loop header
LB: loop body
LE: loop exit
PB: predicated region body
PF: predicated region fallthrough
CT: control target
= control target key end

     0   :  { %s5792_s0 = inlined_call_operand.vmem [shape: f32[2,8,128], index: 0, kind: input, shape index: {}]   ;;  %s5793_s1 = inlined_call_operand.vmem [shape: f32[2,16,128], index: 1, kind: input, shape index: {}]   ;;  %s5794_s2 = inlined_call_operand.vmem [shape: f32[2,1,16], index: 2, kind: input, shape index: {}]   ;;  %s5795_s3 = inlined_call_operand.hbm [shape: f32[1,128], index: 3, kind: input, shape index: {}]   ;;  %s5796_s4 = inlined_call_operand.hbm [shape: f32[1,128], index: 4, kind: input, shape index: {}]   ;;  %s5797_s5 = inlined_call_operand.hbm [shape: bf16[128,384], index: 5, kind: input, shape index: {}]   ;;  %s5798_s6 = inlined_call_operand.vmem [shape: f32[1,384], index: 6, kind: input, shape index: {}]   ;;  %s5799_s7 = inlined_call_operand.hbm [shape: bf16[128,128], index: 7, kind: input, shape index: {}]   ;;  %s5800_s8 = inlined_call_operand.hbm [shape: f32[1,128], index: 8, kind: input, shape index: {}]   ;;  %s5801_s9 = inlined_call_operand.hbm [shape: f32[1,128], index: 9, kind: input, shape index: {}]   ;;  %s5802_s10 = inlined_call_operand.hbm [shape: f32[1,128], index: 10, kind: input, shape index: {}]   ;;  %s5803_s11 = inlined_call_operand.hbm [shape: bf16[128,128], index: 11, kind: input, shape index: {}]   ;;  %s5804_s12 = inlined_call_operand.hbm [shape: f32[1,128], index: 12, kind: input, shape index: {}]   ;;  %s5805_s13 = inlined_call_operand.vmem [shape: bf16[128,256], index: 13, kind: input, shape index: {}]   ;;  %s5806_s14 = inlined_call_operand.vmem [shape: f32[1,256], index: 14, kind: input, shape index: {}]   ;;  %s5807_s15 = inlined_call_operand.hbm [shape: bf16[128,128], index: 15, kind: input, shape index: {}]   ;;  %s5808_s16 = inlined_call_operand.hbm [shape: f32[1,128], index: 16, kind: input, shape index: {}]   ;;  %s5809_s17 = inlined_call_operand.hbm [shape: f32[1,128], index: 17, kind: input, shape index: {}]   ;;  %s5810_s18 = inlined_call_operand.hbm [shape: f32[1,128], index: 18, kind: input, shape index: {}]   ;;  %s5811_s19 = inlined_call_operand.hbm [shape: bf16[128,256], index: 19, kind: input, shape index: {}]   ;;  %s5812_s20 = inlined_call_operand.hbm [shape: f32[1,256], index: 20, kind: input, shape index: {}]   ;;  %s5813_s21 = inlined_call_operand.hbm [shape: bf16[256,128], index: 21, kind: input, shape index: {}]   ;;  %s5814_s22 = inlined_call_operand.hbm [shape: f32[1,128], index: 22, kind: input, shape index: {}]   ;;  %s5815_s23 = inlined_call_operand.vmem [shape: f32[2,8,128], index: 23, kind: output, shape index: {}]  }
   0x1   :  { %5829 = sst [smem:[#allocation39_spill]] %s5792_s0 }
   0x2   :  { %5830 = sst [smem:[#allocation40_spill]] %s5793_s1 }
   0x3   :  { %5831 = sst [smem:[#allocation41_spill]] %s5794_s2 }
   0x4   :  { %5832 = sst [smem:[#allocation42_spill]] %s5795_s3 }
   0x5   :  { %5833 = sst [smem:[#allocation43_spill]] %s5796_s4 }
   0x6   :  { %5834 = sst [smem:[#allocation44_spill]] %s5797_s5 }
   0x7   :  { %5835 = sst [smem:[#allocation45_spill]] %s5798_s6 }
   0x8   :  { %5836 = sst [smem:[#allocation46_spill]] %s5799_s7 }
   0x9   :  { %5837 = sst [smem:[#allocation47_spill]] %s5801_s9 }
   0xa   :  { %5838 = sst [smem:[#allocation48_spill]] %s5803_s11 }
   0xb   :  { %5839 = sst [smem:[#allocation49_spill]] %s5805_s13 }
   0xc   :  { %5840 = sst [smem:[#allocation50_spill]] %s5806_s14 }
   0xd   :  { %5841 = sst [smem:[#allocation51_spill]] %s5807_s15 }
   0xe   :  { %5842 = sst [smem:[#allocation52_spill]] %s5815_s23 }
   0xf   :  { %28 = vsyncpa [#allocation3], 0 }
  0x10   :  { %29 = vsyncpa [#allocation5], 0 }
  0x11   :  { %30 = vsyncpa [#allocation8], 0 }
  0x12   :  { %31 = vsyncpa [#allocation11], 0 }
  0x13   :  { %32 = vsyncpa [#allocation14], 0 }
  0x14   :  { %33 = vsyncpa [#allocation17], 0 }
  0x15   :  { %34 = vsyncpa [#allocation20], 0 }
  0x16   :  { %35 = vsyncpa [#allocation23], 0 }
  0x17   :  { %36 = vsyncpa [#allocation26], 0  ;;  %s5040_s4 = smov 0  }
  0x18 LB: > { %5843 = sst [smem:[#allocation37_spill]] %s4889_s4  ;;  %s4891_s30 = smov [#allocation4]   ;;  %s4889_s4 = sphi %s5040_s4, %s42_s4  }
  0x19   : > { %s595_s24 = sshll.u32 %s4891_s30, 4  ;;  %s5046_s25 = sadd.s32 4294967295, %s4889_s4   ;;  %s5051_s24 = int_to_ptr.vmem [resolvable:$true] %s595_s24 }
  0x1a   : > { %5844 = sst [smem:[#allocation38_spill]] %s5046_s25  ;;  %p3551_p0 = scmp.ge.s32.totalorder %s4889_s4, 1 }
  0x1b   : > { %p571_p1 = scmp.lt.s32.totalorder %s4889_s4, 3  ;;  %p5825_p2 = scmp.eq.s32.totalorder %s5046_s25, 0 }
  0x1c   : > { %s4892_s1 = smov [#allocation7]   ;;  %s4893_s6 = smov [#allocation10]  }
  0x1d   : > { %p5053_p3 = pnand %p3551_p0, %p571_p1  ;;  %s621_s26 = sshll.u32 %s4892_s1, 4  ;;  %s5059_s26 = int_to_ptr.vmem [resolvable:$true] %s621_s26 }
  0x1e   : > { %s646_s27 = sshll.u32 %s4893_s6, 4  ;;  %s4894_s7 = smov [#allocation13]   ;;  %s5067_s27 = int_to_ptr.vmem [resolvable:$true] %s646_s27 }
  0x1f   : > { %s5845_s5 = scalar_select %p5053_p3, 1, 0 }
  0x20   : > { %p4090_p4 = pneg %p5053_p3  ;;  %s5069_s28 = sshll.u32 %s4894_s7, 4  ;;  %s668_s28 = int_to_ptr.vmem [resolvable:$true] %s5069_s28 }
  0x21   : > { %s5847_s0 = sld [smem:[#allocation43_spill]] }
  0x22   : > { %p5063_p5 = pnand %p5825_p2, %p4090_p4 }
  0x24   : > { %p5079_p7 = pneg %p5063_p5 }
  0x27   : > { %s4371_s30 = scalar_lea.hbm %s5847_s0, 16 }
  0x28   : > { %p4372_p6 = scmp.ne.s32.totalorder %s5847_s0, %s4371_s30  ;;  %p4378_p10 = scmp.lt.u32.totalorder %s4371_s30, %s5847_s0 }
  0x2a   : > { %p4374_p8 = pnand %p5079_p7, %p4372_p6 }
  0x2c   : > { %p4375_p9 = pneg %p4374_p8 }
  0x2e   : > { %p4380_p11 = pnand %p4378_p10, %p4375_p9 }
  0x30   : > { %4383 = shalt.err (!%p4380_p11)
}
  0x31   : > { %s4384_s4 = scalar_lea.vmem %s5051_s24, 16  ;;  %s4391_s29 = scalar_lea.vmem %s5051_s24, 32 }
  0x32   : > { %p4385_p12 = scmp.ne.s32.totalorder %s5051_s24, %s4384_s4  ;;  %p4392_p1 = scmp.lt.s32.totalorder %s5051_s24, %s5051_s24 }
  0x33   : > { %p4393_p4 = scmp.lt.s32.totalorder %s4391_s29, %s4384_s4 }
  0x34   : > { %p4387_p13 = pnand %p4385_p12, %p5079_p7 }
  0x35   : > { %p4394_p6 = por %p4393_p4, %p4392_p1 }
  0x36   : > { %p4388_p0 = pneg %p4387_p13 }
  0x38   : > { %p4395_p8 = pnand %p4394_p6, %p4388_p0 }
  0x3a   : > { %4398 = shalt.err (!%p4395_p8)
}
  0x3b   : > { %4096 = dma.hbm_to_vmem [thread:$0]  (!%p5063_p5), %s5847_s0, 16, %s5051_s24, [#allocation5]  }
  0x3c   : > { %s5849_s7 = sld [smem:[#allocation46_spill]] }
  0x42   : > { %s4399_s14 = scalar_lea.hbm %s5849_s7, 1024 }
  0x43   : > { %p4400_p9 = scmp.ne.s32.totalorder %s5849_s7, %s4399_s14  ;;  %p4406_p12 = scmp.lt.u32.totalorder %s4399_s14, %s5849_s7 }
  0x45   : > { %p4402_p10 = pnand %p4400_p9, %p5079_p7 }
  0x47   : > { %p4403_p11 = pneg %p4402_p10 }
  0x49   : > { %p4408_p13 = pnand %p4406_p12, %p4403_p11 }
  0x4b   : > { %4411 = shalt.err (!%p4408_p13)
}
  0x4c   : > { %s4412_s24 = scalar_lea.vmem %s5059_s26, 1024  ;;  %p4420_p6 = scmp.lt.s32.totalorder %s5059_s26, %s5059_s26 }
  0x4d   : > { %p4413_p0 = scmp.ne.s32.totalorder %s5059_s26, %s4412_s24  ;;  %p4421_p8 = scmp.lt.s32.totalorder %s4412_s24, %s4412_s24 }
  0x4f   : > { %p4415_p1 = pnand %p4413_p0, %p5079_p7  ;;  %p4422_p9 = por %p4421_p8, %p4420_p6 }
  0x51   : > { %p4416_p4 = pneg %p4415_p1 }
  0x53   : > { %p4423_p10 = pnand %p4422_p9, %p4416_p4 }
  0x55   : > { %4426 = shalt.err (!%p4423_p10)
}
  0x56   : > { %s5828_s13 = smov 64   ;;  %s4896_s14 = smov 4  }
  0x57   : > { %4102 = dma.hbm_to_vmem [thread:$0]  (!%p5063_p5), %s5849_s7, 1024, %s5059_s26, [#allocation8], %s5828_s13, %s5828_s13, %s4896_s14  }
  0x58   : > { %s5850_s9 = sld [smem:[#allocation47_spill]] }
  0x5e   : > { %s4427_s6 = scalar_lea.hbm %s5850_s9, 16 }
  0x5f   : > { %p4428_p11 = scmp.ne.s32.totalorder %s5850_s9, %s4427_s6  ;;  %p4434_p0 = scmp.lt.u32.totalorder %s4427_s6, %s5850_s9 }
  0x61   : > { %p4430_p12 = pnand %p4428_p11, %p5079_p7 }
  0x63   : > { %p4431_p13 = pneg %p4430_p12 }
  0x65   : > { %p4436_p1 = pnand %p4434_p0, %p4431_p13 }
  0x67   : > { %4439 = shalt.err (!%p4436_p1)
}
  0x68   : > { %s4440_s26 = scalar_lea.vmem %s5067_s27, 16  ;;  %s4447_s25 = scalar_lea.vmem %s5067_s27, 32 }
  0x69   : > { %p4441_p4 = scmp.ne.s32.totalorder %s5067_s27, %s4440_s26  ;;  %p4448_p9 = scmp.lt.s32.totalorder %s5067_s27, %s5067_s27 }
  0x6a   : > { %p4449_p10 = scmp.lt.s32.totalorder %s4447_s25, %s4440_s26 }
  0x6b   : > { %p4443_p6 = pnand %p4441_p4, %p5079_p7 }
  0x6c   : > { %p4450_p11 = por %p4449_p10, %p4448_p9 }
  0x6d   : > { %p4444_p8 = pneg %p4443_p6 }
  0x6f   : > { %p4451_p12 = pnand %p4450_p11, %p4444_p8 }
  0x71   : > { %4454 = shalt.err (!%p4451_p12)
}
  0x72   : > { %4108 = dma.hbm_to_vmem [thread:$0]  (!%p5063_p5), %s5850_s9, 16, %s5067_s27, [#allocation11]  }
  0x73   : > { %s5851_s11 = sld [smem:[#allocation48_spill]] }
  0x79   : > { %s4455_s6 = scalar_lea.hbm %s5851_s11, 1024 }
  0x7a   : > { %p4456_p13 = scmp.ne.s32.totalorder %s5851_s11, %s4455_s6  ;;  %p4462_p4 = scmp.lt.u32.totalorder %s4455_s6, %s5851_s11 }
  0x7c   : > { %p4458_p0 = pnand %p4456_p13, %p5079_p7 }
  0x7e   : > { %p4459_p1 = pneg %p4458_p0 }
  0x80   : > { %p4464_p6 = pnand %p4462_p4, %p4459_p1 }
  0x82   : > { %4467 = shalt.err (!%p4464_p6)
}
  0x83   : > { %s4468_s25 = scalar_lea.vmem %s668_s28, 1024  ;;  %p4476_p11 = scmp.lt.s32.totalorder %s668_s28, %s668_s28 }
  0x84   : > { %p4469_p8 = scmp.ne.s32.totalorder %s668_s28, %s4468_s25  ;;  %p4477_p12 = scmp.lt.s32.totalorder %s4468_s25, %s4468_s25 }
  0x86   : > { %p4471_p9 = pnand %p4469_p8, %p5079_p7  ;;  %p4478_p2 = por %p4477_p12, %p4476_p11 }
  0x88   : > { %p4472_p10 = pneg %p4471_p9 }
  0x8a   : > { %p4479_p3 = pnand %p4478_p2, %p4472_p10 }
  0x8c   : > { %4482 = shalt.err (!%p4479_p3)
}
  0x8d   : > { %4114 = dma.hbm_to_vmem [thread:$0]  (!%p5063_p5), %s5851_s11, 1024, %s668_s28, [#allocation14], %s5828_s13, %s5828_s13, %s4896_s14  }
  0x8e   : > { %s4897_s3 = smov [#allocation16]   ;;  %s4898_s1 = smov [#allocation19]  }
  0x8f   : > { %s697_s30 = sshll.u32 %s4897_s3, 4  ;;  %s722_s6 = sshll.u32 %s4898_s1, 4  ;;  %s698_s30 = int_to_ptr.vmem [resolvable:$true] %s697_s30  ;;  %s723_s6 = int_to_ptr.vmem [resolvable:$true] %s722_s6 }
  0x90   : > { %s5852_s15 = sld [smem:[#allocation51_spill]] }
  0x96   : > { %s4483_s24 = scalar_lea.hbm %s5852_s15, 1024 }
  0x97   : > { %p4484_p2 = scmp.ne.s32.totalorder %s5852_s15, %s4483_s24  ;;  %p4490_p0 = scmp.lt.u32.totalorder %s4483_s24, %s5852_s15 }
  0x99   : > { %p4486_p3 = pnand %p4484_p2, %p5079_p7 }
  0x9b   : > { %p4487_p13 = pneg %p4486_p3 }
  0x9d   : > { %p4492_p1 = pnand %p4490_p0, %p4487_p13 }
  0x9f   : > { %4495 = shalt.err (!%p4492_p1)
}
  0xa0   : > { %s4496_s28 = scalar_lea.vmem %s698_s30, 1024  ;;  %p4504_p9 = scmp.lt.s32.totalorder %s698_s30, %s698_s30 }
  0xa1   : > { %p4497_p4 = scmp.ne.s32.totalorder %s698_s30, %s4496_s28  ;;  %p4505_p10 = scmp.lt.s32.totalorder %s4496_s28, %s4496_s28 }
  0xa3   : > { %p4499_p6 = pnand %p4497_p4, %p5079_p7  ;;  %p4506_p11 = por %p4505_p10, %p4504_p9 }
  0xa5   : > { %p4500_p8 = pneg %p4499_p6 }
  0xa7   : > { %p4507_p12 = pnand %p4506_p11, %p4500_p8 }
  0xa9   : > { %4510 = shalt.err (!%p4507_p12)
}
  0xaa   : > { %4120 = dma.hbm_to_vmem [thread:$0]  (!%p5063_p5), %s5852_s15, 1024, %s698_s30, [#allocation17], %s5828_s13, %s5828_s13, %s4896_s14  }
  0xab   : > { %s4511_s4 = scalar_lea.hbm %s5809_s17, 16 }
  0xac   : > { %p4512_p2 = scmp.ne.s32.totalorder %s5809_s17, %s4511_s4  ;;  %p4518_p0 = scmp.lt.u32.totalorder %s4511_s4, %s5809_s17 }
  0xae   : > { %p4514_p3 = pnand %p4512_p2, %p5079_p7 }
  0xb0   : > { %p4515_p13 = pneg %p4514_p3 }
  0xb2   : > { %p4520_p1 = pnand %p4518_p0, %p4515_p13 }
  0xb4   : > { %4523 = shalt.err (!%p4520_p1)
}
  0xb5   : > { %s4524_s27 = scalar_lea.vmem %s723_s6, 16  ;;  %s4531_s30 = scalar_lea.vmem %s723_s6, 32 }
  0xb6   : > { %p4525_p4 = scmp.ne.s32.totalorder %s723_s6, %s4524_s27  ;;  %p4532_p9 = scmp.lt.s32.totalorder %s723_s6, %s723_s6 }
  0xb7   : > { %p4533_p10 = scmp.lt.s32.totalorder %s4531_s30, %s4524_s27 }
  0xb8   : > { %p4527_p6 = pnand %p4525_p4, %p5079_p7 }
  0xb9   : > { %p4534_p11 = por %p4533_p10, %p4532_p9 }
  0xba   : > { %p4528_p8 = pneg %p4527_p6 }
  0xbc   : > { %p4535_p12 = pnand %p4534_p11, %p4528_p8 }
  0xbe   : > { %4538 = shalt.err (!%p4535_p12)
}
  0xbf   : > { %4126 = dma.hbm_to_vmem [thread:$0]  (!%p5063_p5), %s5809_s17, 16, %s723_s6, [#allocation20]  }
  0xc0   : > { %s4899_s0 = smov [#allocation22]   ;;  %s4539_s29 = scalar_lea.hbm %s5811_s19, 2048 }
  0xc1   : > { %s743_s3 = sshll.u32 %s4899_s0, 4  ;;  %p4540_p2 = scmp.ne.s32.totalorder %s5811_s19, %s4539_s29  ;;  %s744_s3 = int_to_ptr.vmem [resolvable:$true] %s743_s3 }
  0xc2   : > { %p4546_p0 = scmp.lt.u32.totalorder %s4539_s29, %s5811_s19 }
  0xc3   : > { %p4542_p3 = pnand %p4540_p2, %p5079_p7 }
  0xc5   : > { %p4543_p13 = pneg %p4542_p3 }
  0xc7   : > { %p4548_p1 = pnand %p4546_p0, %p4543_p13 }
  0xc9   : > { %4551 = shalt.err (!%p4548_p1)
}
  0xca   : > { %s4552_s6 = scalar_lea.vmem %s744_s3, 2048  ;;  %p4560_p9 = scmp.lt.s32.totalorder %s744_s3, %s744_s3 }
  0xcb   : > { %p4553_p4 = scmp.ne.s32.totalorder %s744_s3, %s4552_s6  ;;  %p4561_p10 = scmp.lt.s32.totalorder %s4552_s6, %s4552_s6 }
  0xcd   : > { %p4555_p6 = pnand %p4553_p4, %p5079_p7  ;;  %p4562_p11 = por %p4561_p10, %p4560_p9 }
  0xcf   : > { %p4556_p8 = pneg %p4555_p6 }
  0xd1   : > { %p4563_p12 = pnand %p4562_p11, %p4556_p8 }
  0xd3   : > { %4566 = shalt.err (!%p4563_p12)
}
  0xd4   : > { %s4900_s30 = smov 128   ;;  %s4901_s28 = smov 8  }
  0xd5   : > { %4132 = dma.hbm_to_vmem [thread:$0]  (!%p5063_p5), %s5811_s19, 2048, %s744_s3, [#allocation23], %s4900_s30, %s4900_s30, %s4901_s28  }
  0xd6   : > { %s4902_s1 = smov [#allocation25]   ;;  %s4903_s29 = smov [#allocation2]  }
  0xd7   : > { %s767_s4 = sshll.u32 %s4902_s1, 4  ;;  %s584_s24 = sshll.u32 %s4903_s29, 4  ;;  %s768_s4 = int_to_ptr.vmem [resolvable:$true] %s767_s4  ;;  %s5230_s24 = int_to_ptr.vmem [resolvable:$true] %s584_s24 }
  0xd8   : > { %s4567_s27 = scalar_lea.hbm %s5813_s21, 2048 }
  0xd9   : > { %p4568_p2 = scmp.ne.s32.totalorder %s5813_s21, %s4567_s27  ;;  %p4574_p0 = scmp.lt.u32.totalorder %s4567_s27, %s5813_s21 }
  0xdb   : > { %p4570_p3 = pnand %p4568_p2, %p5079_p7 }
  0xdd   : > { %p4571_p13 = pneg %p4570_p3 }
  0xdf   : > { %p4576_p1 = pnand %p4574_p0, %p4571_p13 }
  0xe1   : > { %4579 = shalt.err (!%p4576_p1)
}
  0xe2   : > { %s4580_s30 = scalar_lea.vmem %s768_s4, 2048  ;;  %p4588_p9 = scmp.lt.s32.totalorder %s768_s4, %s768_s4 }
  0xe3   : > { %p4581_p4 = scmp.ne.s32.totalorder %s768_s4, %s4580_s30  ;;  %p4589_p10 = scmp.lt.s32.totalorder %s4580_s30, %s4580_s30 }
  0xe5   : > { %p4583_p6 = pnand %p4581_p4, %p5079_p7  ;;  %p4590_p11 = por %p4589_p10, %p4588_p9 }
  0xe7   : > { %p4584_p8 = pneg %p4583_p6 }
  0xe9   : > { %p4591_p12 = pnand %p4590_p11, %p4584_p8 }
  0xeb   : > { %4594 = shalt.err (!%p4591_p12)
}
  0xec   : > { %s5853_s13 = smov 64   ;;  %s5854_s26 = sld [smem:[#allocation42_spill]] }
  0xed   : > { %4138 = dma.hbm_to_vmem [thread:$0]  (!%p5063_p5), %s5813_s21, 2048, %s768_s4, [#allocation26], %s5853_s13, %s5853_s13, %s4896_s14  }
  0xf2   : > { %s4595_s25 = scalar_lea.hbm %s5854_s26, 16 }
  0xf3   : > { %p4596_p2 = scmp.ne.s32.totalorder %s5854_s26, %s4595_s25  ;;  %p4602_p0 = scmp.lt.u32.totalorder %s4595_s25, %s5854_s26 }
  0xf5   : > { %p4598_p3 = pnand %p4596_p2, %p5079_p7 }
  0xf7   : > { %p4599_p13 = pneg %p4598_p3 }
  0xf9   : > { %p4604_p1 = pnand %p4602_p0, %p4599_p13 }
  0xfb   : > { %4607 = shalt.err (!%p4604_p1)
}
  0xfc   : > { %s4608_s14 = scalar_lea.vmem %s5230_s24, 16  ;;  %s4615_s4 = scalar_lea.vmem %s5230_s24, 32 }
  0xfd   : > { %p4609_p4 = scmp.ne.s32.totalorder %s5230_s24, %s4608_s14  ;;  %p4616_p9 = scmp.lt.s32.totalorder %s5230_s24, %s5230_s24 }
  0xfe   : > { %p4617_p10 = scmp.lt.s32.totalorder %s4615_s4, %s4608_s14 }
  0xff   : > { %p4611_p6 = pnand %p4609_p4, %p5079_p7 }
 0x100   : > { %p4618_p11 = por %p4617_p10, %p4616_p9 }
 0x101   : > { %p4612_p8 = pneg %p4611_p6 }
 0x103   : > { %p4619_p12 = pnand %p4618_p11, %p4612_p8 }
 0x105   : > { %4622 = shalt.err (!%p4619_p12)
}
 0x106   : > { %4093 = dma.hbm_to_vmem [thread:$0]  (!%p5063_p5), %s5854_s26, 16, %s5230_s24, [#allocation3]  }
 0x107   : > { %s4904_s28 = smov [#allocation6]   ;;  %s5855_s25 = sld [smem:[#allocation44_spill]] }
 0x108   : > { %s605_s0 = sshll.u32 %s4904_s28, 4  ;;  %s606_s0 = int_to_ptr.vmem [resolvable:$true] %s605_s0 }
 0x10d   : > { %s4623_s27 = scalar_lea.hbm %s5855_s25, 3072 }
 0x10e   : > { %p4624_p2 = scmp.ne.s32.totalorder %s5855_s25, %s4623_s27  ;;  %p4630_p0 = scmp.lt.u32.totalorder %s4623_s27, %s5855_s25 }
 0x110   : > { %p4626_p3 = pnand %p4624_p2, %p5079_p7 }
 0x112   : > { %p4627_p13 = pneg %p4626_p3 }
 0x114   : > { %p4632_p1 = pnand %p4630_p0, %p4627_p13 }
 0x116   : > { %4635 = shalt.err (!%p4632_p1)
}
 0x117   : > { %s4636_s24 = scalar_lea.vmem %s606_s0, 3072  ;;  %p4644_p9 = scmp.lt.s32.totalorder %s606_s0, %s606_s0 }
 0x118   : > { %p4637_p4 = scmp.ne.s32.totalorder %s606_s0, %s4636_s24  ;;  %p4645_p10 = scmp.lt.s32.totalorder %s4636_s24, %s4636_s24 }
 0x11a   : > { %p4639_p6 = pnand %p4637_p4, %p5079_p7  ;;  %p4646_p11 = por %p4645_p10, %p4644_p9 }
 0x11c   : > { %p4640_p8 = pneg %p4639_p6 }
 0x11e   : > { %p4647_p12 = pnand %p4646_p11, %p4640_p8 }
 0x120   : > { %4650 = shalt.err (!%p4647_p12)
}
 0x121   : > { %s4905_s4 = smov 192   ;;  %s4906_s30 = smov 12  }
 0x122   : > { %4099 = dma.hbm_to_vmem [thread:$0]  (!%p5063_p5), %s5855_s25, 3072, %s606_s0, [#allocation5], %s4905_s4, %s4905_s4, %s4906_s30  }
 0x123   : > { %s4907_s1 = smov [#allocation9]   ;;  %s4908_s27 = smov [#allocation12]  }
 0x124   : > { %s635_s29 = sshll.u32 %s4907_s1, 4  ;;  %s657_s6 = sshll.u32 %s4908_s27, 4  ;;  %s636_s29 = int_to_ptr.vmem [resolvable:$true] %s635_s29  ;;  %s658_s6 = int_to_ptr.vmem [resolvable:$true] %s657_s6 }
 0x125   : > { %s4651_s14 = scalar_lea.hbm %s5800_s8, 16 }
 0x126   : > { %p4652_p2 = scmp.ne.s32.totalorder %s5800_s8, %s4651_s14  ;;  %p4658_p0 = scmp.lt.u32.totalorder %s4651_s14, %s5800_s8 }
 0x128   : > { %p4654_p3 = pnand %p4652_p2, %p5079_p7 }
 0x12a   : > { %p4655_p13 = pneg %p4654_p3 }
 0x12c   : > { %p4660_p1 = pnand %p4658_p0, %p4655_p13 }
 0x12e   : > { %4663 = shalt.err (!%p4660_p1)
}
 0x12f   : > { %s4664_s0 = scalar_lea.vmem %s636_s29, 16  ;;  %s4671_s4 = scalar_lea.vmem %s636_s29, 32 }
 0x130   : > { %p4665_p4 = scmp.ne.s32.totalorder %s636_s29, %s4664_s0  ;;  %p4672_p9 = scmp.lt.s32.totalorder %s636_s29, %s636_s29 }
 0x131   : > { %p4673_p10 = scmp.lt.s32.totalorder %s4671_s4, %s4664_s0 }
 0x132   : > { %p4667_p6 = pnand %p4665_p4, %p5079_p7 }
 0x133   : > { %p4674_p11 = por %p4673_p10, %p4672_p9 }
 0x134   : > { %p4668_p8 = pneg %p4667_p6 }
 0x136   : > { %p4675_p12 = pnand %p4674_p11, %p4668_p8 }
 0x138   : > { %4678 = shalt.err (!%p4675_p12)
}
 0x139   : > { %4105 = dma.hbm_to_vmem [thread:$0]  (!%p5063_p5), %s5800_s8, 16, %s636_s29, [#allocation8]  }
 0x13a   : > { %s4679_s13 = scalar_lea.hbm %s5802_s10, 16 }
 0x13b   : > { %p4680_p2 = scmp.ne.s32.totalorder %s5802_s10, %s4679_s13  ;;  %p4686_p0 = scmp.lt.u32.totalorder %s4679_s13, %s5802_s10 }
 0x13d   : > { %p4682_p3 = pnand %p4680_p2, %p5079_p7 }
 0x13f   : > { %p4683_p13 = pneg %p4682_p3 }
 0x141   : > { %p4688_p1 = pnand %p4686_p0, %p4683_p13 }
 0x143   : > { %4691 = shalt.err (!%p4688_p1)
}
 0x144   : > { %s4692_s3 = scalar_lea.vmem %s658_s6, 16  ;;  %s4699_s29 = scalar_lea.vmem %s658_s6, 32 }
 0x145   : > { %p4693_p4 = scmp.ne.s32.totalorder %s658_s6, %s4692_s3  ;;  %p4700_p9 = scmp.lt.s32.totalorder %s658_s6, %s658_s6 }
 0x146   : > { %p4701_p10 = scmp.lt.s32.totalorder %s4699_s29, %s4692_s3 }
 0x147   : > { %p4695_p6 = pnand %p4693_p4, %p5079_p7 }
 0x148   : > { %p4702_p11 = por %p4701_p10, %p4700_p9 }
 0x149   : > { %p4696_p8 = pneg %p4695_p6 }
 0x14b   : > { %p4703_p12 = pnand %p4702_p11, %p4696_p8 }
 0x14d   : > { %4706 = shalt.err (!%p4703_p12)
}
 0x14e   : > { %4111 = dma.hbm_to_vmem [thread:$0]  (!%p5063_p5), %s5802_s10, 16, %s658_s6, [#allocation11]  }
 0x14f   : > { %s4909_s0 = smov [#allocation15]   ;;  %s4910_s9 = smov [#allocation18]  }
 0x150   : > { %s681_s4 = sshll.u32 %s4909_s0, 4  ;;  %s711_s30 = sshll.u32 %s4910_s9, 4  ;;  %s682_s4 = int_to_ptr.vmem [resolvable:$true] %s681_s4  ;;  %s712_s30 = int_to_ptr.vmem [resolvable:$true] %s711_s30 }
 0x151   : > { %s4707_s13 = scalar_lea.hbm %s5804_s12, 16 }
 0x152   : > { %p4708_p2 = scmp.ne.s32.totalorder %s5804_s12, %s4707_s13  ;;  %p4714_p0 = scmp.lt.u32.totalorder %s4707_s13, %s5804_s12 }
 0x154   : > { %p4710_p3 = pnand %p4708_p2, %p5079_p7 }
 0x156   : > { %p4711_p13 = pneg %p4710_p3 }
 0x158   : > { %p4716_p1 = pnand %p4714_p0, %p4711_p13 }
 0x15a   : > { %4719 = shalt.err (!%p4716_p1)
}
 0x15b   : > { %s4720_s6 = scalar_lea.vmem %s682_s4, 16  ;;  %s4727_s3 = scalar_lea.vmem %s682_s4, 32 }
 0x15c   : > { %p4721_p4 = scmp.ne.s32.totalorder %s682_s4, %s4720_s6  ;;  %p4728_p9 = scmp.lt.s32.totalorder %s682_s4, %s682_s4 }
 0x15d   : > { %p4729_p10 = scmp.lt.s32.totalorder %s4727_s3, %s4720_s6 }
 0x15e   : > { %p4723_p6 = pnand %p4721_p4, %p5079_p7 }
 0x15f   : > { %p4730_p11 = por %p4729_p10, %p4728_p9 }
 0x160   : > { %p4724_p8 = pneg %p4723_p6 }
 0x162   : > { %p4731_p12 = pnand %p4730_p11, %p4724_p8 }
 0x164   : > { %4734 = shalt.err (!%p4731_p12)
}
 0x165   : > { %4117 = dma.hbm_to_vmem [thread:$0]  (!%p5063_p5), %s5804_s12, 16, %s682_s4, [#allocation14]  }
 0x166   : > { %s4735_s9 = scalar_lea.hbm %s5808_s16, 16 }
 0x167   : > { %p4736_p2 = scmp.ne.s32.totalorder %s5808_s16, %s4735_s9  ;;  %p4742_p0 = scmp.lt.u32.totalorder %s4735_s9, %s5808_s16 }
 0x169   : > { %p4738_p3 = pnand %p4736_p2, %p5079_p7 }
 0x16b   : > { %p4739_p13 = pneg %p4738_p3 }
 0x16d   : > { %p4744_p1 = pnand %p4742_p0, %p4739_p13 }
 0x16f   : > { %4747 = shalt.err (!%p4744_p1)
}
 0x170   : > { %s4748_s1 = scalar_lea.vmem %s712_s30, 16  ;;  %s4755_s4 = scalar_lea.vmem %s712_s30, 32 }
 0x171   : > { %p4749_p4 = scmp.ne.s32.totalorder %s712_s30, %s4748_s1  ;;  %p4756_p9 = scmp.lt.s32.totalorder %s712_s30, %s712_s30 }
 0x172   : > { %p4757_p10 = scmp.lt.s32.totalorder %s4755_s4, %s4748_s1 }
 0x173   : > { %p4751_p6 = pnand %p4749_p4, %p5079_p7 }
 0x174   : > { %p4758_p11 = por %p4757_p10, %p4756_p9 }
 0x175   : > { %p4752_p8 = pneg %p4751_p6 }
 0x177   : > { %p4759_p12 = pnand %p4758_p11, %p4752_p8 }
 0x179   : > { %4762 = shalt.err (!%p4759_p12)
}
 0x17a   : > { %4123 = dma.hbm_to_vmem [thread:$0]  (!%p5063_p5), %s5808_s16, 16, %s712_s30, [#allocation17]  }
 0x17b   : > { %s4911_s6 = smov [#allocation21]   ;;  %s4912_s29 = smov [#allocation24]  }
 0x17c   : > { %s733_s3 = sshll.u32 %s4911_s6, 4  ;;  %s757_s14 = sshll.u32 %s4912_s29, 4  ;;  %s734_s3 = int_to_ptr.vmem [resolvable:$true] %s733_s3  ;;  %s758_s14 = int_to_ptr.vmem [resolvable:$true] %s757_s14 }
 0x17d   : > { %s4763_s9 = scalar_lea.hbm %s5810_s18, 16 }
 0x17e   : > { %p4764_p2 = scmp.ne.s32.totalorder %s5810_s18, %s4763_s9  ;;  %p4770_p0 = scmp.lt.u32.totalorder %s4763_s9, %s5810_s18 }
 0x180   : > { %p4766_p3 = pnand %p4764_p2, %p5079_p7 }
 0x182   : > { %p4767_p13 = pneg %p4766_p3 }
 0x184   : > { %p4772_p1 = pnand %p4770_p0, %p4767_p13 }
 0x186   : > { %4775 = shalt.err (!%p4772_p1)
}
 0x187   : > { %s4776_s30 = scalar_lea.vmem %s734_s3, 16  ;;  %s4783_s1 = scalar_lea.vmem %s734_s3, 32 }
 0x188   : > { %p4777_p4 = scmp.ne.s32.totalorder %s734_s3, %s4776_s30  ;;  %p4784_p9 = scmp.lt.s32.totalorder %s734_s3, %s734_s3 }
 0x189   : > { %p4785_p10 = scmp.lt.s32.totalorder %s4783_s1, %s4776_s30 }
 0x18a   : > { %p4779_p6 = pnand %p4777_p4, %p5079_p7 }
 0x18b   : > { %p4786_p11 = por %p4785_p10, %p4784_p9 }
 0x18c   : > { %p4780_p8 = pneg %p4779_p6 }
 0x18e   : > { %p4787_p12 = pnand %p4786_p11, %p4780_p8 }
 0x190   : > { %4790 = shalt.err (!%p4787_p12)
}
 0x191   : > { %4129 = dma.hbm_to_vmem [thread:$0]  (!%p5063_p5), %s5810_s18, 16, %s734_s3, [#allocation20]  }
 0x192   : > { %s4791_s29 = scalar_lea.hbm %s5812_s20, 32 }
 0x193   : > { %p4792_p2 = scmp.ne.s32.totalorder %s5812_s20, %s4791_s29  ;;  %p4798_p0 = scmp.lt.u32.totalorder %s4791_s29, %s5812_s20 }
 0x195   : > { %p4794_p3 = pnand %p4792_p2, %p5079_p7 }
 0x197   : > { %p4795_p13 = pneg %p4794_p3 }
 0x199   : > { %p4800_p1 = pnand %p4798_p0, %p4795_p13 }
 0x19b   : > { %4803 = shalt.err (!%p4800_p1)
}
 0x19c   : > { %s4804_s15 = scalar_lea.vmem %s758_s14, 32  ;;  %p4812_p9 = scmp.lt.s32.totalorder %s758_s14, %s758_s14 }
 0x19d   : > { %p4805_p4 = scmp.ne.s32.totalorder %s758_s14, %s4804_s15  ;;  %p4813_p10 = scmp.lt.s32.totalorder %s4804_s15, %s4804_s15 }
 0x19f   : > { %p4807_p6 = pnand %p4805_p4, %p5079_p7  ;;  %p4814_p11 = por %p4813_p10, %p4812_p9 }
 0x1a1   : > { %p4808_p8 = pneg %p4807_p6 }
 0x1a3   : > { %p4815_p12 = pnand %p4814_p11, %p4808_p8 }
 0x1a5   : > { %4818 = shalt.err (!%p4815_p12)
}
 0x1a6   : > { %4135 = dma.hbm_to_vmem [thread:$0]  (!%p5063_p5), %s5812_s20, 32, %s758_s14, [#allocation23]  }
 0x1a7   : > { %s4913_s28 = smov [#allocation27]   ;;  %s4819_s27 = scalar_lea.hbm %s5814_s22, 16 }
 0x1a8   : > { %s781_s30 = sshll.u32 %s4913_s28, 4  ;;  %p4820_p2 = scmp.ne.s32.totalorder %s5814_s22, %s4819_s27  ;;  %s782_s30 = int_to_ptr.vmem [resolvable:$true] %s781_s30 }
 0x1a9   : > { %p4826_p0 = scmp.lt.u32.totalorder %s4819_s27, %s5814_s22 }
 0x1aa   : > { %p4822_p3 = pnand %p4820_p2, %p5079_p7 }
 0x1ac   : > { %p4823_p13 = pneg %p4822_p3 }
 0x1ae   : > { %p4828_p1 = pnand %p4826_p0, %p4823_p13 }
 0x1b0   : > { %4831 = shalt.err (!%p4828_p1)
}
 0x1b1   : > { %s4832_s14 = scalar_lea.vmem %s782_s30, 16  ;;  %s4839_s0 = scalar_lea.vmem %s782_s30, 32 }
 0x1b2   : > { %p4833_p4 = scmp.ne.s32.totalorder %s782_s30, %s4832_s14  ;;  %p4840_p9 = scmp.lt.s32.totalorder %s782_s30, %s782_s30 }
 0x1b3   : > { %p4841_p10 = scmp.lt.s32.totalorder %s4839_s0, %s4832_s14 }
 0x1b4   : > { %p4835_p6 = pnand %p4833_p4, %p5079_p7 }
 0x1b5   : > { %p4842_p11 = por %p4841_p10, %p4840_p9 }
 0x1b6   : > { %p4836_p8 = pneg %p4835_p6 }
 0x1b8   : > { %p4843_p12 = pnand %p4842_p11, %p4836_p8 }
 0x1ba   : > { %4846 = shalt.err (!%p4843_p12)
}
 0x1bb   : > { %4141 = dma.hbm_to_vmem [thread:$0]  (!%p5063_p5), %s5814_s22, 16, %s782_s30, [#allocation26]  }
 0x1bc   : > { %p5856_p2 = scmp.ne.s32.totalorder %s5845_s5, 0 }
 0x1bd   : > { %s5857_s15 = sld [smem:[#allocation38_spill]] (!%p5856_p2) }
 0x1be   : > { %815 = sbr.rel (%p5856_p2) target bundleno = 7053 (0x1b8d), region = 112 }
 0x1c3   : > { %p5858_p3 = scmp.eq.s32.totalorder (!%p5856_p2), %s5857_s15, 0 }
 0x1c5   : > { %4852 = dma.done.wait (%p5858_p3), [#allocation3], 16   ;;  %p5859_p7 = pmov %p5858_p3 }
 0x1c6   : > { %p5860_p13 = pmov %p5858_p3 }
 0x1c7   : > { %4854 = vsyncadd (%p5859_p7), [#allocation3], 4294967280 }
 0x1c8   : > { %4856 = dma.done.wait (%p5860_p13), [#allocation5], 3088   ;;  %p5861_p0 = pmov %p5858_p3 }
 0x1ca   : > { %4858 = vsyncadd (%p5861_p0), [#allocation5], 4294964208  ;;  %p5862_p1 = pmov %p5861_p0 }
 0x1cb   : > { %p5863_p5 = pmov %p5861_p0 }
 0x1cc   : > { %4860 = dma.done.wait (%p5862_p1), [#allocation8], 1040  }
 0x1cd   : > { %4862 = vsyncadd (%p5863_p5), [#allocation8], 4294966256  ;;  %p5864_p4 = pmov %p5861_p0 }
 0x1ce   : > { %p5865_p6 = pmov %p5861_p0 }
 0x1cf   : > { %4864 = dma.done.wait (%p5864_p4), [#allocation11], 32  }
 0x1d0   : > { %4866 = vsyncadd (%p5865_p6), [#allocation11], 4294967264  ;;  %p5866_p8 = pmov %p5861_p0 }
 0x1d1   : > { %p5867_p9 = pmov %p5861_p0 }
 0x1d2   : > { %4868 = dma.done.wait (%p5866_p8), [#allocation14], 1040  }
 0x1d3   : > { %4870 = vsyncadd (%p5867_p9), [#allocation14], 4294966256  ;;  %p5868_p10 = pmov %p5861_p0 }
 0x1d4   : > { %p5869_p11 = pmov %p5861_p0 }
 0x1d5   : > { %4872 = dma.done.wait (%p5868_p10), [#allocation17], 1040  }
 0x1d6   : > { %4874 = vsyncadd (%p5869_p11), [#allocation17], 4294966256  ;;  %p5870_p12 = pmov %p5861_p0 }
 0x1d7   : > { %p5871_p2 = pmov %p5861_p0 }
 0x1d8   : > { %4876 = dma.done.wait (%p5870_p12), [#allocation20], 32  }
 0x1d9   : > { %4878 = vsyncadd (%p5871_p2), [#allocation20], 4294967264  ;;  %p5872_p3 = pmov %p5861_p0 }
 0x1da   : > { %p5873_p7 = pmov %p5861_p0 }
 0x1db   : > { %4880 = dma.done.wait (%p5872_p3), [#allocation23], 2080  }
 0x1dc   : > { %4882 = vsyncadd (%p5873_p7), [#allocation23], 4294965216  ;;  %p5874_p13 = pmov %p5861_p0 }
 0x1de   : > { %4884 = dma.done.wait (%p5874_p13), [#allocation26], 2064  }
 0x1df   : > { %4886 = vsyncadd (%p5861_p0), [#allocation26], 4294965232  ;;  %p949_p1 = scmp.lt.s32.totalorder %s5857_s15, 1  ;;  %s5875_s3 = sld [smem:[#allocation39_spill]]  ;;  %v4213_v1 = vld [vmem:[#allocation6 + $0x4] ss:$12 sps:$4 sm:$0xff]   ;;  %v1033_v41 = vlaneseq }
 0x1e0   : > { %v4215_v2 = vld [vmem:[#allocation6] ss:$12 sps:$4 sm:$0xff]   ;;  %v4914_v3 = vmov 0.0   ;;  %v4216_v4 = vld [vmem:[#allocation6 + $0x8] ss:$12 sps:$4 sm:$0xff]   ;;  %1176 = vmatprep.subr.bf16.mxu0 %v4213_v1  ;;  %v4915_v25 = vmov 0  }
 0x1e1   : > { %s5884_s15 = smov (!%p949_p1, %s5857_s15), 1  ;;  %3822 = vmatprep.subr.bf16.mxu1 %v4914_v3  ;;  %v4217_v5 = vld [vmem:[#allocation6 + $0x1c] ss:$12 sps:$4 sm:$0xff]   ;;  %v4219_v6 = vld [vmem:[#allocation6 + $0x18] ss:$12 sps:$4 sm:$0xff]   ;;  %1177 = vmatpush1.bf16.msra.mxu0 %v4215_v2  ;;  %vm4916_vm0 = vmmov 0  }
 0x1e2   : > { %s3588_s23 = sshll.u32 %s5884_s15, 3  ;;  %v4220_v7 = vld [vmem:[#allocation6 + $0x20] ss:$12 sps:$4 sm:$0xff]   ;;  %3823 = vmatpush3.bf16.msra.mxu1 %v4216_v4  ;;  %1178 = vmatprep.subr.bf16.mxu0 %v4217_v5  ;;  %v4223_v13 = vld [vmem:[#allocation6 + $0x30] ss:$12 sps:$4 sm:$0xff]   ;;  %v1034_v42 = vshrl.u32 %v1033_v41, 7 }
 0x1e3   : > { %v4221_v8 = vld [vmem:[#allocation6 + $0x34] ss:$12 sps:$4 sm:$0xff]   ;;  %3824 = vmatprep.subr.bf16.mxu1 %v4914_v3  ;;  %v4224_v14 = vld [vmem:[#allocation6 + $0x38] ss:$12 sps:$4 sm:$0xff]   ;;  %v4228_v17 = vld [vmem:[#allocation6 + $0x50] ss:$12 sps:$4 sm:$0xff]   ;;  %1208 = vmatprep.mubr.bf16.mxu0 %v4915_v25 }
 0x1e4   : > { %v4225_v15 = vld [vmem:[#allocation6 + $0x4c] ss:$12 sps:$4 sm:$0xff]   ;;  %v4227_v16 = vld [vmem:[#allocation6 + $0x48] ss:$12 sps:$4 sm:$0xff]   ;;  %v4229_v18 = vld [vmem:[#allocation6 + $0x64] ss:$12 sps:$4 sm:$0xff]   ;;  %3838 = vmatprep.mubr.msk.bf16.mxu1 %vm4916_vm0, %v4914_v3 }
 0x1e5   : > { %s952_s13 = scalar_lea.vmem %s5875_s3, %s3588_s23  ;;  %1179 = vmatpush1.bf16.msra.mxu0 %v4219_v6  ;;  %v4231_v19 = vld [vmem:[#allocation6 + $0x60] ss:$12 sps:$4 sm:$0xff]   ;;  %v4232_v20 = vld [vmem:[#allocation6 + $0x68] ss:$12 sps:$4 sm:$0xff]   ;;  %v4235_v22 = vld [vmem:[#allocation6 + $0x78] ss:$12 sps:$4 sm:$0xff]  }
 0x1e6   : > { %v5469_v0 = vld [vmem:[%s952_s13] sm:$0xff]  ;;  %3825 = vmatpush3.bf16.msra.mxu1 %v4220_v7  ;;  %1180 = vmatprep.subr.bf16.mxu0 %v4221_v8  ;;  %v4240_v27 = vld [vmem:[#allocation6 + $0x98] ss:$12 sps:$4 sm:$0xff]   ;;  %v4243_v29 = vld [vmem:[#allocation6 + $0xa8] ss:$12 sps:$4 sm:$0xff]   ;;  %v1043_v43 = vsub.s32 2, %v1034_v42 }
 0x1e7   : > { %972 = vadd.xlane.f32.xlu0 %v5469_v0  ;;  %3826 = vmatprep.subr.bf16.mxu1 %v4914_v3  ;;  %v4233_v21 = vld [vmem:[#allocation6 + $0x7c] ss:$12 sps:$4 sm:$0xff]   ;;  %v4236_v23 = vld [vmem:[#allocation6 + $0x80] ss:$12 sps:$4 sm:$0xff]   ;;  %s5876_s1 = sld [smem:[#allocation45_spill]]  ;;  %v5493_v45 = vsub.s32 1, %v1034_v42 }
 0x1e8   : > { %v4237_v24 = vld [vmem:[#allocation6 + $0x94] ss:$12 sps:$4 sm:$0xff]   ;;  %v4239_v26 = vld [vmem:[#allocation6 + $0x90] ss:$12 sps:$4 sm:$0xff]   ;;  %v4241_v28 = vld [vmem:[#allocation6 + $0xac] ss:$12 sps:$4 sm:$0xff]  }
 0x1e9   : > { %1181 = vmatpush1.bf16.msra.mxu0 %v4223_v13  ;;  %v4244_v30 = vld [vmem:[#allocation6 + $0xb0] ss:$12 sps:$4 sm:$0xff]   ;;  %v5495_v46 = vsub.s32 0, %v1034_v42  ;;  %vm1331_vm1 = vcmask 1043456   ;;  %vm1266_vm2 = vcmask 261120   ;;  %s4917_s4 = smov 96  }
 0x1ea   : > { %3827 = vmatpush3.bf16.msra.mxu1 %v4224_v14  ;;  %1182 = vmatprep.subr.bf16.mxu0 %v4225_v15  ;;  %v3592_v35 = vld [vmem:[#allocation2] ss:$0 sm:$0xff]  ;;  %v3593_v37 = vld [vmem:[#allocation4] ss:$0 sm:$0xff]  ;;  %v1260_v7 = vand.u32 127, %v1033_v41  ;;  %vm1315_vm4 = vcmask 64512  }
 0x1eb   : > { %3828 = vmatprep.subr.bf16.mxu1 %v4914_v3  ;;  %s4918_s27 = smov 64   ;;  %s4919_s7 = smov 32   ;;  %vm2313_vm5 = vcmask 130048  }
 0x1ec   : > { %vm1261_vm3 = vcmp.gt.s32.totalorder %v1260_v7, %v1034_v42  ;;  %s5877_s24 = sld [smem:[#allocation49_spill]]  ;;  %s3725_s5 = sshll.u32 %s5884_s15, 4 }
 0x1ed   : > { %1183 = vmatpush1.bf16.msra.mxu0 %v4227_v16  ;;  %v1031_v44 = vld [vmem:[%s5876_s1] sm:$0x7]  ;;  %s5878_s13 = sld [smem:[#allocation40_spill]]  ;;  %s5879_s6 = sld [smem:[#allocation50_spill]] }
 0x1ee   : > { %3829 = vmatpush3.bf16.msra.mxu1 %v4228_v17  ;;  %1184 = vmatprep.subr.bf16.mxu0 %v4229_v18  ;;  %v1044_v47 = vrot.slane %v1031_v44, %v1043_v43  ;;  %v1040_v48 = vrot.slane %v1031_v44, %v5493_v45  ;;  %v1036_v49 = vrot.slane %v1031_v44, %v5495_v46  ;;  %s5880_s0 = sld [smem:[#allocation41_spill]] }
 0x1ef   : > { %3830 = vmatprep.subr.bf16.mxu1 %v4914_v3 }
 0x1f1   : > { %1185 = vmatpush1.bf16.msra.mxu0 %v4231_v19 }
 0x1f2   : > { %3831 = vmatpush3.bf16.msra.mxu1 %v4232_v20  ;;  %1186 = vmatprep.subr.bf16.mxu0 %v4233_v21 }
 0x1f3   : > { %3832 = vmatprep.subr.bf16.mxu1 %v4914_v3  ;;  %s957_s28 = scalar_lea.vmem %s5878_s13, %s3725_s5 }
 0x1f4   : > { %s960_s9 = scalar_lea.vmem %s5880_s0, %s5884_s15 }
 0x1f5   : > { %1187 = vmatpush1.bf16.msra.mxu0 %v4235_v22 }
 0x1f6   : > { %3833 = vmatpush3.bf16.msra.mxu1 %v4236_v23  ;;  %1188 = vmatprep.subr.bf16.mxu0 %v4237_v24 }
 0x1f7   : > { %3834 = vmatprep.subr.bf16.mxu1 %v4914_v3 }
 0x1f9   : > { %1189 = vmatpush1.bf16.msra.mxu0 %v4239_v26 }
 0x1fa   : > { %3835 = vmatpush3.bf16.msra.mxu1 %v4240_v27  ;;  %1190 = vmatprep.subr.bf16.mxu0 %v4241_v28 }
 0x1fb   : > { %3836 = vmatprep.subr.bf16.mxu1 %v4914_v3 }
 0x1fd   : > { %1191 = vmatpush1.bf16.msra.mxu0 %v4243_v29 }
 0x1fe   : > { %3837 = vmatpush3.bf16.msra.mxu1 %v4244_v30  ;;  %3842 = vmatprep.subr.bf16.mxu0 %v4914_v3 }
 0x1ff   : > { %3848 = vmatprep.subr.bf16.mxu1 %v4914_v3 }
 0x274   : > { %v973_v9 = vpop.xlane.xlu0 %972 }
 0x275   : > { %v975_v10 = vmul.f32 0.0078125, %v973_v9  ;;  %v5525_v9 = vsel %vm1261_vm3, -1e+09, %v4914_v3 }
 0x277   : > { %v976_v11 = vsub.f32 %v5469_v0, %v975_v10 }
 0x279   : > { %v977_v12 = vmul.f32 %v976_v11, %v976_v11 }
 0x27b   : > { %978 = vadd.xlane.f32.xlu0 %v977_v12 }
 0x308   : > { %v979_v31 = vpop.xlane.xlu0 %978 }
 0x309   : > { %v980_v32 = vmul.f32 0.0078125, %v979_v31 }
 0x30b   : > { %v981_v33 = vadd.f32 1e-05, %v980_v32 }
 0x30d   : > { %4333 = vrsqrt.f32 %v981_v33 }
 0x317   : > { %v4334_v34 = vpop.eup %4333 }
 0x318   : > { %v983_v36 = vmul.f32 %v4334_v34, %v976_v11 }
 0x31a   : > { %v990_v38 = vmul.f32 %v3592_v35, %v983_v36 }
 0x31c   : > { %v997_v39 = vadd.f32 %v3593_v37, %v990_v38  ;;  %v4247_v38 = vld [vmem:[#allocation7 + $0x10] sm:$0xff]  }
 0x31e   : > { %v998_v40 = vpack.c.bf16 %v997_v39, %v997_v39  ;;  %v4248_v39 = vld [vmem:[#allocation7 + $0x18] sm:$0xff]  }
 0x320   : > { %1209 = vmatmul.mubr.bf16.vlgmr.msra.gmra.mrb[0].mxu0 %v998_v40  ;;  %3839 = vmatmul.mubr.bf16.vlgmr.msra.gmra.mrb[0].mxu1 %v998_v40 }
 0x321   : > { %3844 = vmatprep.mubr.msk.bf16.mxu0 %vm4916_vm0, %v4914_v3  ;;  %3850 = vmatprep.mubr.msk.bf16.mxu1 %vm4916_vm0, %v4914_v3 }
 0x3f3   : > { %v1210_v50 = vpop.f32.mrb[0].mxu0  ;;  %v1251_v51 = vpop.f32.mrb[0].mxu1 }
 0x3f4   : > { %v1252_v52 = vadd.f32 %v1251_v51, %v1044_v47  ;;  %v1212_v53 = vpop.f32.mrb[1].mxu0  ;;  %v3840_v54 = vpop.f32.mrb[1].mxu1  ;;  %v1211_v61 = vadd.f32 %v1210_v50, %v1036_v49  ;;  %v4245_v47 = vld [vmem:[#allocation7] sm:$0xff]   ;;  %v4246_v49 = vld [vmem:[#allocation7 + $0x8] sm:$0xff]  }
 0x3f5   : > { %v1213_v55 = vadd.f32 %v1212_v53, %v1040_v48  ;;  %v1214_v56 = vpop.f32.mrb[2].mxu0  ;;  %v1254_v57 = vpop.f32.mrb[2].mxu1 }
 0x3f6   : > { %v5499_v58 = vpack.c.bf16 %v1252_v52, %v1252_v52  ;;  %v1215_v59 = vpop.f32.mrb[3].mxu0  ;;  %v3841_v60 = vpop.f32.mrb[3].mxu1  ;;  %v5510_v2 = vpack.c.bf16 %v1211_v61, %v1211_v61 }
 0x3f7   : > { %v5501_v62 = vpack.c.bf16 %v1213_v55, %v1213_v55 }
 0x3f8   : > { %v1333_v63 = vsel %vm1331_vm1, %v5499_v58, 0 }
 0x3f9   : > { %3849 = vmatpush3.bf16.msra.mxu1 %v1333_v63  ;;  %1384 = vrot.lane.b32.xlu1 %v5501_v62, %s4917_s4  ;;  %v1271_v1 = vsel %vm1266_vm2, %v5501_v62, 0 }
 0x3fa   : > { %3843 = vmatpush3.bf16.xpose.msra.mxu0 %v1271_v1  ;;  %3860 = vmatprep.subr.bf16.mxu1 %v4914_v3 }
 0x3fb   : > { %3854 = vmatprep.subr.bf16.mxu0 %v4914_v3 }
 0x3fd   : > { %1381 = vrot.lane.b32.xlu1 %v5510_v2, %s4917_s4 }
 0x401   : > { %3845 = vmatmul.mubr.msk.bf16.vlgmr.msra.gmra.mrb[4].mxu0 %vm1266_vm2, %v5510_v2 }
 0x402   : > { %3856 = vmatprep.mubr.msk.bf16.mxu0 %vm4916_vm0, %v4914_v3 }
 0x46b   : > { %v1385_v4 = vpop.permute.xlu1 %1384 }
 0x46c   : > { %v1390_v5 = vsel %vm1266_vm2, %v1385_v4, 0 }
 0x46d   : > { %3855 = vmatpush3.bf16.xpose.msra.mxu0 %v1390_v5 }
 0x46e   : > { %3866 = vmatprep.subr.bf16.mxu0 %v4914_v3 }
 0x46f   : > { %v1382_v6 = vpop.permute.xlu1 %1381 }
 0x474   : > { %3857 = vmatmul.mubr.msk.bf16.vlgmr.msra.gmra.mrb[8].mxu0 %vm1266_vm2, %v1382_v6 }
 0x475   : > { %3870 = vmatprep.mubr.msk.bf16.mxu0 %vm4916_vm0, %v4914_v3  ;;  %3867 = vmatpush3.bf16.msra.mxu0 %v4247_v38 }
 0x476   : > { %3868 = vmatprep.subr.bf16.mxu0 %v4914_v3 }
 0x479   : > { %3869 = vmatpush3.bf16.msra.mxu0 %v4248_v39 }
 0x47a   : > { %3882 = vmatprep.subr.bf16.mxu0 %v4914_v3 }
 0x4d4   : > { %v1307_v8 = vpop.f32.mrb[4].mxu0 }
 0x4d5   : > { %v1313_v10 = vmul.f32 0.17677669, %v1307_v8  ;;  %v3846_v11 = vpop.f32.mrb[5].mxu0 }
 0x4d6   : > { %v1310_v12 = vpop.f32.mrb[6].mxu0 }
 0x4d7   : > { %v3847_v13 = vpop.f32.mrb[7].mxu0  ;;  %v1314_v14 = vadd.f32 %v1313_v10, %v5525_v9 }
 0x4d9   : > { %v1316_v15 = vsel %vm1315_vm4, %v1314_v14, -inf }
 0x4da   : > { %1317 = vmax.xlane.f32.xlu0 %v1316_v15 }
 0x547   : > { %v1426_v16 = vpop.f32.mrb[8].mxu0 }
 0x548   : > { %v1432_v17 = vmul.f32 0.17677669, %v1426_v16  ;;  %v3858_v18 = vpop.f32.mrb[9].mxu0 }
 0x549   : > { %v1429_v19 = vpop.f32.mrb[10].mxu0 }
 0x54a   : > { %v3859_v20 = vpop.f32.mrb[11].mxu0  ;;  %v1433_v21 = vadd.f32 %v1432_v17, %v5525_v9 }
 0x54c   : > { %v1434_v22 = vsel %vm1315_vm4, %v1433_v21, -inf }
 0x54d   : > { %1435 = vmax.xlane.f32.xlu1 %v1434_v22 }
 0x55e   : > { %1610 = vrot.lane.b32.xlu1 %v5510_v2, %s4918_s27 }
 0x567   : > { %v1318_v23 = vpop.xlane.xlu0 %1317 }
 0x568   : > { %v1319_v24 = vsub.f32 %v1314_v14, %v1318_v23 }
 0x56a   : > { %v1320_v26 = vmul.f32 1.442695, %v1319_v24 }
 0x56c   : > { %4335 = vpow2.f32 %v1320_v26 }
 0x576   : > { %v4336_v27 = vpop.eup %4335 }
 0x577   : > { %v1322_v28 = vsel %vm1315_vm4, %v4336_v27, 0.0 }
 0x578   : > { %1323 = vadd.xlane.f32.xlu0 %v1322_v28 }
 0x5da   : > { %v1436_v29 = vpop.xlane.xlu1 %1435 }
 0x5db   : > { %v1437_v30 = vsub.f32 %v1433_v21, %v1436_v29  ;;  %v4249_v29 = vld [vmem:[#allocation7 + $0x20] sm:$0xff]  }
 0x5dd   : > { %v1438_v31 = vmul.f32 1.442695, %v1437_v30 }
 0x5de   : > { %v1611_v1 = vpop.permute.xlu1 %1610 }
 0x5df   : > { %4337 = vpow2.f32 %v1438_v31 }
 0x5e9   : > { %v4338_v32 = vpop.eup %4337 }
 0x5ea   : > { %v1440_v33 = vsel %vm1315_vm4, %v4338_v32, 0.0 }
 0x5eb   : > { %1441 = vadd.xlane.f32.xlu0 %v1440_v33 }
 0x601   : > { %1447 = vrot.lane.b32.xlu0 %v5499_v58, %s4917_s4 }
 0x605   : > { %v1324_v34 = vpop.xlane.xlu0 %1323  ;;  %1612 = vrot.lane.b32.xlu0 %v5501_v62, %s4918_s27 }
 0x606   : > { %4339 = vrcp.f32 %v1324_v34 }
 0x610   : > { %v4340_v35 = vpop.eup %4339 }
 0x611   : > { %v1326_v36 = vmul.f32 %v4340_v35, %v4336_v27  ;;  %v4250_v35 = vld [vmem:[#allocation7 + $0x28] sm:$0xff]  }
 0x613   : > { %v1327_v37 = vpack.c.bf16 %v1326_v36, %v1326_v36 }
 0x615   : > { %3851 = vmatmul.mubr.msk.bf16.vlgmr.msra.gmra.mrb[4].mxu1 %vm1315_vm4, %v1327_v37 }
 0x616   : > { %3862 = vmatprep.mubr.msk.bf16.mxu1 %vm4916_vm0, %v4914_v3 }
 0x678   : > { %v1442_v40 = vpop.xlane.xlu0 %1441 }
 0x679   : > { %4341 = vrcp.f32 %v1442_v40 }
 0x67c   : > { %v1448_v41 = vpop.permute.xlu0 %1447 }
 0x67d   : > { %v1453_v42 = vsel %vm1331_vm1, %v1448_v41, 0 }
 0x67e   : > { %3861 = vmatpush3.bf16.msra.mxu1 %v1453_v42 }
 0x67f   : > { %3874 = vmatprep.subr.bf16.mxu1 %v4914_v3 }
 0x680   : > { %v1613_v55 = vpop.permute.xlu0 %1612 }
 0x681   : > { %v1618_v61 = vsel %vm1266_vm2, %v1613_v55, 0 }
 0x683   : > { %v4342_v43 = vpop.eup %4341 }
 0x684   : > { %v1444_v44 = vmul.f32 %v4342_v43, %v4338_v32 }
 0x686   : > { %v1445_v48 = vpack.c.bf16 %v1444_v44, %v1444_v44 }
 0x688   : > { %3863 = vmatmul.mubr.msk.bf16.vlgmr.msra.gmra.mrb[8].mxu1 %vm1315_vm4, %v1445_v48 }
 0x689   : > { %3875 = vmatpush3.bf16.msra.mxu1 %v4245_v47  ;;  %3878 = vmatprep.mubr.msk.bf16.mxu1 %vm4916_vm0, %v4914_v3 }
 0x68a   : > { %3876 = vmatprep.subr.bf16.mxu1 %v4914_v3 }
 0x68d   : > { %3877 = vmatpush3.bf16.msra.mxu1 %v4246_v49 }
 0x68e   : > { %3888 = vmatprep.subr.bf16.mxu1 %v4914_v3 }
 0x6e8   : > { %v1369_v50 = vpop.f32.mrb[4].mxu1 }
 0x6e9   : > { %v1375_v51 = vpack.c.bf16 %v1369_v50, %v1369_v50  ;;  %v3852_v52 = vpop.f32.mrb[5].mxu1 }
 0x6ea   : > { %v1372_v53 = vpop.f32.mrb[6].mxu1 }
 0x6eb   : > { %v3853_v54 = vpop.f32.mrb[7].mxu1  ;;  %3879 = vmatmul.mubr.msk.bf16.vlgmr.msra.gmra.mrb[12].mxu1 %vm1266_vm2, %v1375_v51 }
 0x6ec   : > { %3890 = vmatprep.mubr.msk.bf16.mxu1 %vm4916_vm0, %v4914_v3 }
 0x75b   : > { %v1489_v56 = vpop.f32.mrb[8].mxu1 }
 0x75c   : > { %v1495_v57 = vpack.c.bf16 %v1489_v56, %v1489_v56  ;;  %v3864_v59 = vpop.f32.mrb[9].mxu1 }
 0x75d   : > { %v1492_v60 = vpop.f32.mrb[10].mxu1 }
 0x75e   : > { %v3865_v63 = vpop.f32.mrb[11].mxu1  ;;  %3871 = vmatmul.mubr.msk.bf16.vlgmr.msra.gmra.mrb[12].mxu0 %vm1266_vm2, %v1495_v57 }
 0x75f   : > { %3883 = vmatpush3.bf16.xpose.msra.mxu0 %v1618_v61  ;;  %3884 = vmatprep.mubr.msk.bf16.mxu0 %vm4916_vm0, %v4914_v3 }
 0x760   : > { %3894 = vmatprep.subr.bf16.mxu0 %v4914_v3 }
 0x766   : > { %3885 = vmatmul.mubr.msk.bf16.vlgmr.msra.gmra.mrb[16].mxu0 %vm1266_vm2, %v1611_v1 }
 0x767   : > { %3898 = vmatprep.mubr.msk.bf16.mxu0 %vm4916_vm0, %v4914_v3  ;;  %3895 = vmatpush3.bf16.msra.mxu0 %v4249_v29  ;;  %v4264_v29 = vld [vmem:[%s5877_s24 + $0x34] ss:$8 sps:$4 sm:$0xff]  }
 0x768   : > { %3896 = vmatprep.subr.bf16.mxu0 %v4914_v3 }
 0x76b   : > { %3897 = vmatpush3.bf16.msra.mxu0 %v4250_v35 }
 0x76c   : > { %3908 = vmatprep.subr.bf16.mxu0 %v4914_v3 }
 0x7be   : > { %v1604_v4 = vpop.f32.mrb[12].mxu1 }
 0x7bf   : > { %v3880_v5 = vpop.f32.mrb[13].mxu1 }
 0x7c0   : > { %v1607_v6 = vpop.f32.mrb[14].mxu1 }
 0x7c1   : > { %v3881_v7 = vpop.f32.mrb[15].mxu1  ;;  %v4252_v6 = vld [vmem:[#allocation7 + $0x38] sm:$0xff]  }
 0x831   : > { %v1549_v8 = vpop.f32.mrb[12].mxu0 }
 0x832   : > { %v5562_v10 = vadd.f32 %v1604_v4, %v1549_v8  ;;  %v3872_v11 = vpop.f32.mrb[13].mxu0 }
 0x833   : > { %v1552_v12 = vpop.f32.mrb[14].mxu0 }
 0x834   : > { %v3873_v13 = vpop.f32.mrb[15].mxu0 }
 0x839   : > { %v1654_v14 = vpop.f32.mrb[16].mxu0 }
 0x83a   : > { %v1660_v15 = vmul.f32 0.17677669, %v1654_v14  ;;  %v3886_v16 = vpop.f32.mrb[17].mxu0 }
 0x83b   : > { %v1657_v17 = vpop.f32.mrb[18].mxu0 }
 0x83c   : > { %v3887_v18 = vpop.f32.mrb[19].mxu0  ;;  %v1661_v19 = vadd.f32 %v1660_v15, %v5525_v9  ;;  %v3638_v17 = vld [vmem:[#allocation9] ss:$0 sm:$0xff] }
 0x83e   : > { %v1662_v20 = vsel %vm1315_vm4, %v1661_v19, -inf }
 0x83f   : > { %1663 = vmax.xlane.f32.xlu0 %v1662_v20 }
 0x855   : > { %1674 = vrot.lane.b32.xlu0 %v5499_v58, %s4918_s27 }
 0x859   : > { %1783 = vrot.lane.b32.xlu0 %v5510_v2, %s4919_s7 }
 0x8cc   : > { %v1664_v21 = vpop.xlane.xlu0 %1663 }
 0x8cd   : > { %v1665_v22 = vsub.f32 %v1661_v19, %v1664_v21  ;;  %v4253_v21 = vld [vmem:[%s5877_s24] ss:$8 sps:$4 sm:$0xff]  }
 0x8cf   : > { %v1666_v23 = vmul.f32 1.442695, %v1665_v22  ;;  %v4255_v22 = vld [vmem:[%s5877_s24 + $0x4] ss:$8 sps:$4 sm:$0xff]  }
 0x8d0   : > { %v1675_v24 = vpop.permute.xlu0 %1674 }
 0x8d1   : > { %4343 = vpow2.f32 %v1666_v23  ;;  %v1680_v26 = vsel %vm1331_vm1, %v1675_v24, 0  ;;  %v4258_v23 = vld [vmem:[%s5877_s24 + $0x14] ss:$8 sps:$4 sm:$0xff]   ;;  %v4265_v24 = vld [vmem:[#allocation13] sm:$0xff]  }
 0x8d2   : > { %3889 = vmatpush3.bf16.msra.mxu1 %v1680_v26  ;;  %v4261_v26 = vld [vmem:[%s5877_s24 + $0x24] ss:$8 sps:$4 sm:$0xff]  }
 0x8d3   : > { %3902 = vmatprep.subr.bf16.mxu1 %v4914_v3 }
 0x8db   : > { %v4344_v27 = vpop.eup %4343 }
 0x8dc   : > { %v1668_v28 = vsel %vm1315_vm4, %v4344_v27, 0.0 }
 0x8dd   : > { %1669 = vadd.xlane.f32.xlu1 %v1668_v28  ;;  %v4259_v28 = vld [vmem:[%s5877_s24 + $0x20] ss:$8 sps:$4 sm:$0xff]  }
 0x8ee   : > { %1785 = vrot.lane.b32.xlu1 %v5501_v62, %s4919_s7  ;;  %v1784_v62 = vpop.permute.xlu0 %1783 }
 0x96a   : > { %v1670_v2 = vpop.xlane.xlu1 %1669 }
 0x96b   : > { %4345 = vrcp.f32 %v1670_v2  ;;  %v4262_v2 = vld [vmem:[%s5877_s24 + $0x30] ss:$8 sps:$4 sm:$0xff]  }
 0x96e   : > { %v1786_v32 = vpop.permute.xlu1 %1785 }
 0x96f   : > { %v1791_v34 = vsel %vm1266_vm2, %v1786_v32, 0  ;;  %v4272_v32 = vld [vmem:[%s5877_s24 + $0x54] ss:$8 sps:$4 sm:$0xff]  }
 0x975   : > { %v4346_v30 = vpop.eup %4345 }
 0x976   : > { %v1672_v31 = vmul.f32 %v4346_v30, %v4344_v27  ;;  %v4269_v27 = vld [vmem:[#allocation13 + $0x8] sm:$0xff]   ;;  %v4268_v30 = vld [vmem:[%s5877_s24 + $0x44] ss:$8 sps:$4 sm:$0xff]  }
 0x978   : > { %v1673_v33 = vpack.c.bf16 %v1672_v31, %v1672_v31  ;;  %v4266_v31 = vld [vmem:[%s5877_s24 + $0x40] ss:$8 sps:$4 sm:$0xff]  }
 0x97a   : > { %3891 = vmatmul.mubr.msk.bf16.vlgmr.msra.gmra.mrb[16].mxu1 %vm1315_vm4, %v1673_v33  ;;  %v4270_v33 = vld [vmem:[%s5877_s24 + $0x50] ss:$8 sps:$4 sm:$0xff]  }
 0x97b   : > { %3903 = vmatpush3.bf16.xpose.msra.mxu1 %v1791_v34  ;;  %3904 = vmatprep.mubr.msk.bf16.mxu1 %vm4916_vm0, %v4914_v3 }
 0x97c   : > { %3914 = vmatprep.subr.bf16.mxu1 %v4914_v3 }
 0x982   : > { %3905 = vmatmul.mubr.msk.bf16.vlgmr.msra.gmra.mrb[20].mxu1 %vm1266_vm2, %v1784_v62 }
 0x983   : > { %3918 = vmatprep.mubr.msk.bf16.mxu1 %vm4916_vm0, %v4914_v3 }
 0xa4d   : > { %v1716_v36 = vpop.f32.mrb[16].mxu1 }
 0xa4e   : > { %v1722_v37 = vpack.c.bf16 %v1716_v36, %v1716_v36  ;;  %v3892_v38 = vpop.f32.mrb[17].mxu1 }
 0xa4f   : > { %v1719_v39 = vpop.f32.mrb[18].mxu1  ;;  %v4276_v38 = vld [vmem:[%s5877_s24 + $0x64] ss:$8 sps:$4 sm:$0xff]  }
 0xa50   : > { %v3893_v40 = vpop.f32.mrb[19].mxu1  ;;  %3899 = vmatmul.mubr.msk.bf16.vlgmr.msra.gmra.mrb[20].mxu0 %vm1266_vm2, %v1722_v37  ;;  %v4273_v37 = vld [vmem:[#allocation13 + $0x10] sm:$0xff]  }
 0xa51   : > { %3910 = vmatprep.mubr.msk.bf16.mxu0 %vm4916_vm0, %v4914_v3  ;;  %v4274_v39 = vld [vmem:[%s5877_s24 + $0x60] ss:$8 sps:$4 sm:$0xff]  }
 0xa52   : > { %v4277_v40 = vld [vmem:[#allocation13 + $0x18] sm:$0xff]  }
 0xa55   : > { %v1827_v41 = vpop.f32.mrb[20].mxu1 }
 0xa56   : > { %v1833_v42 = vmul.f32 0.17677669, %v1827_v41  ;;  %v3906_v43 = vpop.f32.mrb[21].mxu1  ;;  %v4278_v41 = vld [vmem:[%s5877_s24 + $0x70] ss:$8 sps:$4 sm:$0xff]  }
 0xa57   : > { %v1830_v44 = vpop.f32.mrb[22].mxu1  ;;  %v4281_v43 = vld [vmem:[#allocation13 + $0x20] sm:$0xff]  }
 0xa58   : > { %v3907_v47 = vpop.f32.mrb[23].mxu1  ;;  %v1834_v48 = vadd.f32 %v1833_v42, %v5525_v9  ;;  %v4251_v9 = vld [vmem:[#allocation7 + $0x30] sm:$0xff]   ;;  %v967_v44 = vld [vmem:[%s957_s28] sm:$0xff] }
 0xa59   : > { %3915 = vmatpush3.bf16.msra.mxu1 %v4251_v9  ;;  %v4280_v42 = vld [vmem:[%s5877_s24 + $0x74] ss:$8 sps:$4 sm:$0xff]   ;;  %v968_v47 = vld [vmem:[%s957_s28 + $0x8] sm:$0xff] }
 0xa5a   : > { %v1835_v49 = vsel %vm1315_vm4, %v1834_v48, -inf  ;;  %3916 = vmatprep.subr.bf16.mxu1 %v4914_v3 }
 0xa5b   : > { %1836 = vmax.xlane.f32.xlu0 %v1835_v49  ;;  %v4282_v49 = vld [vmem:[#allocation13 + $0x28] sm:$0xff]  }
 0xa5d   : > { %3917 = vmatpush3.bf16.msra.mxu1 %v4252_v6 }
 0xa5e   : > { %2213 = vmatprep.subr.bf16.mxu1 %v4255_v22 }
 0xa71   : > { %1847 = vrot.lane.b32.xlu0 %v5499_v58, %s4919_s7 }
 0xae8   : > { %v1837_v50 = vpop.xlane.xlu0 %1836 }
 0xae9   : > { %v1838_v51 = vsub.f32 %v1834_v48, %v1837_v50  ;;  %v2104_v48 = vpack.c.bf16 %v968_v47, %v967_v44  ;;  %v4283_v50 = vld [vmem:[#allocation13 + $0x30] sm:$0xff]  }
 0xaeb   : > { %v1839_v52 = vmul.f32 1.442695, %v1838_v51  ;;  %v4284_v51 = vld [vmem:[#allocation13 + $0x38] sm:$0xff]  }
 0xaec   : > { %v1848_v53 = vpop.permute.xlu0 %1847 }
 0xaed   : > { %4347 = vpow2.f32 %v1839_v52  ;;  %v1853_v54 = vsel %vm1331_vm1, %v1848_v53, 0 }
 0xaee   : > { %3909 = vmatpush3.bf16.msra.mxu0 %v1853_v54 }
 0xaef   : > { %3922 = vmatprep.subr.bf16.mxu0 %v4914_v3 }
 0xaf7   : > { %v4348_v55 = vpop.eup %4347 }
 0xaf8   : > { %v1841_v56 = vsel %vm1315_vm4, %v4348_v55, 0.0 }
 0xaf9   : > { %1842 = vadd.xlane.f32.xlu1 %v1841_v56  ;;  %v3639_v56 = vld [vmem:[#allocation10] ss:$0 sm:$0xff] }
 0xb23   : > { %v1776_v57 = vpop.f32.mrb[20].mxu0 }
 0xb24   : > { %v1782_v58 = vadd.f32 %v1776_v57, %v5562_v10  ;;  %v3900_v59 = vpop.f32.mrb[21].mxu0  ;;  %v3640_v57 = vld [vmem:[#allocation12] ss:$0 sm:$0xff] }
 0xb25   : > { %v1779_v60 = vpop.f32.mrb[22].mxu0 }
 0xb26   : > { %v3901_v61 = vpop.f32.mrb[23].mxu0 }
 0xb27   : > { %v2121_v61 = vld [vmem:[%s5879_s6] sm:$0x3] }
 0xb86   : > { %v1843_v63 = vpop.xlane.xlu1 %1842 }
 0xb87   : > { %4349 = vrcp.f32 %v1843_v63  ;;  %v2126_v63 = vrot.slane %v2121_v61, %v5495_v46 }
 0xb91   : > { %v4350_v1 = vpop.eup %4349 }
 0xb92   : > { %v1845_v4 = vmul.f32 %v4350_v1, %v4348_v55  ;;  %v2130_v1 = vrot.slane %v2121_v61, %v5493_v45  ;;  %v4285_v61 = vld [vmem:[#allocation16] sm:$0xff]  }
 0xb94   : > { %v1846_v5 = vpack.c.bf16 %v1845_v4, %v1845_v4 }
 0xb96   : > { %3911 = vmatmul.mubr.msk.bf16.vlgmr.msra.gmra.mrb[24].mxu0 %vm1315_vm4, %v1846_v5 }
 0xb97   : > { %3938 = vmatprep.mubr.msk.bf16.mxu0 %vm4916_vm0, %v4914_v3  ;;  %3923 = vmatpush3.bf16.msra.mxu0 %v4265_v24 }
 0xb98   : > { %3924 = vmatprep.subr.bf16.mxu0 %v4914_v3 }
 0xb9b   : > { %3925 = vmatpush3.bf16.msra.mxu0 %v4269_v27 }
 0xb9c   : > { %3926 = vmatprep.subr.bf16.mxu0 %v4914_v3 }
 0xb9f   : > { %3927 = vmatpush3.bf16.msra.mxu0 %v4273_v37 }
 0xba0   : > { %3928 = vmatprep.subr.bf16.mxu0 %v4914_v3 }
 0xba3   : > { %3929 = vmatpush3.bf16.msra.mxu0 %v4277_v40 }
 0xba4   : > { %3930 = vmatprep.subr.bf16.mxu0 %v4914_v3 }
 0xba7   : > { %3931 = vmatpush3.bf16.msra.mxu0 %v4281_v43 }
 0xba8   : > { %3932 = vmatprep.subr.bf16.mxu0 %v4914_v3 }
 0xbab   : > { %3933 = vmatpush3.bf16.msra.mxu0 %v4282_v49 }
 0xbac   : > { %3934 = vmatprep.subr.bf16.mxu0 %v4914_v3 }
 0xbaf   : > { %3935 = vmatpush3.bf16.msra.mxu0 %v4283_v50 }
 0xbb0   : > { %3936 = vmatprep.subr.bf16.mxu0 %v4914_v3 }
 0xbb3   : > { %3937 = vmatpush3.bf16.msra.mxu0 %v4284_v51 }
 0xbb4   : > { %3942 = vmatprep.subr.bf16.mxu0 %v4914_v3 }
 0xc69   : > { %v1889_v7 = vpop.f32.mrb[24].mxu0 }
 0xc6a   : > { %v1895_v8 = vpack.c.bf16 %v1889_v7, %v1889_v7  ;;  %v3912_v11 = vpop.f32.mrb[25].mxu0 }
 0xc6b   : > { %v1892_v12 = vpop.f32.mrb[26].mxu0 }
 0xc6c   : > { %v3913_v10 = vpop.f32.mrb[27].mxu0  ;;  %3919 = vmatmul.mubr.msk.bf16.vlgmr.msra.gmra.mrb[24].mxu1 %vm1266_vm2, %v1895_v8 }
 0xc6d   : > { %2245 = vmatprep.mubr.bf16.mxu1 %v4915_v25  ;;  %2214 = vmatpush1.bf16.msra.mxu1 %v4253_v21 }
 0xc6e   : > { %2215 = vmatprep.subr.bf16.mxu1 %v4258_v23 }
 0xd3f   : > { %v1949_v13 = vpop.f32.mrb[24].mxu1 }
 0xd40   : > { %v1955_v14 = vadd.f32 %v1949_v13, %v1782_v58  ;;  %v3920_v15 = vpop.f32.mrb[25].mxu1 }
 0xd41   : > { %v1952_v16 = vpop.f32.mrb[26].mxu1 }
 0xd42   : > { %v1956_v18 = vadd.f32 %v1955_v14, %v5469_v0  ;;  %v3921_v19 = vpop.f32.mrb[27].mxu1  ;;  %v4256_v0 = vld [vmem:[%s5877_s24 + $0x10] ss:$8 sps:$4 sm:$0xff]   ;;  %v3641_v16 = vld [vmem:[#allocation15] ss:$0 sm:$0xff] }
 0xd43   : > { %2216 = vmatpush1.bf16.msra.mxu1 %v4256_v0 }
 0xd44   : > { %v5603_v20 = vadd.f32 %v3638_v17, %v1956_v18  ;;  %2217 = vmatprep.subr.bf16.mxu1 %v4261_v26 }
 0xd46   : > { %1967 = vadd.xlane.f32.xlu1 %v5603_v20 }
 0xd47   : > { %2218 = vmatpush1.bf16.msra.mxu1 %v4259_v28  ;;  %v5705_v28 = vld [vmem:[%s960_s9] ss:$0 sm:$0xff] }
 0xd48   : > { %2219 = vmatprep.subr.bf16.mxu1 %v4264_v29 }
 0xd4b   : > { %2220 = vmatpush1.bf16.msra.mxu1 %v4262_v2 }
 0xd4c   : > { %2221 = vmatprep.subr.bf16.mxu1 %v4268_v30 }
 0xd4f   : > { %2222 = vmatpush1.bf16.msra.mxu1 %v4266_v31 }
 0xd50   : > { %2223 = vmatprep.subr.bf16.mxu1 %v4272_v32 }
 0xd53   : > { %2224 = vmatpush1.bf16.msra.mxu1 %v4270_v33 }
 0xd54   : > { %2225 = vmatprep.subr.bf16.mxu1 %v4276_v38 }
 0xd57   : > { %2226 = vmatpush1.bf16.msra.mxu1 %v4274_v39 }
 0xd58   : > { %2227 = vmatprep.subr.bf16.mxu1 %v4280_v42 }
 0xd5b   : > { %2228 = vmatpush1.bf16.msra.mxu1 %v4278_v41 }
 0xd5c   : > { %3948 = vmatprep.subr.bf16.mxu1 %v4914_v3 }
 0xd5e   : > { %2246 = vmatmul.mubr.bf16.vlgmr.msra.gmra.mrb[28].mxu1 %v2104_v48 }
 0xd5f   : > { %3950 = vmatprep.mubr.msk.bf16.mxu1 %vm4916_vm0, %v4914_v3 }
 0xdd3   : > { %v1968_v34 = vpop.xlane.xlu1 %1967 }
 0xdd4   : > { %v1969_v62 = vmul.f32 0.0078125, %v1968_v34 }
 0xdd6   : > { %v1970_v35 = vsub.f32 %v5603_v20, %v1969_v62 }
 0xdd8   : > { %v1971_v36 = vmul.f32 %v1970_v35, %v1970_v35 }
 0xdda   : > { %1972 = vadd.xlane.f32.xlu1 %v1971_v36 }
 0xe31   : > { %v2247_v4 = vpop.f32.mrb[28].mxu1 }
 0xe32   : > { %v2248_v5 = vadd.f32 %v2247_v4, %v2126_v63  ;;  %v2249_v6 = vpop.f32.mrb[29].mxu1 }
 0xe33   : > { %v2250_v7 = vadd.f32 %v2249_v6, %v2130_v1  ;;  %v2251_v8 = vpop.f32.mrb[30].mxu1 }
 0xe34   : > { %v2252_v11 = vadd.f32 %v2251_v8, %v2126_v63  ;;  %v2253_v12 = vpop.f32.mrb[31].mxu1 }
 0xe35   : > { %v2254_v10 = vadd.f32 %v2253_v12, %v2130_v1  ;;  %v4286_v1 = vld [vmem:[#allocation16 + $0x8] sm:$0xff]  }
 0xe36   : > { %v5677_v13 = vpack.c.bf16 %v2252_v11, %v2248_v5 }
 0xe37   : > { %v5679_v14 = vpack.c.bf16 %v2254_v10, %v2250_v7 }
 0xe38   : > { %2378 = vrot.lane.b32.xlu0 %v5677_v13, %s4917_s4  ;;  %v2263_v15 = vsel %vm1266_vm2, %v5677_v13, 0 }
 0xe39   : > { %3949 = vmatpush3.bf16.msra.mxu1 %v5679_v14 }
 0xe3a   : > { %3960 = vmatprep.subr.bf16.mxu1 %v4914_v3 }
 0xe67   : > { %v1973_v52 = vpop.xlane.xlu1 %1972 }
 0xe68   : > { %v1974_v53 = vmul.f32 0.0078125, %v1973_v52 }
 0xe6a   : > { %v1975_v54 = vadd.f32 1e-05, %v1974_v53 }
 0xe6c   : > { %4351 = vrsqrt.f32 %v1975_v54 }
 0xe76   : > { %v4352_v55 = vpop.eup %4351 }
 0xe77   : > { %v1977_v9 = vmul.f32 %v4352_v55, %v1970_v35 }
 0xe79   : > { %v1984_v58 = vmul.f32 %v3639_v56, %v1977_v9  ;;  %v4287_v56 = vld [vmem:[#allocation16 + $0x10] sm:$0xff]   ;;  %v4288_v9 = vld [vmem:[#allocation16 + $0x18] sm:$0xff]  }
 0xe7b   : > { %v1991_v59 = vadd.f32 %v3640_v57, %v1984_v58 }
 0xe7d   : > { %v1992_v60 = vpack.c.bf16 %v1991_v59, %v1991_v59 }
 0xe7f   : > { %3939 = vmatmul.mubr.bf16.vlgmr.msra.gmra.mrb[28].mxu0 %v1992_v60 }
 0xe80   : > { %3944 = vmatprep.mubr.msk.bf16.mxu0 %vm4916_vm0, %v4914_v3  ;;  %3943 = vmatpush3.bf16.xpose.msra.mxu0 %v2263_v15 }
 0xe81   : > { %3954 = vmatprep.subr.bf16.mxu0 %v4914_v3 }
 0xeaa   : > { %v2379_v18 = vpop.permute.xlu0 %2378 }
 0xeab   : > { %v2384_v0 = vsel %vm1266_vm2, %v2379_v18, 0 }
 0xf52   : > { %v2098_v17 = vpop.f32.mrb[28].mxu0 }
 0xf53   : > { %v2099_v19 = vadd.f32 %v3641_v16, %v2098_v17  ;;  %v3940_v21 = vpop.f32.mrb[29].mxu0 }
 0xf54   : > { %v2101_v22 = vpop.f32.mrb[30].mxu0 }
 0xf55   : > { %v5688_v23 = vpack.c.bf16 %v2099_v19, %v2099_v19  ;;  %v3941_v24 = vpop.f32.mrb[31].mxu0 }
 0xf57   : > { %2375 = vrot.lane.b32.xlu1 %v5688_v23, %s4917_s4  ;;  %3945 = vmatmul.mubr.msk.bf16.vlgmr.msra.gmra.mrb[32].mxu0 %vm1266_vm2, %v5688_v23 }
 0xf58   : > { %3955 = vmatpush3.bf16.xpose.msra.mxu0 %v2384_v0  ;;  %3956 = vmatprep.mubr.msk.bf16.mxu0 %vm4916_vm0, %v4914_v3 }
 0xf59   : > { %3966 = vmatprep.subr.bf16.mxu0 %v4914_v3 }
 0xfc9   : > { %v2376_v26 = vpop.permute.xlu1 %2375 }
 0xfca   : > { %3957 = vmatmul.mubr.msk.bf16.vlgmr.msra.gmra.mrb[36].mxu0 %vm1266_vm2, %v2376_v26 }
 0xfcb   : > { %3970 = vmatprep.mubr.msk.bf16.mxu0 %vm4916_vm0, %v4914_v3  ;;  %3967 = vmatpush3.bf16.msra.mxu0 %v4287_v56 }
 0xfcc   : > { %3968 = vmatprep.subr.bf16.mxu0 %v4914_v3 }
 0xfcf   : > { %3969 = vmatpush3.bf16.msra.mxu0 %v4288_v9 }
 0xfd0   : > { %3982 = vmatprep.subr.bf16.mxu0 %v4914_v3 }
0x102a   : > { %v2299_v27 = vpop.f32.mrb[32].mxu0 }
0x102b   : > { %v2305_v29 = vmul.f32 0.17677669, %v2299_v27  ;;  %v3946_v2 = vpop.f32.mrb[33].mxu0 }
0x102c   : > { %v2302_v30 = vpop.f32.mrb[34].mxu0 }
0x102d   : > { %v3947_v31 = vpop.f32.mrb[35].mxu0  ;;  %v2312_v32 = vadd.f32 %v5705_v28, %v2305_v29 }
0x102f   : > { %v2314_v33 = vsel %vm2313_vm5, %v2312_v32, -inf }
0x1030   : > { %2315 = vmax.xlane.f32.xlu0 %v2314_v33 }
0x109d   : > { %v2420_v34 = vpop.f32.mrb[36].mxu0 }
0x109e   : > { %v2426_v62 = vmul.f32 0.17677669, %v2420_v34  ;;  %v3958_v35 = vpop.f32.mrb[37].mxu0 }
0x109f   : > { %v2423_v36 = vpop.f32.mrb[38].mxu0 }
0x10a0   : > { %v3959_v37 = vpop.f32.mrb[39].mxu0  ;;  %v2427_v38 = vadd.f32 %v5705_v28, %v2426_v62 }
0x10a2   : > { %v2428_v39 = vsel %vm2313_vm5, %v2427_v38, -inf }
0x10a3   : > { %2429 = vmax.xlane.f32.xlu1 %v2428_v39 }
0x10b4   : > { %2604 = vrot.lane.b32.xlu1 %v5677_v13, %s4918_s27 }
0x10bd   : > { %v2316_v40 = vpop.xlane.xlu0 %2315 }
0x10be   : > { %v2317_v41 = vsub.f32 %v2312_v32, %v2316_v40 }
0x10c0   : > { %v2318_v42 = vmul.f32 1.442695, %v2317_v41 }
0x10c2   : > { %4353 = vpow2.f32 %v2318_v42 }
0x10cc   : > { %v4354_v43 = vpop.eup %4353 }
0x10cd   : > { %v2320_v44 = vsel %vm2313_vm5, %v4354_v43, 0.0 }
0x10ce   : > { %2321 = vadd.xlane.f32.xlu0 %v2320_v44 }
0x1130   : > { %v2430_v47 = vpop.xlane.xlu1 %2429 }
0x1131   : > { %v2431_v48 = vsub.f32 %v2427_v38, %v2430_v47 }
0x1133   : > { %v2432_v49 = vmul.f32 1.442695, %v2431_v48 }
0x1134   : > { %v2605_v11 = vpop.permute.xlu1 %2604 }
0x1135   : > { %4355 = vpow2.f32 %v2432_v49  ;;  %v2610_v17 = vsel %vm1266_vm2, %v2605_v11, 0 }
0x113f   : > { %v4356_v50 = vpop.eup %4355 }
0x1140   : > { %v2434_v51 = vsel %vm2313_vm5, %v4356_v50, 0.0 }
0x1141   : > { %2435 = vadd.xlane.f32.xlu0 %v2434_v51  ;;  %v4290_v51 = vld [vmem:[#allocation16 + $0x28] sm:$0xff]  }
0x1157   : > { %2441 = vrot.lane.b32.xlu0 %v5679_v14, %s4917_s4 }
0x115b   : > { %v2322_v52 = vpop.xlane.xlu0 %2321  ;;  %2602 = vrot.lane.b32.xlu0 %v5688_v23, %s4918_s27 }
0x115c   : > { %4357 = vrcp.f32 %v2322_v52 }
0x1166   : > { %v4358_v53 = vpop.eup %4357 }
0x1167   : > { %v2324_v54 = vmul.f32 %v4358_v53, %v4354_v43  ;;  %v4289_v43 = vld [vmem:[#allocation16 + $0x20] sm:$0xff]  }
0x1169   : > { %v2325_v55 = vpack.c.bf16 %v2324_v54, %v2324_v54 }
0x116b   : > { %3951 = vmatmul.mubr.msk.bf16.vlgmr.msra.gmra.mrb[32].mxu1 %vm2313_vm5, %v2325_v55 }
0x116c   : > { %3962 = vmatprep.mubr.msk.bf16.mxu1 %vm4916_vm0, %v4914_v3 }
0x11ce   : > { %v2436_v57 = vpop.xlane.xlu0 %2435 }
0x11cf   : > { %4359 = vrcp.f32 %v2436_v57 }
0x11d2   : > { %v2442_v58 = vpop.permute.xlu0 %2441 }
0x11d3   : > { %3961 = vmatpush3.bf16.msra.mxu1 %v2442_v58 }
0x11d4   : > { %3974 = vmatprep.subr.bf16.mxu1 %v4914_v3 }
0x11d6   : > { %v2603_v19 = vpop.permute.xlu0 %2602 }
0x11d9   : > { %v4360_v59 = vpop.eup %4359 }
0x11da   : > { %v2438_v60 = vmul.f32 %v4360_v59, %v4356_v50 }
0x11dc   : > { %v2439_v63 = vpack.c.bf16 %v2438_v60, %v2438_v60 }
0x11de   : > { %3963 = vmatmul.mubr.msk.bf16.vlgmr.msra.gmra.mrb[36].mxu1 %vm2313_vm5, %v2439_v63 }
0x11df   : > { %3975 = vmatpush3.bf16.msra.mxu1 %v4285_v61  ;;  %3978 = vmatprep.mubr.msk.bf16.mxu1 %vm4916_vm0, %v4914_v3 }
0x11e0   : > { %3976 = vmatprep.subr.bf16.mxu1 %v4914_v3 }
0x11e3   : > { %3977 = vmatpush3.bf16.msra.mxu1 %v4286_v1 }
0x11e4   : > { %3988 = vmatprep.subr.bf16.mxu1 %v4914_v3 }
0x123e   : > { %v2363_v4 = vpop.f32.mrb[32].mxu1 }
0x123f   : > { %v2369_v5 = vpack.c.bf16 %v2363_v4, %v2363_v4  ;;  %v3952_v6 = vpop.f32.mrb[33].mxu1 }
0x1240   : > { %v2366_v7 = vpop.f32.mrb[34].mxu1 }
0x1241   : > { %v3953_v8 = vpop.f32.mrb[35].mxu1  ;;  %3979 = vmatmul.mubr.msk.bf16.vlgmr.msra.gmra.mrb[40].mxu1 %vm1266_vm2, %v2369_v5 }
0x1242   : > { %3990 = vmatprep.mubr.msk.bf16.mxu1 %vm4916_vm0, %v4914_v3  ;;  %v4291_v8 = vld [vmem:[#allocation16 + $0x30] sm:$0xff]  }
0x12b1   : > { %v2481_v12 = vpop.f32.mrb[36].mxu1 }
0x12b2   : > { %v2487_v10 = vpack.c.bf16 %v2481_v12, %v2481_v12  ;;  %v3964_v15 = vpop.f32.mrb[37].mxu1 }
0x12b3   : > { %v2484_v16 = vpop.f32.mrb[38].mxu1 }
0x12b4   : > { %v3965_v18 = vpop.f32.mrb[39].mxu1  ;;  %3971 = vmatmul.mubr.msk.bf16.vlgmr.msra.gmra.mrb[40].mxu0 %vm1266_vm2, %v2487_v10 }
0x12b5   : > { %3983 = vmatpush3.bf16.xpose.msra.mxu0 %v2610_v17  ;;  %3984 = vmatprep.mubr.msk.bf16.mxu0 %vm4916_vm0, %v4914_v3 }
0x12b6   : > { %3994 = vmatprep.subr.bf16.mxu0 %v4914_v3 }
0x12bc   : > { %3985 = vmatmul.mubr.msk.bf16.vlgmr.msra.gmra.mrb[44].mxu0 %vm1266_vm2, %v2603_v19 }
0x12bd   : > { %3998 = vmatprep.mubr.msk.bf16.mxu0 %vm4916_vm0, %v4914_v3  ;;  %3995 = vmatpush3.bf16.msra.mxu0 %v4289_v43  ;;  %v4302_v43 = vld [vmem:[#allocation22 + $0x30] ss:$8 sps:$4 sm:$0xff]  }
0x12be   : > { %3996 = vmatprep.subr.bf16.mxu0 %v4914_v3 }
0x12c1   : > { %3997 = vmatpush3.bf16.msra.mxu0 %v4290_v51  ;;  %v4314_v51 = vld [vmem:[#allocation22 + $0x70] ss:$8 sps:$4 sm:$0xff]  }
0x12c2   : > { %4008 = vmatprep.subr.bf16.mxu0 %v4914_v3 }
0x1314   : > { %v2596_v21 = vpop.f32.mrb[40].mxu1 }
0x1315   : > { %v3980_v22 = vpop.f32.mrb[41].mxu1 }
0x1316   : > { %v2599_v24 = vpop.f32.mrb[42].mxu1 }
0x1317   : > { %v3981_v0 = vpop.f32.mrb[43].mxu1 }
0x1387   : > { %v2541_v26 = vpop.f32.mrb[40].mxu0 }
0x1388   : > { %v5741_v27 = vadd.f32 %v2596_v21, %v2541_v26  ;;  %v3972_v29 = vpop.f32.mrb[41].mxu0 }
0x1389   : > { %v2544_v2 = vpop.f32.mrb[42].mxu0 }
0x138a   : > { %v3973_v30 = vpop.f32.mrb[43].mxu0 }
0x138f   : > { %v2646_v31 = vpop.f32.mrb[44].mxu0 }
0x1390   : > { %v2652_v32 = vmul.f32 0.17677669, %v2646_v31  ;;  %v3986_v33 = vpop.f32.mrb[45].mxu0  ;;  %v3687_v31 = vld [vmem:[#allocation18] ss:$0 sm:$0xff] }
0x1391   : > { %v2649_v34 = vpop.f32.mrb[46].mxu0 }
0x1392   : > { %v3987_v62 = vpop.f32.mrb[47].mxu0  ;;  %v2653_v35 = vadd.f32 %v5705_v28, %v2652_v32 }
0x1393   : > { %v4295_v62 = vld [vmem:[#allocation22 + $0x4] ss:$8 sps:$4 sm:$0xff]  }
0x1394   : > { %v2654_v36 = vsel %vm2313_vm5, %v2653_v35, -inf }
0x1395   : > { %2655 = vmax.xlane.f32.xlu0 %v2654_v36  ;;  %v4296_v36 = vld [vmem:[#allocation22 + $0x10] ss:$8 sps:$4 sm:$0xff]  }
0x13ab   : > { %2666 = vrot.lane.b32.xlu0 %v5679_v14, %s4918_s27 }
0x13af   : > { %2773 = vrot.lane.b32.xlu0 %v5688_v23, %s4919_s7 }
0x1422   : > { %v2656_v37 = vpop.xlane.xlu0 %2655 }
0x1423   : > { %v2657_v38 = vsub.f32 %v2653_v35, %v2656_v37  ;;  %v4298_v35 = vld [vmem:[#allocation22 + $0x14] ss:$8 sps:$4 sm:$0xff]   ;;  %v4301_v37 = vld [vmem:[#allocation22 + $0x24] ss:$8 sps:$4 sm:$0xff]  }
0x1425   : > { %v2658_v39 = vmul.f32 1.442695, %v2657_v38  ;;  %v4299_v38 = vld [vmem:[#allocation22 + $0x20] ss:$8 sps:$4 sm:$0xff]  }
0x1426   : > { %v2667_v40 = vpop.permute.xlu0 %2666 }
0x1427   : > { %4361 = vpow2.f32 %v2658_v39  ;;  %3989 = vmatpush3.bf16.msra.mxu1 %v2667_v40 }
0x1428   : > { %4002 = vmatprep.subr.bf16.mxu1 %v4914_v3 }
0x1431   : > { %v4362_v41 = vpop.eup %4361 }
0x1432   : > { %v2660_v42 = vsel %vm2313_vm5, %v4362_v41, 0.0 }
0x1433   : > { %2661 = vadd.xlane.f32.xlu1 %v2660_v42  ;;  %v4304_v42 = vld [vmem:[#allocation22 + $0x34] ss:$8 sps:$4 sm:$0xff]  }
0x1444   : > { %2775 = vrot.lane.b32.xlu1 %v5677_v13, %s4919_s7  ;;  %v2774_v13 = vpop.permute.xlu0 %2773 }
0x14c0   : > { %v2662_v23 = vpop.xlane.xlu1 %2661 }
0x14c1   : > { %4363 = vrcp.f32 %v2662_v23  ;;  %v4307_v23 = vld [vmem:[#allocation22 + $0x44] ss:$8 sps:$4 sm:$0xff]  }
0x14c4   : > { %v2776_v48 = vpop.permute.xlu1 %2775 }
0x14c5   : > { %v2781_v50 = vsel %vm1266_vm2, %v2776_v48, 0  ;;  %v4308_v48 = vld [vmem:[#allocation22 + $0x50] ss:$8 sps:$4 sm:$0xff]  }
0x14cb   : > { %v4364_v44 = vpop.eup %4363 }
0x14cc   : > { %v2664_v47 = vmul.f32 %v4364_v44, %v4362_v41  ;;  %v4305_v44 = vld [vmem:[#allocation22 + $0x40] ss:$8 sps:$4 sm:$0xff]  }
0x14ce   : > { %v2665_v49 = vpack.c.bf16 %v2664_v47, %v2664_v47  ;;  %v4310_v47 = vld [vmem:[#allocation22 + $0x54] ss:$8 sps:$4 sm:$0xff]  }
0x14d0   : > { %3991 = vmatmul.mubr.msk.bf16.vlgmr.msra.gmra.mrb[44].mxu1 %vm2313_vm5, %v2665_v49  ;;  %v4313_v49 = vld [vmem:[#allocation22 + $0x64] ss:$8 sps:$4 sm:$0xff]  }
0x14d1   : > { %4003 = vmatpush3.bf16.xpose.msra.mxu1 %v2781_v50  ;;  %4004 = vmatprep.mubr.msk.bf16.mxu1 %vm4916_vm0, %v4914_v3  ;;  %v4311_v50 = vld [vmem:[#allocation22 + $0x60] ss:$8 sps:$4 sm:$0xff]  }
0x14d2   : > { %4014 = vmatprep.subr.bf16.mxu1 %v4914_v3 }
0x14d8   : > { %4005 = vmatmul.mubr.msk.bf16.vlgmr.msra.gmra.mrb[48].mxu1 %vm1266_vm2, %v2774_v13  ;;  %v4316_v13 = vld [vmem:[#allocation22 + $0x74] ss:$8 sps:$4 sm:$0xff]  }
0x14d9   : > { %4018 = vmatprep.mubr.msk.bf16.mxu1 %vm4916_vm0, %v4914_v3  ;;  %4015 = vmatpush3.bf16.msra.mxu1 %v4291_v8 }
0x14da   : > { %4016 = vmatprep.subr.bf16.mxu1 %v4914_v3 }
0x15a3   : > { %v2706_v52 = vpop.f32.mrb[44].mxu1 }
0x15a4   : > { %v2712_v53 = vpack.c.bf16 %v2706_v52, %v2706_v52  ;;  %v3992_v54 = vpop.f32.mrb[45].mxu1  ;;  %v4317_v52 = vld [vmem:[#allocation25 + $0x40] sm:$0xff]  }
0x15a5   : > { %v2709_v55 = vpop.f32.mrb[46].mxu1  ;;  %v4319_v54 = vld [vmem:[#allocation25 + $0x48] sm:$0xff]  }
0x15a6   : > { %v3993_v56 = vpop.f32.mrb[47].mxu1  ;;  %3999 = vmatmul.mubr.msk.bf16.vlgmr.msra.gmra.mrb[48].mxu0 %vm1266_vm2, %v2712_v53  ;;  %v4318_v53 = vld [vmem:[#allocation25] sm:$0xff]   ;;  %v4320_v55 = vld [vmem:[#allocation25 + $0x8] sm:$0xff]  }
0x15a7   : > { %4010 = vmatprep.mubr.msk.bf16.mxu0 %vm4916_vm0, %v4914_v3  ;;  %v4321_v56 = vld [vmem:[#allocation25 + $0x50] sm:$0xff]  }
0x15ab   : > { %v2817_v9 = vpop.f32.mrb[48].mxu1 }
0x15ac   : > { %v2823_v57 = vmul.f32 0.17677669, %v2817_v9  ;;  %v4006_v58 = vpop.f32.mrb[49].mxu1  ;;  %v4322_v9 = vld [vmem:[#allocation25 + $0x10] sm:$0xff]  }
0x15ad   : > { %v2820_v59 = vpop.f32.mrb[50].mxu1  ;;  %v4324_v58 = vld [vmem:[#allocation25 + $0x18] sm:$0xff]  }
0x15ae   : > { %v4007_v60 = vpop.f32.mrb[51].mxu1  ;;  %v2824_v61 = vadd.f32 %v5705_v28, %v2823_v57  ;;  %v4323_v57 = vld [vmem:[#allocation25 + $0x58] sm:$0xff]   ;;  %v4325_v59 = vld [vmem:[#allocation25 + $0x60] sm:$0xff]  }
0x15af   : > { %v4326_v60 = vld [vmem:[#allocation25 + $0x20] sm:$0xff]  }
0x15b0   : > { %v2825_v63 = vsel %vm2313_vm5, %v2824_v61, -inf }
0x15b1   : > { %2826 = vmax.xlane.f32.xlu1 %v2825_v63  ;;  %v4328_v63 = vld [vmem:[#allocation25 + $0x28] sm:$0xff]  }
0x163e   : > { %v2827_v1 = vpop.xlane.xlu1 %2826 }
0x163f   : > { %v2828_v4 = vsub.f32 %v2824_v61, %v2827_v1  ;;  %v4327_v61 = vld [vmem:[#allocation25 + $0x68] sm:$0xff]  }
0x1641   : > { %v2829_v5 = vmul.f32 1.442695, %v2828_v4 }
0x1643   : > { %4365 = vpow2.f32 %v2829_v5 }
0x164d   : > { %v4366_v6 = vpop.eup %4365 }
0x164e   : > { %v2831_v7 = vsel %vm2313_vm5, %v4366_v6, 0.0 }
0x164f   : > { %2832 = vadd.xlane.f32.xlu0 %v2831_v7  ;;  %v3688_v7 = vld [vmem:[#allocation19] ss:$0 sm:$0xff] }
0x1665   : > { %2837 = vrot.lane.b32.xlu0 %v5679_v14, %s4919_s7  ;;  %v4292_v14 = vld [vmem:[#allocation16 + $0x38] sm:$0xff]   ;;  %s5881_s7 = sld [smem:[#allocation52_spill]] }
0x1666   : > { %4017 = vmatpush3.bf16.msra.mxu1 %v4292_v14 }
0x1667   : > { %3800 = vmatprep.subr.bf16.mxu1 %v4317_v52 }
0x166b   : > { %s964_s11 = scalar_lea.vmem %s5881_s7, %s3588_s23 }
0x1679   : > { %v2766_v11 = vpop.f32.mrb[48].mxu0 }
0x167a   : > { %v2772_v28 = vadd.f32 %v2766_v11, %v5741_v27  ;;  %v4000_v12 = vpop.f32.mrb[49].mxu0  ;;  %v3689_v11 = vld [vmem:[#allocation21] ss:$0 sm:$0xff] }
0x167b   : > { %v2769_v10 = vpop.f32.mrb[50].mxu0 }
0x167c   : > { %v4001_v15 = vpop.f32.mrb[51].mxu0 }
0x167d   : > { %v4329_v15 = vld [vmem:[#allocation25 + $0x70] sm:$0xff]  }
0x16dc   : > { %v2833_v16 = vpop.xlane.xlu0 %2832 }
0x16dd   : > { %4367 = vrcp.f32 %v2833_v16  ;;  %v4330_v16 = vld [vmem:[#allocation25 + $0x30] sm:$0xff]  }
0x16e0   : > { %v2838_v17 = vpop.permute.xlu0 %2837 }
0x16e1   : > { %4009 = vmatpush3.bf16.msra.mxu0 %v2838_v17  ;;  %v4331_v17 = vld [vmem:[#allocation25 + $0x78] sm:$0xff]  }
0x16e2   : > { %3089 = vmatprep.subr.bf16.mxu0 %v4295_v62 }
0x16e7   : > { %v4368_v18 = vpop.eup %4367 }
0x16e8   : > { %v2835_v19 = vmul.f32 %v4368_v18, %v4366_v6  ;;  %v4332_v18 = vld [vmem:[#allocation25 + $0x38] sm:$0xff]  }
0x16ea   : > { %v2836_v21 = vpack.c.bf16 %v2835_v19, %v2835_v19  ;;  %v2997_v19 = vld [vmem:[#allocation24] sm:$0x3] }
0x16eb   : > { %v3006_v14 = vrot.slane %v2997_v19, %v5493_v45 }
0x16ec   : > { %4011 = vmatmul.mubr.msk.bf16.vlgmr.msra.gmra.mrb[52].mxu0 %vm2313_vm5, %v2836_v21  ;;  %v3002_v21 = vrot.slane %v2997_v19, %v5495_v46 }
0x16ed   : > { %3121 = vmatprep.mubr.bf16.mxu0 %v4915_v25  ;;  %v4293_v25 = vld [vmem:[#allocation22] ss:$8 sps:$4 sm:$0xff]  }
0x16ee   : > { %3090 = vmatpush1.bf16.msra.mxu0 %v4293_v25 }
0x16ef   : > { %3091 = vmatprep.subr.bf16.mxu0 %v4298_v35 }
0x16f2   : > { %3092 = vmatpush1.bf16.msra.mxu0 %v4296_v36 }
0x16f3   : > { %3093 = vmatprep.subr.bf16.mxu0 %v4301_v37 }
0x16f6   : > { %3094 = vmatpush1.bf16.msra.mxu0 %v4299_v38 }
0x16f7   : > { %3095 = vmatprep.subr.bf16.mxu0 %v4304_v42 }
0x16fa   : > { %3096 = vmatpush1.bf16.msra.mxu0 %v4302_v43 }
0x16fb   : > { %3097 = vmatprep.subr.bf16.mxu0 %v4307_v23 }
0x16fe   : > { %3098 = vmatpush1.bf16.msra.mxu0 %v4305_v44 }
0x16ff   : > { %3099 = vmatprep.subr.bf16.mxu0 %v4310_v47 }
0x1702   : > { %3100 = vmatpush1.bf16.msra.mxu0 %v4308_v48 }
0x1703   : > { %3101 = vmatprep.subr.bf16.mxu0 %v4313_v49 }
0x1706   : > { %3102 = vmatpush1.bf16.msra.mxu0 %v4311_v50 }
0x1707   : > { %3103 = vmatprep.subr.bf16.mxu0 %v4316_v13 }
0x170a   : > { %3104 = vmatpush1.bf16.msra.mxu0 %v4314_v51 }
0x17bf   : > { %v2877_v3 = vpop.f32.mrb[52].mxu0 }
0x17c0   : > { %v2883_v22 = vpack.c.bf16 %v2877_v3, %v2877_v3  ;;  %v4012_v24 = vpop.f32.mrb[53].mxu0 }
0x17c1   : > { %v2880_v0 = vpop.f32.mrb[54].mxu0 }
0x17c2   : > { %v4013_v26 = vpop.f32.mrb[55].mxu0  ;;  %4019 = vmatmul.mubr.msk.bf16.vlgmr.msra.gmra.mrb[52].mxu1 %vm1266_vm2, %v2883_v22 }
0x17c3   : > { %3801 = vmatpush3.bf16.msra.mxu1 %v4318_v53 }
0x17c4   : > { %3802 = vmatprep.subr.bf16.mxu1 %v4319_v54 }
0x17c7   : > { %3803 = vmatpush3.bf16.msra.mxu1 %v4320_v55 }
0x17c8   : > { %3804 = vmatprep.subr.bf16.mxu1 %v4321_v56 }
0x17cb   : > { %3805 = vmatpush3.bf16.msra.mxu1 %v4322_v9 }
0x17cc   : > { %3806 = vmatprep.subr.bf16.mxu1 %v4323_v57 }
0x17cf   : > { %3807 = vmatpush3.bf16.msra.mxu1 %v4324_v58 }
0x17d0   : > { %3808 = vmatprep.subr.bf16.mxu1 %v4325_v59 }
0x17d3   : > { %3809 = vmatpush3.bf16.msra.mxu1 %v4326_v60 }
0x17d4   : > { %3810 = vmatprep.subr.bf16.mxu1 %v4327_v61 }
0x17d7   : > { %3811 = vmatpush3.bf16.msra.mxu1 %v4328_v63 }
0x17d8   : > { %3812 = vmatprep.subr.bf16.mxu1 %v4329_v15 }
0x17db   : > { %3813 = vmatpush3.bf16.msra.mxu1 %v4330_v16 }
0x17dc   : > { %3814 = vmatprep.subr.bf16.mxu1 %v4331_v17 }
0x17df   : > { %3815 = vmatpush3.bf16.msra.mxu1 %v4332_v18 }
0x1895   : > { %v2937_v27 = vpop.f32.mrb[52].mxu1 }
0x1896   : > { %v2943_v29 = vadd.f32 %v2937_v27, %v2772_v28  ;;  %v4020_v2 = vpop.f32.mrb[53].mxu1 }
0x1897   : > { %v2940_v30 = vpop.f32.mrb[54].mxu1 }
0x1898   : > { %v2944_v32 = vadd.f32 %v2943_v29, %v5603_v20  ;;  %v4021_v33 = vpop.f32.mrb[55].mxu1 }
0x1899   : > { %v3706_v33 = vld [vmem:[#allocation27] ss:$0 sm:$0xff] }
0x189a   : > { %v5777_v34 = vadd.f32 %v3687_v31, %v2944_v32 }
0x189c   : > { %2955 = vadd.xlane.f32.xlu1 %v5777_v34 }
0x1929   : > { %v2956_v39 = vpop.xlane.xlu1 %2955 }
0x192a   : > { %v2957_v40 = vmul.f32 0.0078125, %v2956_v39 }
0x192c   : > { %v2958_v20 = vsub.f32 %v5777_v34, %v2957_v40 }
0x192e   : > { %v2959_v41 = vmul.f32 %v2958_v20, %v2958_v20 }
0x1930   : > { %2960 = vadd.xlane.f32.xlu1 %v2959_v41 }
0x19bd   : > { %v2961_v1 = vpop.xlane.xlu1 %2960 }
0x19be   : > { %v2962_v4 = vmul.f32 0.0078125, %v2961_v1 }
0x19c0   : > { %v2963_v5 = vadd.f32 1e-05, %v2962_v4 }
0x19c2   : > { %4369 = vrsqrt.f32 %v2963_v5 }
0x19cc   : > { %v4370_v6 = vpop.eup %4369 }
0x19cd   : > { %v2965_v8 = vmul.f32 %v4370_v6, %v2958_v20 }
0x19cf   : > { %v2972_v28 = vmul.f32 %v3688_v7, %v2965_v8 }
0x19d1   : > { %v2979_v12 = vadd.f32 %v3689_v11, %v2972_v28 }
0x19d3   : > { %v2980_v10 = vpack.c.bf16 %v2979_v12, %v2979_v12 }
0x19d5   : > { %3122 = vmatmul.mubr.bf16.vlgmr.msra.gmra.mrb[56].mxu0 %v2980_v10 }
0x1aa8   : > { %v3123_v3 = vpop.f32.mrb[56].mxu0 }
0x1aa9   : > { %v3124_v22 = vadd.f32 %v3123_v3, %v3002_v21  ;;  %v3125_v24 = vpop.f32.mrb[57].mxu0 }
0x1aaa   : > { %v3126_v0 = vadd.f32 %v3125_v24, %v3006_v14  ;;  %v3127_v26 = vpop.f32.mrb[58].mxu0 }
0x1aab   : > { %v3130_v27 = vmax.f32 %v3124_v22, 0.0  ;;  %v3128_v29 = vpop.f32.mrb[59].mxu0 }
0x1aac   : > { %v3131_v2 = vmax.f32 %v3126_v0, 0.0 }
0x1aad   : > { %v3132_v31 = vpack.c.bf16 %v3130_v27, %v3130_v27 }
0x1aae   : > { %v3133_v30 = vpack.c.bf16 %v3131_v2, %v3131_v2 }
0x1ab0   : > { %3301 = vmatprep.mubr.bf16.mxu1 %v3133_v30 }
0x1ab1   : > { %3302 = vmatmul.mubr.bf16.vlgmr.msra.gmra.mrb[56].mxu1 %v3132_v31 }
0x1b84   : > { %v3816_v32 = vpop.f32.mrb[56].mxu1 }
0x1b85   : > { %v3817_v25 = vpop.f32.mrb[57].mxu1 }
0x1b86   : > { %v3818_v62 = vadd.f32 %v3817_v25, %v3816_v32  ;;  %v3819_v46 = vpop.f32.mrb[58].mxu1 }
0x1b87   : > { %v3820_v35 = vpop.f32.mrb[59].mxu1 }
0x1b88   : > { %v3304_v45 = vadd.f32 %v3818_v62, %v3706_v33 }
0x1b8a   : > { %v3309_v36 = vadd.f32 %v3304_v45, %v5777_v34 }
0x1b8c   : > { %3310 = vst [vmem:[%s964_s11] sm:$0xff] %v3309_v36 }
0x1b8d PF: > { %s5882_s5 = sld [smem:[#allocation37_spill]] }
0x1b93   : > { %s42_s4 = sadd.s32 1, %s5882_s5  }
0x1b94   : > { %p39_p5 = scmp.ge.s32.totalorder %s42_s4, 4  }
0x1b96   :  { %41 = sbr.rel (!%p39_p5) target bundleno = 24 (0x18), region = 217 }
0x1b9d   :  { %3330 = vsyncpa [#allocation3], 1 }
0x1b9e   :  { %3332 = vsyncpa [#allocation3 + $0x1], 1 }
0x1b9f   :  { %3333 = vsyncpa [#allocation5], 1 }
0x1ba0   :  { %3334 = vsyncpa [#allocation8], 1 }
0x1ba1   :  { %3335 = vsyncpa [#allocation11], 1 }
0x1ba2   :  { %3336 = vsyncpa [#allocation14], 1 }
0x1ba3   :  { %3337 = vsyncpa [#allocation17], 1 }
0x1ba4   :  { %3338 = vsyncpa [#allocation20], 1 }
0x1ba5   :  { %3339 = vsyncpa [#allocation23], 1 }
0x1ba6   :  { %3340 = vsyncpa [#allocation26], 1 }

</bundles_post_ra>
